<compile_context>
chip_gen: v7x
topology: tpu7x:2x2x1
jax: 0.10.0
libtpu: 0.0.40
codegen_flags: <defaults>
</compile_context>

<pallas_src>
import jax
import jax.numpy as jnp
from jax.experimental import pallas as pl
from jax.experimental.pallas import tpu as pltpu


def fire_kernel(x_top_ref, x_mid_ref, x_bot_ref, ws_ref, bs_ref, wc_ref, bc_ref,
                o_ref, s_buf):
    # x_top_ref: (1, Cin, W)   bf16  halo row above the tile (clamped at border)
    # x_mid_ref: (1, Cin, TH*W) bf16 the tile's rows, spatially flattened on lanes
    # x_bot_ref: (1, Cin, W)   bf16  halo row below the tile (clamped at border)
    # ws_ref:    (Sp, Cin)     bf16  squeeze 1x1 weight (S zero-padded to Sp)
    # bs_ref:    (Sp, 1)       f32   squeeze bias
    # wc_ref:    (E, 9*Sp)     bf16  combined expand weight, column order
    #                                (kh, kw, s); expand1x1 lives in the centre tap
    # bc_ref:    (E, 1)        f32   combined expand bias
    # o_ref:     (1, E, TH*W)  bf16
    # s_buf:     (Sp, 256 + (TH+2)*W) bf16 VMEM scratch (128 pad lanes each side)
    W = x_top_ref.shape[2]                 # image width (lane-resident)
    n = x_mid_ref.shape[2]                 # TH * W output pixels in this tile
    Sp = ws_ref.shape[0]
    E = wc_ref.shape[0]
    PAD = 128                              # left pad -> centre taps are lane-aligned
    cdt = ws_ref.dtype                     # bf16 compute dtype for MXU operands

    h_idx = pl.program_id(1)
    n_h = pl.num_programs(1)

    def squeeze(x_cm):                     # (Cin, m) bf16 -> (Sp, m) bf16, relu'd
        acc = jnp.dot(ws_ref[...], x_cm, preferred_element_type=jnp.float32)
        return jnp.maximum(acc + bs_ref[...], 0.0).astype(cdt)

    # The tile's own rows (always needed), written as an aligned slice.
    s_buf[:, PAD + W:PAD + W + n] = squeeze(x_mid_ref[0])

    # Top halo row: zeros at the true image border (conv zero padding), else the
    # squeeze of the clamped row fetched above the tile.  pl.when keeps the
    # common interior path select-free and skips the wasted border matmul.
    @pl.when(h_idx == 0)
    def _():
        s_buf[:, PAD:PAD + W] = jnp.zeros((Sp, W), cdt)

    @pl.when(h_idx > 0)
    def _():
        s_buf[:, PAD:PAD + W] = squeeze(x_top_ref[0])

    # Bottom halo row, same treatment.
    @pl.when(h_idx == n_h - 1)
    def _():
        s_buf[:, PAD + W + n:PAD + 2 * W + n] = jnp.zeros((Sp, W), cdt)

    @pl.when(h_idx < n_h - 1)
    def _():
        s_buf[:, PAD + W + n:PAD + 2 * W + n] = squeeze(x_bot_ref[0])

    # Column masks for the horizontal +-1 taps (left / right zero padding).
    # Also masks the (never-written) scratch pad lanes that those taps touch.
    col = jax.lax.broadcasted_iota(jnp.int32, (1, n), 1) % W
    left_ok = col >= 1
    right_ok = col < (W - 1)
    zero_tap = jnp.zeros((Sp, n), cdt)

    # Expand conv as 3 per-kh matmuls (K = 3*Sp) accumulated in f32: only one
    # row of taps is live at a time; centre taps are aligned slices; expand1x1
    # is folded into the centre tap's weight columns, so the output is already
    # channel-concatenated [expand1x1 | expand3x3].
    acc = None
    for kh in range(3):
        base = PAD + kh * W
        center = s_buf[:, base:base + n]
        left = jnp.where(left_ok, s_buf[:, base - 1:base - 1 + n], zero_tap)
        right = jnp.where(right_ok, s_buf[:, base + 1:base + 1 + n], zero_tap)
        tap3 = jnp.concatenate([left, center, right], axis=0)     # (3*Sp, n) bf16
        part = jnp.dot(wc_ref[:, kh * 3 * Sp:(kh + 1) * 3 * Sp], tap3,
                       preferred_element_type=jnp.float32)
        acc = part if acc is None else acc + part

    out = jnp.maximum(acc + bc_ref[...], 0.0)                     # (E, n) f32
    o_ref[...] = out.astype(o_ref.dtype).reshape(1, E, n)


def fire_forward(x_nchw, params, *, tile_h=None, out_dtype=jnp.bfloat16):
    """x_nchw: (B, Cin, H, W).  Returns (B, E1+E3, H, W) in `out_dtype`."""
    ws, bs, wc, bc = params["ws"], params["bs"], params["wc"], params["bc"]
    B, Cin, H, W = x_nchw.shape
    Sp = ws.shape[0]
    E = wc.shape[0]
    assert wc.shape[1] == 9 * Sp
    # TODO(synk): support ragged W (not a multiple of the 128-lane width).
    assert W % 128 == 0, "W must be a multiple of the 128-lane width"

    # Generation-aware tiling: v7x has 64 MiB VMEM per TensorCore -> small tiles
    # and a tight limit; v5e/v6e (128 MiB) -> tall tiles (less halo re-squeeze
    # and fewer per-step pipeline overheads) and a generous limit.
    try:
        vmem_cap = pltpu.get_tpu_info().vmem_capacity_bytes
    except Exception:  # interpret mode / older runtimes
        vmem_cap = 128 * 1024 * 1024
    if vmem_cap <= 64 * 1024 * 1024:
        default_tile_h, vmem_limit = 4, 40 * 1024 * 1024
    else:
        default_tile_h, vmem_limit = 16, 96 * 1024 * 1024
    if tile_h is None:
        tile_h = default_tile_h
    tile_h = max(1, min(tile_h, H))
    while H % tile_h:                      # fall back to a divisor of H
        tile_h -= 1
    n_h = H // tile_h
    HW = H * W

    # Free reshape (NCHW is already channel-major) + bf16 cast: half the DMA
    # bytes and half the double-buffered input blocks.
    x_flat = x_nchw.reshape(B, Cin, HW).astype(ws.dtype)

    cost = pl.CostEstimate(
        flops=2 * B * H * W * (Sp * Cin + 9 * Sp * E),
        transcendentals=0,
        bytes_accessed=(B * Cin * HW * 2 + B * E * HW * jnp.dtype(out_dtype).itemsize
                        + int(ws.size) * 2 + int(wc.size) * 2
                        + int(bs.size) * 4 + int(bc.size) * 4),
    )

    out_flat = pl.pallas_call(
        fire_kernel,
        out_shape=jax.ShapeDtypeStruct((B, E, HW), out_dtype),
        grid_spec=pltpu.PrefetchScalarGridSpec(
            num_scalar_prefetch=0,
            grid=(B, n_h),
            in_specs=[
                # halo row above the tile (row index clamped at the top border)
                pl.BlockSpec((1, Cin, W),
                             lambda b, h: (b, 0, jnp.maximum(h * tile_h - 1, 0))),
                # the tile itself: tile_h rows, spatially flattened on lanes
                pl.BlockSpec((1, Cin, tile_h * W), lambda b, h: (b, 0, h)),
                # halo row below the tile (row index clamped at the bottom border)
                pl.BlockSpec((1, Cin, W),
                             lambda b, h: (b, 0, jnp.minimum((h + 1) * tile_h, H - 1))),
                # resident weights / biases (constant index maps)
                pl.BlockSpec((Sp, Cin), lambda b, h: (0, 0)),
                pl.BlockSpec((Sp, 1), lambda b, h: (0, 0)),
                pl.BlockSpec((E, 9 * Sp), lambda b, h: (0, 0)),
                pl.BlockSpec((E, 1), lambda b, h: (0, 0)),
            ],
            out_specs=pl.BlockSpec((1, E, tile_h * W), lambda b, h: (b, 0, h)),
            scratch_shapes=[
                # squeeze map for tile_h+2 rows, 128 zero-pad lanes on each side
                pltpu.VMEM((Sp, 256 + (tile_h + 2) * W), ws.dtype),
            ],
        ),
        compiler_params=pltpu.CompilerParams(
            dimension_semantics=("parallel", "parallel"),
            vmem_limit_bytes=vmem_limit,
        ),
        cost_estimate=cost,
    )(x_flat, x_flat, x_flat, ws, bs, wc, bc)

    return out_flat.reshape(B, E, H, W)


def init_fire_torch_params(key, inplanes, squeeze_planes, expand1x1_planes, expand3x3_planes):
    """Random parameters in the PyTorch Conv2d layouts."""
    ks = jax.random.split(key, 6)
    return dict(
        squeeze_w=0.2 * jax.random.normal(ks[0], (squeeze_planes, inplanes), jnp.float32),
        squeeze_b=0.1 * jax.random.normal(ks[1], (squeeze_planes,), jnp.float32),
        expand1x1_w=0.2 * jax.random.normal(ks[2], (expand1x1_planes, squeeze_planes), jnp.float32),
        expand1x1_b=0.1 * jax.random.normal(ks[3], (expand1x1_planes,), jnp.float32),
        expand3x3_w=0.2 * jax.random.normal(ks[4], (expand3x3_planes, squeeze_planes, 3, 3), jnp.float32),
        expand3x3_b=0.1 * jax.random.normal(ks[5], (expand3x3_planes,), jnp.float32),
    )


def prepare_fire_params(tp, compute_dtype=jnp.bfloat16, s_pad_multiple=16):
    """Build kernel-layout weights from torch-layout params (done once, offline).

    S is zero-padded to a multiple of 16 (bf16 sublane packing) so the in-kernel
    tap concatenation along sublanes is aligned.  Real SalsaNext expand widths
    (128/256/384/512) are already multiples of 128.
    """
    w_sq, b_sq = tp["squeeze_w"], tp["squeeze_b"]          # (S, Cin), (S,)
    w_e1, b_e1 = tp["expand1x1_w"], tp["expand1x1_b"]      # (E1, S), (E1,)
    w_e3, b_e3 = tp["expand3x3_w"], tp["expand3x3_b"]      # (E3, S, 3, 3), (E3,)
    S, Cin = w_sq.shape
    E1, E3 = w_e1.shape[0], w_e3.shape[0]
    Sp = ((S + s_pad_multiple - 1) // s_pad_multiple) * s_pad_multiple

    # Padded squeeze weight/bias: padded rows give relu(0) = 0 activations.
    ws = jnp.zeros((Sp, Cin), jnp.float32).at[:S].set(w_sq)
    bs = jnp.zeros((Sp,), jnp.float32).at[:S].set(b_sq)

    # Combined expand weight over 9*Sp columns ordered (kh, kw, s); expand1x1
    # lives only in the centre tap (kh=kw=1) so its semantics are exact.
    w_e3_p = jnp.zeros((E3, Sp, 3, 3), jnp.float32).at[:, :S].set(w_e3)
    wc = jnp.zeros((E1 + E3, 9 * Sp), jnp.float32)
    wc = wc.at[:E1, 4 * Sp:4 * Sp + S].set(w_e1)
    wc = wc.at[E1:, :].set(jnp.transpose(w_e3_p, (0, 2, 3, 1)).reshape(E3, 9 * Sp))
    # TODO(synk): optionally pad E1+E3 to an MXU-friendly multiple when a fire
    # layer's expand width is not already a multiple of 128.

    return dict(
        ws=ws.astype(compute_dtype),
        bs=bs.reshape(Sp, 1).astype(jnp.float32),
        wc=wc.astype(compute_dtype),
        bc=jnp.concatenate([b_e1, b_e3]).reshape(E1 + E3, 1).astype(jnp.float32),
    )


def fire_reference(x_nchw, tp):
    """Pure-JAX (f32 lax convs) reference matching the PyTorch Fire.forward."""
    dn = ("NCHW", "OIHW", "NCHW")

    def conv(x, w_oihw, b, pad):
        y = jax.lax.conv_general_dilated(
            x, w_oihw, (1, 1), pad, dimension_numbers=dn,
            precision=jax.lax.Precision.HIGHEST)
        return y + b.reshape(1, -1, 1, 1)

    s = jax.nn.relu(conv(x_nchw, tp["squeeze_w"][:, :, None, None], tp["squeeze_b"], "VALID"))
    e1 = jax.nn.relu(conv(s, tp["expand1x1_w"][:, :, None, None], tp["expand1x1_b"], "VALID"))
    e3 = jax.nn.relu(conv(s, tp["expand3x3_w"], tp["expand3x3_b"], "SAME"))
    return jnp.concatenate([e1, e3], axis=1)


if __name__ == "__main__":
    key = jax.random.PRNGKey(0)
    k_x, k_p = jax.random.split(key)

    # Small shapes consistent with the module: a thin range-image slab
    # (W kept at the minimal 128-lane width).
    B, Cin, H, W = 2, 4, 16, 128
    squeeze_planes, expand1x1_planes, expand3x3_planes = 8, 8, 8

    x = jax.random.normal(k_x, (B, Cin, H, W), jnp.float32)
    torch_params = init_fire_torch_params(
        k_p, Cin, squeeze_planes, expand1x1_planes, expand3x3_planes)
    params = prepare_fire_params(torch_params)          # bf16 MXU operands

    out = fire_forward(x, params)
    out = jax.block_until_ready(out)

    ref = fire_reference(x, torch_params)
    assert out.shape == (B, expand1x1_planes + expand3x3_planes, H, W), out.shape
    out_f32 = out.astype(jnp.float32)
    max_err = float(jnp.max(jnp.abs(out_f32 - ref)))
    # bf16 activations / weights / output -> tolerances looser than an all-f32 check.
    assert jnp.allclose(out_f32, ref, rtol=5e-2, atol=5e-2), max_err

    print("KERNEL_OK")
</pallas_src>

<mosaic_0001>
module attributes {stable_mosaic.version = 11 : i64} {
  func.func @fire_kernel(%arg0: i32, %arg1: i32, %arg2: memref<1x4x128xbf16, #tpu.memory_space<vmem>>, %arg3: memref<1x4x2048xbf16, #tpu.memory_space<vmem>>, %arg4: memref<1x4x128xbf16, #tpu.memory_space<vmem>>, %arg5: memref<16x4xbf16, #tpu.memory_space<vmem>>, %arg6: memref<16x1xf32, #tpu.memory_space<vmem>>, %arg7: memref<16x144xbf16, #tpu.memory_space<vmem>>, %arg8: memref<16x1xf32, #tpu.memory_space<vmem>>, %arg9: memref<1x16x2048xbf16, #tpu.memory_space<vmem>>, %arg10: memref<16x2560xbf16, #tpu.memory_space<vmem>>) attributes {dimension_semantics = [#tpu.dimension_semantics<parallel>, #tpu.dimension_semantics<parallel>], iteration_bounds = array<i64: 2, 1>, scalar_prefetch = 0 : i64, scratch_operands = 1 : i64, tpu.core_type = #tpu.core_type<tc>, window_params = [{transform_indices = @transform_0, window_bounds = array<i64: 1, 4, 128>}, {transform_indices = @transform_1, window_bounds = array<i64: 1, 4, 2048>}, {transform_indices = @transform_2, window_bounds = array<i64: 1, 4, 128>}, {pipeline_mode = #tpu.pipeline_mode<synchronous>, transform_indices = @transform_3, window_bounds = array<i64: 16, 4>}, {pipeline_mode = #tpu.pipeline_mode<synchronous>, transform_indices = @transform_4, window_bounds = array<i64: 16, 1>}, {pipeline_mode = #tpu.pipeline_mode<synchronous>, transform_indices = @transform_5, window_bounds = array<i64: 16, 144>}, {pipeline_mode = #tpu.pipeline_mode<synchronous>, transform_indices = @transform_6, window_bounds = array<i64: 16, 1>}, {transform_indices = @transform_7, window_bounds = array<i64: 1, 16, 2048>}]} {
    %c0 = arith.constant 0 : index
    %c0_0 = arith.constant 0 : index
    %c0_1 = arith.constant 0 : index
    %0 = vector.load %arg3[%c0, %c0_0, %c0_1] : memref<1x4x2048xbf16, #tpu.memory_space<vmem>>, vector<1x4x2048xbf16>
    %1 = vector.shape_cast %0 : vector<1x4x2048xbf16> to vector<4x2048xbf16>
    %c0_2 = arith.constant 0 : index
    %c0_3 = arith.constant 0 : index
    %2 = vector.load %arg5[%c0_2, %c0_3] : memref<16x4xbf16, #tpu.memory_space<vmem>>, vector<16x4xbf16>
    %cst = arith.constant dense<0.000000e+00> : vector<16x2048xf32>
    %3 = tpu.matmul %2, %1, %cst {dimension_numbers = #tpu.dot_dimension_numbers<[1], [0], [0], [1], [0, 0, 1, 1], [], []>} : vector<16x4xbf16>, vector<4x2048xbf16>, vector<16x2048xf32> -> vector<16x2048xf32>
    %c0_4 = arith.constant 0 : index
    %c0_5 = arith.constant 0 : index
    %4 = vector.load %arg6[%c0_4, %c0_5] : memref<16x1xf32, #tpu.memory_space<vmem>>, vector<16x1xf32>
    %5 = vector.broadcast %4 : vector<16x1xf32> to vector<16x2048xf32>
    %6 = arith.addf %3, %5 : vector<16x2048xf32>
    %cst_6 = arith.constant 0.000000e+00 : f32
    %7 = vector.broadcast %cst_6 : f32 to vector<16x2048xf32>
    %8 = arith.maximumf %6, %7 : vector<16x2048xf32>
    %9 = arith.truncf %8 : vector<16x2048xf32> to vector<16x2048xbf16>
    %c0_7 = arith.constant 0 : index
    %c256 = arith.constant 256 : index
    %10 = vector.load %arg10[%c0_7, %c256] : memref<16x2560xbf16, #tpu.memory_space<vmem>>, vector<16x2048xbf16>
    tpu.vector_store %arg10[%c0_7, %c256], %9 {strides = array<i32>} : memref<16x2560xbf16, #tpu.memory_space<vmem>>, vector<16x2048xbf16>,
    %c0_i32 = arith.constant 0 : i32
    %11 = arith.cmpi eq, %arg1, %c0_i32 : i32
    %12 = arith.extui %11 : i1 to i32
    %c0_i32_8 = arith.constant 0 : i32
    %13 = arith.cmpi ne, %12, %c0_i32_8 : i32
    scf.if %13 {
      %cst_44 = arith.constant 0.000000e+00 : bf16
      %91 = vector.broadcast %cst_44 : bf16 to vector<16x128xbf16>
      %c0_45 = arith.constant 0 : index
      %c128_46 = arith.constant 128 : index
      %92 = vector.load %arg10[%c0_45, %c128_46] : memref<16x2560xbf16, #tpu.memory_space<vmem>>, vector<16x128xbf16>
      tpu.vector_store %arg10[%c0_45, %c128_46], %91 {strides = array<i32>} : memref<16x2560xbf16, #tpu.memory_space<vmem>>, vector<16x128xbf16>,
    } else {
    }
    %c0_i32_9 = arith.constant 0 : i32
    %14 = arith.cmpi sgt, %arg1, %c0_i32_9 : i32
    %15 = arith.extui %14 : i1 to i32
    %c0_i32_10 = arith.constant 0 : i32
    %16 = arith.cmpi ne, %15, %c0_i32_10 : i32
    scf.if %16 {
      %c0_44 = arith.constant 0 : index
      %c0_45 = arith.constant 0 : index
      %c0_46 = arith.constant 0 : index
      %91 = vector.load %arg2[%c0_44, %c0_45, %c0_46] : memref<1x4x128xbf16, #tpu.memory_space<vmem>>, vector<1x4x128xbf16>
      %92 = vector.shape_cast %91 : vector<1x4x128xbf16> to vector<4x128xbf16>
      %c0_47 = arith.constant 0 : index
      %c0_48 = arith.constant 0 : index
      %93 = vector.load %arg5[%c0_47, %c0_48] : memref<16x4xbf16, #tpu.memory_space<vmem>>, vector<16x4xbf16>
      %cst_49 = arith.constant dense<0.000000e+00> : vector<16x128xf32>
      %94 = tpu.matmul %93, %92, %cst_49 {dimension_numbers = #tpu.dot_dimension_numbers<[1], [0], [0], [1], [0, 0, 1, 1], [], []>} : vector<16x4xbf16>, vector<4x128xbf16>, vector<16x128xf32> -> vector<16x128xf32>
      %c0_50 = arith.constant 0 : index
      %c0_51 = arith.constant 0 : index
      %95 = vector.load %arg6[%c0_50, %c0_51] : memref<16x1xf32, #tpu.memory_space<vmem>>, vector<16x1xf32>
      %96 = vector.broadcast %95 : vector<16x1xf32> to vector<16x128xf32>
      %97 = arith.addf %94, %96 : vector<16x128xf32>
      %cst_52 = arith.constant 0.000000e+00 : f32
      %98 = vector.broadcast %cst_52 : f32 to vector<16x128xf32>
      %99 = arith.maximumf %97, %98 : vector<16x128xf32>
      %100 = arith.truncf %99 : vector<16x128xf32> to vector<16x128xbf16>
      %c0_53 = arith.constant 0 : index
      %c128_54 = arith.constant 128 : index
      %101 = vector.load %arg10[%c0_53, %c128_54] : memref<16x2560xbf16, #tpu.memory_space<vmem>>, vector<16x128xbf16>
      tpu.vector_store %arg10[%c0_53, %c128_54], %100 {strides = array<i32>} : memref<16x2560xbf16, #tpu.memory_space<vmem>>, vector<16x128xbf16>,
    } else {
    }
    %c0_i32_11 = arith.constant 0 : i32
    %17 = arith.cmpi eq, %arg1, %c0_i32_11 : i32
    %18 = arith.extui %17 : i1 to i32
    %c0_i32_12 = arith.constant 0 : i32
    %19 = arith.cmpi ne, %18, %c0_i32_12 : i32
    scf.if %19 {
      %cst_44 = arith.constant 0.000000e+00 : bf16
      %91 = vector.broadcast %cst_44 : bf16 to vector<16x128xbf16>
      %c0_45 = arith.constant 0 : index
      %c2304 = arith.constant 2304 : index
      %92 = vector.load %arg10[%c0_45, %c2304] : memref<16x2560xbf16, #tpu.memory_space<vmem>>, vector<16x128xbf16>
      tpu.vector_store %arg10[%c0_45, %c2304], %91 {strides = array<i32>} : memref<16x2560xbf16, #tpu.memory_space<vmem>>, vector<16x128xbf16>,
    } else {
    }
    %c0_i32_13 = arith.constant 0 : i32
    %20 = arith.cmpi slt, %arg1, %c0_i32_13 : i32
    %21 = arith.extui %20 : i1 to i32
    %c0_i32_14 = arith.constant 0 : i32
    %22 = arith.cmpi ne, %21, %c0_i32_14 : i32
    scf.if %22 {
      %c0_44 = arith.constant 0 : index
      %c0_45 = arith.constant 0 : index
      %c0_46 = arith.constant 0 : index
      %91 = vector.load %arg4[%c0_44, %c0_45, %c0_46] : memref<1x4x128xbf16, #tpu.memory_space<vmem>>, vector<1x4x128xbf16>
      %92 = vector.shape_cast %91 : vector<1x4x128xbf16> to vector<4x128xbf16>
      %c0_47 = arith.constant 0 : index
      %c0_48 = arith.constant 0 : index
      %93 = vector.load %arg5[%c0_47, %c0_48] : memref<16x4xbf16, #tpu.memory_space<vmem>>, vector<16x4xbf16>
      %cst_49 = arith.constant dense<0.000000e+00> : vector<16x128xf32>
      %94 = tpu.matmul %93, %92, %cst_49 {dimension_numbers = #tpu.dot_dimension_numbers<[1], [0], [0], [1], [0, 0, 1, 1], [], []>} : vector<16x4xbf16>, vector<4x128xbf16>, vector<16x128xf32> -> vector<16x128xf32>
      %c0_50 = arith.constant 0 : index
      %c0_51 = arith.constant 0 : index
      %95 = vector.load %arg6[%c0_50, %c0_51] : memref<16x1xf32, #tpu.memory_space<vmem>>, vector<16x1xf32>
      %96 = vector.broadcast %95 : vector<16x1xf32> to vector<16x128xf32>
      %97 = arith.addf %94, %96 : vector<16x128xf32>
      %cst_52 = arith.constant 0.000000e+00 : f32
      %98 = vector.broadcast %cst_52 : f32 to vector<16x128xf32>
      %99 = arith.maximumf %97, %98 : vector<16x128xf32>
      %100 = arith.truncf %99 : vector<16x128xf32> to vector<16x128xbf16>
      %c0_53 = arith.constant 0 : index
      %c2304 = arith.constant 2304 : index
      %101 = vector.load %arg10[%c0_53, %c2304] : memref<16x2560xbf16, #tpu.memory_space<vmem>>, vector<16x128xbf16>
      tpu.vector_store %arg10[%c0_53, %c2304], %100 {strides = array<i32>} : memref<16x2560xbf16, #tpu.memory_space<vmem>>, vector<16x128xbf16>,
    } else {
    }
    %23 = tpu.iota {dimensions = array<i32: 1>} : vector<1x2048xi32>
    %c128_i32 = arith.constant 128 : i32
    %c0_i32_15 = arith.constant 0 : i32
    %24 = arith.cmpi eq, %c128_i32, %c0_i32_15 : i32
    %c1_i32 = arith.constant 1 : i32
    %25 = arith.select %24, %c1_i32, %c128_i32 : i32
    %26 = vector.broadcast %25 : i32 to vector<1x2048xi32>
    %27 = arith.remsi %23, %26 : vector<1x2048xi32>
    %c0_i32_16 = arith.constant 0 : i32
    %28 = vector.broadcast %c0_i32_16 : i32 to vector<1x2048xi32>
    %29 = arith.cmpi ne, %27, %28 : vector<1x2048xi32>
    %c0_i32_17 = arith.constant 0 : i32
    %30 = vector.broadcast %c0_i32_17 : i32 to vector<1x2048xi32>
    %31 = arith.cmpi slt, %27, %30 : vector<1x2048xi32>
    %c0_i32_18 = arith.constant 0 : i32
    %32 = arith.cmpi slt, %25, %c0_i32_18 : i32
    %33 = vector.broadcast %32 : i1 to vector<1x2048xi1>
    %34 = vector.broadcast %33 : vector<1x2048xi1> to vector<1x2048xi1>
    %35 = arith.xori %31, %34 : vector<1x2048xi1>
    %36 = arith.andi %35, %29 : vector<1x2048xi1>
    %37 = vector.broadcast %25 : i32 to vector<1x2048xi32>
    %38 = arith.addi %27, %37 : vector<1x2048xi32>
    %39 = arith.select %36, %38, %27 : vector<1x2048xi1>, vector<1x2048xi32>
    %c1_i32_19 = arith.constant 1 : i32
    %40 = vector.broadcast %c1_i32_19 : i32 to vector<1x2048xi32>
    %41 = arith.cmpi sge, %39, %40 : vector<1x2048xi32>
    %c127_i32 = arith.constant 127 : i32
    %42 = vector.broadcast %c127_i32 : i32 to vector<1x2048xi32>
    %43 = arith.cmpi slt, %39, %42 : vector<1x2048xi32>
    %cst_20 = arith.constant 0.000000e+00 : bf16
    %44 = vector.broadcast %cst_20 : bf16 to vector<16x2048xbf16>
    %c0_21 = arith.constant 0 : index
    %c128 = arith.constant 128 : index
    %45 = vector.load %arg10[%c0_21, %c128] : memref<16x2560xbf16, #tpu.memory_space<vmem>>, vector<16x2048xbf16>
    %c0_22 = arith.constant 0 : index
    %c127 = arith.constant 127 : index
    %46 = vector.load %arg10[%c0_22, %c127] : memref<16x2560xbf16, #tpu.memory_space<vmem>>, vector<16x2048xbf16>
    %47 = vector.shape_cast %41 : vector<1x2048xi1> to vector<1x2048xi1>
    %48 = vector.broadcast %47 : vector<1x2048xi1> to vector<16x2048xi1>
    %49 = arith.select %48, %46, %44 : vector<16x2048xi1>, vector<16x2048xbf16>
    %c0_23 = arith.constant 0 : index
    %c129 = arith.constant 129 : index
    %50 = vector.load %arg10[%c0_23, %c129] : memref<16x2560xbf16, #tpu.memory_space<vmem>>, vector<16x2048xbf16>
    %51 = vector.shape_cast %43 : vector<1x2048xi1> to vector<1x2048xi1>
    %52 = vector.broadcast %51 : vector<1x2048xi1> to vector<16x2048xi1>
    %53 = arith.select %52, %50, %44 : vector<16x2048xi1>, vector<16x2048xbf16>
    %54 = tpu.concatenate %49, %45, %53 in 0 : vector<16x2048xbf16>, vector<16x2048xbf16>, vector<16x2048xbf16> -> vector<48x2048xbf16>
    %c0_24 = arith.constant 0 : index
    %c0_25 = arith.constant 0 : index
    %55 = vector.load %arg7[%c0_24, %c0_25] : memref<16x144xbf16, #tpu.memory_space<vmem>>, vector<16x48xbf16>
    %cst_26 = arith.constant dense<0.000000e+00> : vector<16x2048xf32>
    %56 = tpu.matmul %55, %54, %cst_26 {dimension_numbers = #tpu.dot_dimension_numbers<[1], [0], [0], [1], [0, 0, 1, 1], [], []>} : vector<16x48xbf16>, vector<48x2048xbf16>, vector<16x2048xf32> -> vector<16x2048xf32>
    %c0_27 = arith.constant 0 : index
    %c256_28 = arith.constant 256 : index
    %57 = vector.load %arg10[%c0_27, %c256_28] : memref<16x2560xbf16, #tpu.memory_space<vmem>>, vector<16x2048xbf16>
    %c0_29 = arith.constant 0 : index
    %c255 = arith.constant 255 : index
    %58 = vector.load %arg10[%c0_29, %c255] : memref<16x2560xbf16, #tpu.memory_space<vmem>>, vector<16x2048xbf16>
    %59 = vector.shape_cast %41 : vector<1x2048xi1> to vector<1x2048xi1>
    %60 = vector.broadcast %59 : vector<1x2048xi1> to vector<16x2048xi1>
    %61 = arith.select %60, %58, %44 : vector<16x2048xi1>, vector<16x2048xbf16>
    %c0_30 = arith.constant 0 : index
    %c257 = arith.constant 257 : index
    %62 = vector.load %arg10[%c0_30, %c257] : memref<16x2560xbf16, #tpu.memory_space<vmem>>, vector<16x2048xbf16>
    %63 = vector.shape_cast %43 : vector<1x2048xi1> to vector<1x2048xi1>
    %64 = vector.broadcast %63 : vector<1x2048xi1> to vector<16x2048xi1>
    %65 = arith.select %64, %62, %44 : vector<16x2048xi1>, vector<16x2048xbf16>
    %66 = tpu.concatenate %61, %57, %65 in 0 : vector<16x2048xbf16>, vector<16x2048xbf16>, vector<16x2048xbf16> -> vector<48x2048xbf16>
    %c0_31 = arith.constant 0 : index
    %c48 = arith.constant 48 : index
    %67 = vector.load %arg7[%c0_31, %c48] : memref<16x144xbf16, #tpu.memory_space<vmem>>, vector<16x48xbf16>
    %cst_32 = arith.constant dense<0.000000e+00> : vector<16x2048xf32>
    %68 = tpu.matmul %67, %66, %cst_32 {dimension_numbers = #tpu.dot_dimension_numbers<[1], [0], [0], [1], [0, 0, 1, 1], [], []>} : vector<16x48xbf16>, vector<48x2048xbf16>, vector<16x2048xf32> -> vector<16x2048xf32>
    %69 = arith.addf %56, %68 : vector<16x2048xf32>
    %c0_33 = arith.constant 0 : index
    %c384 = arith.constant 384 : index
    %70 = vector.load %arg10[%c0_33, %c384] : memref<16x2560xbf16, #tpu.memory_space<vmem>>, vector<16x2048xbf16>
    %c0_34 = arith.constant 0 : index
    %c383 = arith.constant 383 : index
    %71 = vector.load %arg10[%c0_34, %c383] : memref<16x2560xbf16, #tpu.memory_space<vmem>>, vector<16x2048xbf16>
    %72 = vector.shape_cast %41 : vector<1x2048xi1> to vector<1x2048xi1>
    %73 = vector.broadcast %72 : vector<1x2048xi1> to vector<16x2048xi1>
    %74 = arith.select %73, %71, %44 : vector<16x2048xi1>, vector<16x2048xbf16>
    %c0_35 = arith.constant 0 : index
    %c385 = arith.constant 385 : index
    %75 = vector.load %arg10[%c0_35, %c385] : memref<16x2560xbf16, #tpu.memory_space<vmem>>, vector<16x2048xbf16>
    %76 = vector.shape_cast %43 : vector<1x2048xi1> to vector<1x2048xi1>
    %77 = vector.broadcast %76 : vector<1x2048xi1> to vector<16x2048xi1>
    %78 = arith.select %77, %75, %44 : vector<16x2048xi1>, vector<16x2048xbf16>
    %79 = tpu.concatenate %74, %70, %78 in 0 : vector<16x2048xbf16>, vector<16x2048xbf16>, vector<16x2048xbf16> -> vector<48x2048xbf16>
    %c0_36 = arith.constant 0 : index
    %c96 = arith.constant 96 : index
    %80 = vector.load %arg7[%c0_36, %c96] : memref<16x144xbf16, #tpu.memory_space<vmem>>, vector<16x48xbf16>
    %cst_37 = arith.constant dense<0.000000e+00> : vector<16x2048xf32>
    %81 = tpu.matmul %80, %79, %cst_37 {dimension_numbers = #tpu.dot_dimension_numbers<[1], [0], [0], [1], [0, 0, 1, 1], [], []>} : vector<16x48xbf16>, vector<48x2048xbf16>, vector<16x2048xf32> -> vector<16x2048xf32>
    %82 = arith.addf %69, %81 : vector<16x2048xf32>
    %c0_38 = arith.constant 0 : index
    %c0_39 = arith.constant 0 : index
    %83 = vector.load %arg8[%c0_38, %c0_39] : memref<16x1xf32, #tpu.memory_space<vmem>>, vector<16x1xf32>
    %84 = vector.broadcast %83 : vector<16x1xf32> to vector<16x2048xf32>
    %85 = arith.addf %82, %84 : vector<16x2048xf32>
    %cst_40 = arith.constant 0.000000e+00 : f32
    %86 = vector.broadcast %cst_40 : f32 to vector<16x2048xf32>
    %87 = arith.maximumf %85, %86 : vector<16x2048xf32>
    %88 = arith.truncf %87 : vector<16x2048xf32> to vector<16x2048xbf16>
    %89 = vector.shape_cast %88 : vector<16x2048xbf16> to vector<1x16x2048xbf16>
    %c0_41 = arith.constant 0 : index
    %c0_42 = arith.constant 0 : index
    %c0_43 = arith.constant 0 : index
    %90 = vector.load %arg9[%c0_41, %c0_42, %c0_43] : memref<1x16x2048xbf16, #tpu.memory_space<vmem>>, vector<1x16x2048xbf16>
    tpu.vector_store %arg9[%c0_41, %c0_42, %c0_43], %89 {strides = array<i32>} : memref<1x16x2048xbf16, #tpu.memory_space<vmem>>, vector<1x16x2048xbf16>,
    return
  }
  func.func @transform_0(%arg0: i32, %arg1: i32) -> (i32, i32, i32) {
    %c16_i32 = arith.constant 16 : i32
    %0 = arith.muli %arg1, %c16_i32 : i32
    %c1_i32 = arith.constant 1 : i32
    %1 = arith.subi %0, %c1_i32 : i32
    %c0_i32 = arith.constant 0 : i32
    %2 = arith.maxsi %1, %c0_i32 : i32
    %c0_i32_0 = arith.constant 0 : i32
    %c0_i32_1 = arith.constant 0 : i32
    return %arg0, %c0_i32_0, %2 : i32, i32, i32
  }
  func.func @transform_1(%arg0: i32, %arg1: i32) -> (i32, i32, i32) {
    %c0_i32 = arith.constant 0 : i32
    %c0_i32_0 = arith.constant 0 : i32
    return %arg0, %c0_i32, %arg1 : i32, i32, i32
  }
  func.func @transform_2(%arg0: i32, %arg1: i32) -> (i32, i32, i32) {
    %c1_i32 = arith.constant 1 : i32
    %0 = arith.addi %arg1, %c1_i32 : i32
    %c16_i32 = arith.constant 16 : i32
    %1 = arith.muli %0, %c16_i32 : i32
    %c15_i32 = arith.constant 15 : i32
    %2 = arith.minsi %1, %c15_i32 : i32
    %c0_i32 = arith.constant 0 : i32
    %c0_i32_0 = arith.constant 0 : i32
    return %arg0, %c0_i32, %2 : i32, i32, i32
  }
  func.func @transform_3(%arg0: i32, %arg1: i32) -> (i32, i32) {
    %c0_i32 = arith.constant 0 : i32
    %c0_i32_0 = arith.constant 0 : i32
    %c0_i32_1 = arith.constant 0 : i32
    return %c0_i32, %c0_i32_0 : i32, i32
  }
  func.func @transform_4(%arg0: i32, %arg1: i32) -> (i32, i32) {
    %c0_i32 = arith.constant 0 : i32
    %c0_i32_0 = arith.constant 0 : i32
    %c0_i32_1 = arith.constant 0 : i32
    return %c0_i32, %c0_i32_0 : i32, i32
  }
  func.func @transform_5(%arg0: i32, %arg1: i32) -> (i32, i32) {
    %c0_i32 = arith.constant 0 : i32
    %c0_i32_0 = arith.constant 0 : i32
    %c0_i32_1 = arith.constant 0 : i32
    return %c0_i32, %c0_i32_0 : i32, i32
  }
  func.func @transform_6(%arg0: i32, %arg1: i32) -> (i32, i32) {
    %c0_i32 = arith.constant 0 : i32
    %c0_i32_0 = arith.constant 0 : i32
    %c0_i32_1 = arith.constant 0 : i32
    return %c0_i32, %c0_i32_0 : i32, i32
  }
  func.func @transform_7(%arg0: i32, %arg1: i32) -> (i32, i32, i32) {
    %c0_i32 = arith.constant 0 : i32
    %c0_i32_0 = arith.constant 0 : i32
    return %arg0, %c0_i32, %arg1 : i32, i32, i32
  }
}

</mosaic_0001>

<bundles_post_ra>
// kernel: tpu_custom_call.1
= control target key start
LH: loop header
LB: loop body
LE: loop exit
PB: predicated region body
PF: predicated region fallthrough
CT: control target
= control target key end

     0   :  { %s7304_s0 = inlined_call_operand.hbm [shape: bf16[2,4,2048], index: 0, kind: input, shape index: {}]   ;;  %s7305_s1 = inlined_call_operand.hbm [shape: bf16[2,4,2048], index: 1, kind: input, shape index: {}]   ;;  %s7306_s2 = inlined_call_operand.hbm [shape: bf16[2,4,2048], index: 2, kind: input, shape index: {}]   ;;  %s7307_s3 = inlined_call_operand.hbm [shape: bf16[16,4], index: 3, kind: input, shape index: {}]   ;;  %s7308_s4 = inlined_call_operand.hbm [shape: f32[16,1], index: 4, kind: input, shape index: {}]   ;;  %s7309_s5 = inlined_call_operand.hbm [shape: bf16[16,144], index: 5, kind: input, shape index: {}]   ;;  %s7310_s6 = inlined_call_operand.hbm [shape: f32[16,1], index: 6, kind: input, shape index: {}]   ;;  %s7311_s7 = inlined_call_operand.hbm [shape: bf16[2,16,2048], index: 7, kind: output, shape index: {}]  }
   0x1   :  { %7366 = sst [smem:[#allocation57_spill]] %s7305_s1 }
   0x2   :  { %7367 = sst [smem:[#allocation58_spill]] %s7307_s3 }
   0x3   :  { %7368 = sst [smem:[#allocation59_spill]] %s7309_s5 }
   0x4   :  { %12 = vsyncpa [#allocation4], 0 }
   0x5   :  { %14 = vsyncpa [#allocation4 + $0x1], 0 }
   0x6   :  { %15 = vsyncpa [#allocation7], 0 }
   0x7   :  { %17 = vsyncpa [#allocation7 + $0x1], 0 }
   0x8   :  { %18 = vsyncpa [#allocation10], 0 }
   0x9   :  { %19 = vsyncpa [#allocation13], 0 }
   0xa   :  { %20 = vsyncpa [#allocation5], 0 }
   0xb   :  { %22 = vsyncpa [#allocation5 + $0x1], 0  ;;  %s4913_s24 = smov 0   ;;  %s4915_s25 = smov 0  }
   0xc   :  { %s4917_s26 = smov 0   ;;  %s4919_s27 = smov 0  }
   0xd   :  { %s4921_s28 = smov 0   ;;  %s4923_s29 = smov 0  }
   0xe LB: > { %7369 = sst [smem:[#allocation21_spill]] %s4830_s24  ;;  %s4944_s30 = sadd.s32 4294967295, %s4850_s29   ;;  %s4850_s29 = sphi %s4923_s29, %s28_s29   ;;  %s4846_s28 = sphi %s4921_s28, %s7508_s28   ;;  %s4842_s27 = sphi %s4919_s27, %s7507_s27   ;;  %s4838_s26 = sphi %s4917_s26, %s7506_s26   ;;  %s4834_s25 = sphi %s4915_s25, %s7510_s25   ;;  %s4830_s24 = sphi %s4913_s24, %s7509_s24  }
   0xf   : > { %7370 = sst [smem:[#allocation22_spill]] %s4838_s26  ;;  %p4222_p0 = scmp.ge.s32.totalorder %s4850_s29, 1 }
  0x10   : > { %7371 = sst [smem:[#allocation23_spill]] %s4846_s28  ;;  %p7312_p1 = scmp.eq.s32.totalorder %s4944_s30, 0 }
  0x11   : > { %7372 = sst [smem:[#allocation24_spill]] %s4850_s29  ;;  %p257_p2 = scmp.lt.s32.totalorder %s4850_s29, 3 }
  0x12   : > { %s4852_s9 = smov [#allocation9]   ;;  %s4853_s12 = smov [#allocation12]  }
  0x13   : > { %p4949_p3 = pnand %p4222_p0, %p257_p2  ;;  %s269_s10 = sshll.u32 %s4852_s9, 4  ;;  %s270_s10 = int_to_ptr.vmem [resolvable:$true] %s269_s10 }
  0x14   : > { %s295_s13 = sshll.u32 %s4853_s12, 4  ;;  %s7375_s3 = sld [smem:[#allocation58_spill]]  ;;  %s296_s13 = int_to_ptr.vmem [resolvable:$true] %s295_s13 }
  0x15   : > { %s7373_s8 = scalar_select %p4949_p3, 1, 0 }
  0x16   : > { %p4425_p4 = pneg %p4949_p3 }
  0x18   : > { %p4958_p6 = pnand %p4425_p4, %p7312_p1 }
  0x1a   : > { %s7374_s11 = scalar_select %p4958_p6, 1, 0 }
  0x1b   : > { %s4554_s16 = scalar_lea.hbm %s7375_s3, 128  ;;  %p4970_p8 = pneg %p4958_p6 }
  0x1c   : > { %p4555_p7 = scmp.ne.s32.totalorder %s7375_s3, %s4554_s16  ;;  %p4561_p11 = scmp.lt.u32.totalorder %s4554_s16, %s7375_s3 }
  0x1d   : > { %s7376_s19 = scalar_select %p4970_p8, 1, 0 }
  0x1e   : > { %p4557_p9 = pnand %p4970_p8, %p4555_p7 }
  0x20   : > { %p4558_p10 = pneg %p4557_p9 }
  0x22   : > { %p4563_p12 = pnand %p4561_p11, %p4558_p10 }
  0x24   : > { %4566 = shalt.err (!%p4563_p12)
}
  0x25   : > { %s4567_s22 = scalar_lea.vmem %s270_s10, 128  ;;  %p4575_p4 = scmp.lt.s32.totalorder %s270_s10, %s270_s10 }
  0x26   : > { %p4568_p13 = scmp.ne.s32.totalorder %s270_s10, %s4567_s22  ;;  %p4576_p5 = scmp.lt.s32.totalorder %s4567_s22, %s4567_s22 }
  0x28   : > { %p4570_p0 = pnand %p4568_p13, %p4970_p8  ;;  %p4577_p1 = por %p4576_p5, %p4575_p4 }
  0x2a   : > { %p4571_p2 = pneg %p4570_p0 }
  0x2c   : > { %p4578_p3 = pnand %p4577_p1, %p4571_p2 }
  0x2e   : > { %4581 = shalt.err (!%p4578_p3)
}
  0x2f   : > { %s4854_s23 = smov 64   ;;  %s4855_s9 = smov 4  }
  0x30   : > { %4428 = dma.hbm_to_vmem [thread:$0]  (!%p4958_p6), %s7375_s3, 128, %s270_s10, [#allocation10], %s4854_s23, %s4854_s23, %s4855_s9  }
  0x31   : > { %s7377_s5 = sld [smem:[#allocation59_spill]] }
  0x37   : > { %s4582_s17 = scalar_lea.hbm %s7377_s5, 256 }
  0x38   : > { %p4583_p5 = scmp.ne.s32.totalorder %s7377_s5, %s4582_s17  ;;  %p4589_p7 = scmp.lt.u32.totalorder %s4582_s17, %s7377_s5 }
  0x3a   : > { %p4585_p1 = pnand %p4583_p5, %p4970_p8 }
  0x3c   : > { %p4586_p3 = pneg %p4585_p1 }
  0x3e   : > { %p4591_p9 = pnand %p4589_p7, %p4586_p3 }
  0x40   : > { %4594 = shalt.err (!%p4591_p9)
}
  0x41   : > { %s4595_s12 = scalar_lea.vmem %s296_s13, 256  ;;  %p4603_p13 = scmp.lt.s32.totalorder %s296_s13, %s296_s13 }
  0x42   : > { %p4596_p10 = scmp.ne.s32.totalorder %s296_s13, %s4595_s12  ;;  %p4604_p0 = scmp.lt.s32.totalorder %s4595_s12, %s4595_s12 }
  0x44   : > { %p4598_p11 = pnand %p4596_p10, %p4970_p8  ;;  %p4605_p2 = por %p4604_p0, %p4603_p13 }
  0x46   : > { %p4599_p12 = pneg %p4598_p11 }
  0x48   : > { %p4606_p4 = pnand %p4605_p2, %p4599_p12 }
  0x4a   : > { %4609 = shalt.err (!%p4606_p4)
}
  0x4b   : > { %s7314_s10 = smov 128   ;;  %s7316_s23 = smov 8  }
  0x4c   : > { %4434 = dma.hbm_to_vmem [thread:$0]  (!%p4958_p6), %s7377_s5, 256, %s296_s13, [#allocation13], %s7314_s10, %s7314_s10, %s7316_s23  }
  0x4d   : > { %s4221_s15 = sadd.s32 4294967294, %s4850_s29   ;;  %s40_s16 = sadd.s32 1, %s4846_s28 }
  0x4e   : > { %p42_p5 = scmp.ge.s32.totalorder %s40_s16, 2  ;;  %s57_s17 = sadd.s32 1, %s4838_s26 }
  0x4f   : > { %p64_p1 = scmp.ne.s32.totalorder %s4838_s26, %s4834_s25  ;;  %p65_p3 = scmp.eq.s32.totalorder %s4850_s29, 0 }
  0x50   : > { %s7512_s16 = smov (%p42_p5, %s40_s16), 0  ;;  %p70_p9 = scmp.ne.s32.totalorder %s4834_s25, %s4830_s24 }
  0x51   : > { %7378 = sst [smem:[#allocation25_spill]] %s7512_s16  ;;  %p5015_p7 = por %p65_p3, %p64_p1 }
  0x52   : > { %s52_s13 = ssub.s32 %s4846_s28, %s7512_s16  ;;  %p244_p10 = scmp.eq.s32.totalorder %s4944_s30, 1 }
  0x53   : > { %p55_p11 = scmp.eq.s32.totalorder %s52_s13, 0  ;;  %p7380_p12 = scmp.eq.s32.totalorder %s4944_s30, 0 }
  0x54   : > { %p5030_p0 = por %p244_p10, %p64_p1  ;;  %p250_p2 = scmp.eq.s32.totalorder %s4221_s15, 1 }
  0x55   : > { %p5026_p13 = por %p7380_p12, %p70_p9  ;;  %p4456_p5 = scmp.lt.s32.totalorder %s4850_s29, 2 }
  0x56   : > { %s7382_s21 = scalar_select %p5030_p0, 1, 0 }
  0x57   : > { %s7381_s20 = scalar_select %p5026_p13, 1, 0 }
  0x58   : > { %s5035_s22 = scalar_select %p55_p11, %s4838_s26, %s57_s17  }
  0x59   : > { %p5037_p4 = por %p250_p2, %p70_p9  ;;  %s5043_s9 = sand.u32 1, %s4838_s26  }
  0x5a   : > { %7383 = sst [smem:[#allocation26_spill]] %s5035_s22  ;;  %s5046_s14 = sshll.u32 %s4846_s28, 9 }
  0x5b   : > { %s7384_s12 = scalar_select %p5037_p4, 1, 0 }
  0x5c   : > { %p5050_p3 = pnand %p4456_p5, %p5015_p7  ;;  %s346_s15 = sand.u32 1, %s4850_s29  }
  0x5d   : > { %7385 = sst [smem:[#allocation27_spill]] %s7384_s12  ;;  %s4231_s17 = sshll.u32 %s5043_s9, 5 }
  0x5e   : > { %s7386_s13 = scalar_select %p5050_p3, 1, 0 }
  0x5f   : > { %s7387_s1 = sld [smem:[#allocation57_spill]]  ;;  %s350_s5 = scalar_lea.vmem [#allocation6], %s4231_s17 }
  0x60   : > { %s360_s16 = sshll.u32 %s350_s5, 4  ;;  %s5064_s18 = scalar_lea.sflag [#allocation7], %s346_s15  ;;  %s5062_s16 = int_to_ptr.vmem [resolvable:$true] %s360_s16 }
  0x61   : > { %p5070_p7 = pneg %p5050_p3 }
  0x63   : > { %s7388_s22 = scalar_select %p5070_p7, 1, 0 }
  0x65   : > { %s5060_s3 = scalar_lea.hbm %s7387_s1, %s5046_s14  ;;  %s4615_s17 = scalar_lea.hbm %s7387_s1, 1024 }
  0x66   : > { %s4610_s28 = scalar_lea.hbm %s5060_s3, 512  ;;  %p4616_p11 = scmp.lt.u32.totalorder %s5060_s3, %s7387_s1 }
  0x67   : > { %p4611_p1 = scmp.ne.s32.totalorder %s5060_s3, %s4610_s28  ;;  %p4617_p12 = scmp.lt.u32.totalorder %s4615_s17, %s4610_s28 }
  0x68   : > { %p4619_p5 = scmp.lt.u32.totalorder %s4610_s28, %s5060_s3 }
  0x69   : > { %p4613_p9 = pnand %p5070_p7, %p4611_p1  ;;  %p4618_p2 = por %p4617_p12, %p4616_p11 }
  0x6b   : > { %p4614_p10 = pneg %p4613_p9  ;;  %p4620_p4 = por %p4619_p5, %p4618_p2 }
  0x6d   : > { %p4621_p0 = pnand %p4620_p4, %p4614_p10 }
  0x6f   : > { %4624 = shalt.err (!%p4621_p0)
}
  0x70   : > { %s4625_s15 = scalar_lea.vmem %s5062_s16, 512  ;;  %s4858_s10 = smov [#allocation6]  }
  0x71   : > { %p4626_p1 = scmp.ne.s32.totalorder %s5062_s16, %s4625_s15  ;;  %s4630_s23 = sshll.u32 %s4858_s10, 4  ;;  %s4631_s23 = int_to_ptr.vmem [resolvable:$false] %s4630_s23 }
  0x72   : > { %s4632_s26 = scalar_lea.vmem %s4631_s23, 1024  ;;  %p4633_p6 = scmp.lt.s32.totalorder %s5062_s16, %s4631_s23 }
  0x73   : > { %p4628_p9 = pnand %p4626_p1, %p5070_p7  ;;  %p4634_p8 = scmp.lt.s32.totalorder %s4632_s26, %s4625_s15 }
  0x75   : > { %p4629_p13 = pneg %p4628_p9  ;;  %p4635_p11 = por %p4634_p8, %p4633_p6 }
  0x77   : > { %p4636_p12 = pnand %p4635_p11, %p4629_p13 }
  0x79   : > { %4639 = shalt.err (!%p4636_p12)
}
  0x7a   : > { %4444 = dma.hbm_to_vmem [thread:$0]  (!%p5050_p3), %s5060_s3, 512, %s5062_s16, %s5064_s18  }
  0x7b   : > { %s4859_s28 = smov [#allocation11]   ;;  %s4860_s5 = smov [#allocation14]  }
  0x7c   : > { %s282_s17 = sshll.u32 %s4859_s28, 4  ;;  %s308_s1 = sshll.u32 %s4860_s5, 4  ;;  %s283_s17 = int_to_ptr.vmem [resolvable:$true] %s282_s17  ;;  %s309_s1 = int_to_ptr.vmem [resolvable:$true] %s308_s1 }
  0x7d   : > { %s4640_s23 = scalar_lea.hbm %s7308_s4, 256  ;;  %p7389_p8 = scmp.ne.s32.totalorder %s7376_s19, 0 }
  0x7e   : > { %p4641_p6 = scmp.ne.s32.totalorder %s7308_s4, %s4640_s23  ;;  %p4647_p4 = scmp.lt.u32.totalorder %s4640_s23, %s7308_s4 }
  0x80   : > { %p4643_p13 = pnand %p4641_p6, %p7389_p8 }
  0x82   : > { %p4644_p0 = pneg %p4643_p13 }
  0x84   : > { %p4649_p10 = pnand %p4647_p4, %p4644_p0 }
  0x86   : > { %4652 = shalt.err (!%p4649_p10)
}
  0x87   : > { %s4653_s3 = scalar_lea.vmem %s283_s17, 256  ;;  %p4661_p9 = scmp.lt.s32.totalorder %s283_s17, %s283_s17 }
  0x88   : > { %p4654_p2 = scmp.ne.s32.totalorder %s283_s17, %s4653_s3  ;;  %p4662_p11 = scmp.lt.s32.totalorder %s4653_s3, %s4653_s3 }
  0x8a   : > { %p4656_p5 = pnand %p4654_p2, %p7389_p8  ;;  %p4663_p12 = por %p4662_p11, %p4661_p9 }
  0x8c   : > { %p4657_p1 = pneg %p4656_p5 }
  0x8e   : > { %p4664_p3 = pnand %p4663_p12, %p4657_p1 }
  0x90   : > { %4667 = shalt.err (!%p4664_p3)
}
  0x91   : > { %p7390_p6 = scmp.ne.s32.totalorder %s7374_s11, 0  ;;  %s7391_s29 = smov 8  }
  0x92   : > { %s7392_s16 = smov 128   ;;  %s4668_s10 = scalar_lea.hbm %s7310_s6, 256 }
  0x93   : > { %4431 = dma.hbm_to_vmem [thread:$0]  (!%p7390_p6), %s7308_s4, 256, %s283_s17, [#allocation10], %s7392_s16, %s7392_s16, %s7391_s29  }
  0x94   : > { %p4669_p13 = scmp.ne.s32.totalorder %s7310_s6, %s4668_s10  ;;  %p4675_p4 = scmp.lt.u32.totalorder %s4668_s10, %s7310_s6 }
  0x96   : > { %p4671_p3 = pnand %p4669_p13, %p7389_p8 }
  0x98   : > { %p4672_p0 = pneg %p4671_p3 }
  0x9a   : > { %p4677_p10 = pnand %p4675_p4, %p4672_p0 }
  0x9c   : > { %4680 = shalt.err (!%p4677_p10)
}
  0x9d   : > { %s4681_s24 = scalar_lea.vmem %s309_s1, 256  ;;  %p4689_p9 = scmp.lt.s32.totalorder %s309_s1, %s309_s1 }
  0x9e   : > { %p4682_p2 = scmp.ne.s32.totalorder %s309_s1, %s4681_s24  ;;  %p4690_p11 = scmp.lt.s32.totalorder %s4681_s24, %s4681_s24 }
  0xa0   : > { %p4684_p5 = pnand %p4682_p2, %p7389_p8  ;;  %p4691_p12 = por %p4690_p11, %p4689_p9 }
  0xa2   : > { %p4685_p1 = pneg %p4684_p5 }
  0xa4   : > { %p4692_p7 = pnand %p4691_p12, %p4685_p1 }
  0xa6   : > { %4695 = shalt.err (!%p4692_p7)
}
  0xa7   : > { %4437 = dma.hbm_to_vmem [thread:$0]  (!%p7390_p6), %s7310_s6, 256, %s309_s1, [#allocation13], %s7392_s16, %s7392_s16, %s7391_s29  }
  0xa8   : > { %s4228_s19 = sshll.u32 %s5043_s9, 1  ;;  %s5141_s10 = scalar_lea.hbm %s7304_s0, %s5046_s14 }
  0xa9   : > { %s326_s11 = scalar_lea.vmem [#allocation3], %s4228_s19  ;;  %s4318_s15 = sadd.s32 480, %s5046_s14 }
  0xaa   : > { %s339_s23 = sshll.u32 %s326_s11, 4  ;;  %s5151_s1 = scalar_lea.hbm %s7306_s2, %s4318_s15  ;;  %s5146_s23 = int_to_ptr.vmem [resolvable:$true] %s339_s23 }
  0xab   : > { %s323_s29 = scalar_lea.sflag [#allocation4], %s5043_s9  ;;  %s4696_s16 = scalar_lea.hbm %s5141_s10, 32 }
  0xac   : > { %p4697_p7 = scmp.ne.s32.totalorder %s5141_s10, %s4696_s16  ;;  %p7393_p8 = scmp.ne.s32.totalorder %s7388_s22, 0 }
  0xad   : > { %s4701_s12 = scalar_lea.hbm %s7304_s0, 1024  ;;  %p4702_p3 = scmp.lt.u32.totalorder %s5141_s10, %s7304_s0 }
  0xae   : > { %p4699_p6 = pnand %p4697_p7, %p7393_p8  ;;  %p4703_p0 = scmp.lt.u32.totalorder %s4701_s12, %s4696_s16 }
  0xaf   : > { %p4705_p10 = scmp.lt.u32.totalorder %s4696_s16, %s5141_s10 }
  0xb0   : > { %p4700_p13 = pneg %p4699_p6  ;;  %p4704_p4 = por %p4703_p0, %p4702_p3 }
  0xb2   : > { %p4706_p2 = por %p4705_p10, %p4704_p4 }
  0xb4   : > { %p4707_p5 = pnand %p4706_p2, %p4700_p13 }
  0xb6   : > { %4710 = shalt.err (!%p4707_p5)
}
  0xb7   : > { %s4711_s14 = scalar_lea.vmem %s5146_s23, 32  ;;  %s4861_s11 = smov [#allocation3]  }
  0xb8   : > { %p4712_p1 = scmp.ne.s32.totalorder %s5146_s23, %s4711_s14  ;;  %s4716_s15 = sshll.u32 %s4861_s11, 4  ;;  %s4717_s15 = int_to_ptr.vmem [resolvable:$false] %s4716_s15 }
  0xb9   : > { %s4718_s26 = scalar_lea.vmem %s4717_s15, 64  ;;  %p4719_p12 = scmp.lt.s32.totalorder %s5146_s23, %s4717_s15 }
  0xba   : > { %p4714_p9 = pnand %p4712_p1, %p7393_p8  ;;  %p4720_p7 = scmp.lt.s32.totalorder %s4718_s26, %s4711_s14 }
  0xbc   : > { %p4715_p11 = pneg %p4714_p9  ;;  %p4721_p6 = por %p4720_p7, %p4719_p12 }
  0xbe   : > { %p4722_p3 = pnand %p4721_p6, %p4715_p11 }
  0xc0   : > { %4725 = shalt.err (!%p4722_p3)
}
  0xc1   : > { %p7394_p13 = scmp.ne.s32.totalorder %s7386_s13, 0  ;;  %s371_s3 = scalar_lea.vmem [#allocation8], %s4228_s19 }
  0xc2   : > { %s384_s16 = sshll.u32 %s371_s3, 4  ;;  %s4726_s24 = scalar_lea.hbm %s5151_s1, 32  ;;  %s385_s16 = int_to_ptr.vmem [resolvable:$true] %s384_s16 }
  0xc3   : > { %4441 = dma.hbm_to_vmem [thread:$0]  (!%p7394_p13), %s5141_s10, 32, %s5146_s23, %s323_s29  }
  0xc4   : > { %p4727_p0 = scmp.ne.s32.totalorder %s5151_s1, %s4726_s24  ;;  %s4731_s28 = scalar_lea.hbm %s7306_s2, 1024 }
  0xc5   : > { %p4732_p2 = scmp.lt.u32.totalorder %s5151_s1, %s7306_s2  ;;  %p4733_p5 = scmp.lt.u32.totalorder %s4731_s28, %s4726_s24 }
  0xc6   : > { %p4729_p4 = pnand %p4727_p0, %p7393_p8  ;;  %p4735_p9 = scmp.lt.u32.totalorder %s4726_s24, %s5151_s1 }
  0xc7   : > { %p4734_p1 = por %p4733_p5, %p4732_p2 }
  0xc8   : > { %p4730_p10 = pneg %p4729_p4 }
  0xc9   : > { %p4736_p11 = por %p4735_p9, %p4734_p1 }
  0xcb   : > { %p4737_p12 = pnand %p4736_p11, %p4730_p10 }
  0xcd   : > { %4740 = shalt.err (!%p4737_p12)
}
  0xce   : > { %s4741_s9 = scalar_lea.vmem %s385_s16, 32  ;;  %s4862_s19 = smov [#allocation8]  }
  0xcf   : > { %p4742_p7 = scmp.ne.s32.totalorder %s385_s16, %s4741_s9  ;;  %s4746_s10 = sshll.u32 %s4862_s19, 4  ;;  %s4747_s10 = int_to_ptr.vmem [resolvable:$false] %s4746_s10 }
  0xd0   : > { %s4748_s23 = scalar_lea.vmem %s4747_s10, 64  ;;  %p4749_p0 = scmp.lt.s32.totalorder %s385_s16, %s4747_s10 }
  0xd1   : > { %p4744_p6 = pnand %p4742_p7, %p7393_p8  ;;  %p4750_p4 = scmp.lt.s32.totalorder %s4748_s23, %s4741_s9 }
  0xd3   : > { %p4745_p3 = pneg %p4744_p6  ;;  %p4751_p13 = por %p4750_p4, %p4749_p0 }
  0xd5   : > { %p4752_p2 = pnand %p4751_p13, %p4745_p3 }
  0xd7   : > { %4755 = shalt.err (!%p4752_p2)
}
  0xd8   : > { %p7395_p5 = scmp.ne.s32.totalorder %s7386_s13, 0  ;;  %p7396_p10 = scmp.ne.s32.totalorder %s7373_s8, 0 }
  0xda   : > { %4447 = dma.hbm_to_vmem [thread:$0]  (!%p7395_p5), %s5151_s1, 32, %s385_s16, %s5064_s18  }
  0xdb   : > { %393 = sbr.rel (%p7396_p10) target bundleno = 1294 (0x50e), region = 48 }
  0xe2   : > { %s5198_s22 = sand.u32 1, %s4834_s25   ;;  %p7397_p8 = scmp.ne.s32.totalorder %s7381_s20, 0 }
  0xe3   : > { %s396_s29 = scalar_lea.sflag [#allocation4], %s5198_s22 }
  0xe4   : > { %4809 = dma.done.wait (%p7397_p8), %s396_s29, 32  }
  0xe5   : > { %4811 = vsyncadd (%p7397_p8), %s396_s29, 4294967264  ;;  %s404_s13 = sand.u32 1, %s4944_s30   ;;  %s4239_s11 = sshll.u32 %s5198_s22, 5 }
  0xe6   : > { %s405_s18 = scalar_lea.sflag [#allocation7], %s404_s13  ;;  %s5207_s1 = scalar_lea.vmem [#allocation6], %s4239_s11 }
  0xe7   : > { %4813 = dma.done.wait (%p7397_p8), %s405_s18, 544  }
  0xe8   : > { %4815 = vsyncadd (%p7397_p8), %s405_s18, 4294966752  ;;  %p7398_p13 = scmp.eq.s32.totalorder %s4944_s30, 0 }
  0xea   : > { %4817 = dma.done.wait (%p7398_p13), [#allocation10], 384   ;;  %p7399_p1 = pmov %p7398_p13 }
  0xec   : > { %4819 = vsyncadd (%p7399_p1), [#allocation10], 4294966912  ;;  %p7400_p9 = pmov %p7399_p1 }
  0xed   : > { %p7401_p11 = pmov %p7399_p1 }
  0xee   : > { %4821 = dma.done.wait (%p7400_p9), [#allocation13], 512  }
  0xef   : > { %4823 = vsyncadd (%p7401_p11), [#allocation13], 4294966784  ;;  %v518_v0 = vlaneseq  ;;  %v4863_v1 = vmov 0   ;;  %v4864_v2 = vmov 1983009808   ;;  %vm586_vm0 = vcmask 1041408  }
  0xf0   : > { %4527 = vset.pattern.permute.xlu0 %v4863_v1  ;;  %1047 = vst [vmem:[#allocation2 + $0x8] sm:$0xff] %v4863_v1  ;;  %v516_v3 = vunpack.c.l.s4 %v4864_v2  ;;  %667 = vmatprep.mubr.bf16.mxu0 %v4863_v1  ;;  %vm582_vm1 = vcmask 31744   ;;  %v493_v15 = vld [vmem:[#allocation11] sm:$0xff]  ;;  %v487_v16 = vld [vmem:[%s5207_s1] sm:$0xff]  ;;  %v494_v24 = vld [vmem:[#allocation11 + $0x8] sm:$0xff]  ;;  %s4865_s30 = smov 1  }
  0xf1   : > { %v519_v4 = vshrl.u32 %v518_v0, 7  ;;  %v5224_v5 = vand.u32 127, %v518_v0  ;;  %710 = vmatprep.mubr.bf16.mxu1 %v4863_v1  ;;  %4528 = vset.pattern.permute.xlu1 %v4863_v1  ;;  %v514_v22 = vcombine.high %v487_v16, %v487_v16  ;;  %v488_v25 = vld [vmem:[%s5207_s1 + $0x8] sm:$0xff]  ;;  %v489_v34 = vld [vmem:[%s5207_s1 + $0x10] sm:$0xff]  ;;  %v490_v54 = vld [vmem:[%s5207_s1 + $0x18] sm:$0xff]  ;;  %s4866_s8 = smov 127  }
  0xf2   : > { %v517_v6 = vunpack.c.0.s8 %v516_v3  ;;  %497 = vperm.xlu0 %4527, %v493_v15   ;;  %v5297_v41 = vld [vmem:[#allocation9] sm:$0xff]   ;;  %v531_v43 = vcombine.high %v488_v25, %v488_v25  ;;  %v548_v53 = vcombine.high %v489_v34, %v489_v34  ;;  %s4867_s20 = smov 80   ;;  %s4868_s15 = smov 126  }
  0xf3   : > { %v5229_v7 = vadd.s32 128, %v5224_v5  ;;  %v5234_v9 = vadd.s32 256, %v5224_v5  ;;  %v5237_v10 = vadd.s32 384, %v5224_v5  ;;  %v5240_v11 = vadd.s32 512, %v5224_v5  ;;  %s4869_s26 = smov 32   ;;  %s4245_s3 = sshll.u32 %s5198_s22, 7 }
  0xf4   : > { %v5231_v8 = vsub.s32 %v517_v6, %v519_v4  ;;  %v5242_v12 = vsub.s32 0, %v519_v4  ;;  %vm1427_vm2 = vcmp.lt.s32.totalorder %v5224_v5, 127  ;;  %v5247_v14 = vadd.s32 640, %v5224_v5  ;;  %s7202_s16 = scalar_lea.vmem [#allocation15], %s4245_s3  ;;  %s4335_s24 = sshll.u32 %s4842_s27, 11 }
  0xf5   : > { %v1230_v13 = vand.u32 127, %v5229_v7  ;;  %v5250_v17 = vsub.s32 4, %v519_v4  ;;  %v1237_v18 = vand.u32 127, %v5234_v9  ;;  %v1244_v19 = vand.u32 127, %v5237_v10  ;;  %s4048_s17 = sshll.u32 %s7202_s16, 4  ;;  %s7251_s5 = scalar_lea.hbm %s7311_s7, %s4335_s24  ;;  %s7253_s17 = int_to_ptr.vmem [resolvable:$true] %s4048_s17 }
  0xf6   : > { %v1251_v20 = vand.u32 127, %v5240_v11  ;;  %v521_v21 = vrot.slane %v487_v16, %v5231_v8  ;;  %v5259_v23 = vadd.s32 768, %v5224_v5  ;;  %v1258_v28 = vand.u32 127, %v5247_v14  ;;  %502 = vperm.xlu0 %4527, %v494_v24   ;;  %s4033_s14 = scalar_lea.sflag [#allocation5], %s5198_s22  ;;  %s4756_s27 = scalar_lea.vmem %s7253_s17, 2048 }
  0xf7   : > { %vm1428_vm3 = vcmp.lt.s32.totalorder %v1230_v13, 127  ;;  %vm5264_vm5 = vcmp.lt.s32.totalorder %v1237_v18, 127  ;;  %vm5270_vm6 = vcmp.lt.s32.totalorder %v1244_v19, 127  ;;  %v5276_v29 = vadd.s32 896, %v5224_v5  ;;  %p4757_p12 = scmp.ne.s32.totalorder %s7253_s17, %s4756_s27  ;;  %p7499_p7 = scmp.ne.s32.totalorder %s7382_s21, 0 }
  0xf8   : > { %vm1687_vm4 = vmpackc.low %vm1428_vm3, %vm1427_vm2  ;;  %v529_v30 = vcombine.high %v521_v21, %v521_v21  ;;  %v588_v32 = vsel %vm586_vm0, %v521_v21, 0  ;;  %v528_v33 = vrot.slane %v514_v22, %v5231_v8  ;;  %v538_v37 = vrot.slane %v488_v25, %v5231_v8  ;;  %s4870_s9 = smov [#allocation15]  }
  0xf9   : > { %v1695_v31 = vsel %vm1687_vm4, 65537, %v4863_v1  ;;  %vm1688_vm7 = vmpackc.low %vm5270_vm6, %vm5264_vm5  ;;  %vm5291_vm8 = vcmp.lt.s32.totalorder %v1251_v20, 127  ;;  %vm1432_vm9 = vcmp.lt.s32.totalorder %v1258_v28, 127  ;;  %v555_v46 = vrot.slane %v489_v34, %v5231_v8  ;;  %p4758_p6 = pnand %p4757_p12, %p7499_p7  ;;  %s4760_s19 = sshll.u32 %s4870_s9, 4  ;;  %s4761_s19 = int_to_ptr.vmem [resolvable:$false] %s4760_s19 }
  0xfa   : > { %v1706_v35 = vrot.slane %v1695_v31, %v5242_v12  ;;  %v1710_v36 = vrot.slane %v1695_v31, %v5250_v17  ;;  %4247 = vmatprep.subr.msk.bf16.mxu0 %vm586_vm0, %v529_v30  ;;  %v530_v39 = vcombine.high %v528_v33, %v528_v33  ;;  %v594_v40 = vsel %vm586_vm0, %v528_v33, 0  ;;  %vm1689_vm10 = vmpackc.low %vm1432_vm9, %vm5291_vm8  ;;  %v4534_v30 = vld [vmem:[#allocation12] ss:$8 sps:$4 sm:$0xff]   ;;  %s4762_s10 = scalar_lea.vmem %s4761_s19, 4096  ;;  %p4763_p0 = scmp.lt.s32.totalorder %s7253_s17, %s4761_s19 }
  0xfb   : > { %v1696_v42 = vsel %vm1688_vm7, 65537, %v4863_v1  ;;  %636 = vmatpush1.bf16.msra.mxu0 %v588_v32  ;;  %v546_v44 = vcombine.high %v538_v37, %v538_v37  ;;  %v600_v45 = vsel %vm586_vm0, %v538_v37, 0  ;;  %v545_v47 = vrot.slane %v531_v43, %v5231_v8  ;;  %p4759_p3 = pneg %p4758_p6  ;;  %p4764_p4 = scmp.lt.s32.totalorder %s4762_s10, %s4756_s27 }
  0xfc   : > { %1767 = vrot.lane.b32.xlu1 %v1706_v35, %s4865_s30  ;;  %4249 = vmatprep.subr.msk.bf16.mxu1 %vm586_vm0, %v530_v39  ;;  %v1265_v48 = vand.u32 127, %v5259_v23  ;;  %v1272_v49 = vand.u32 127, %v5276_v29  ;;  %v1714_v50 = vrot.slane %v1696_v42, %v5242_v12  ;;  %v1718_v51 = vrot.slane %v1696_v42, %v5250_v17 }
  0xfd   : > { %679 = vmatpush1.bf16.msra.mxu1 %v594_v40  ;;  %4251 = vmatprep.subr.msk.bf16.mxu0 %vm586_vm0, %v546_v44  ;;  %v1697_v52 = vsel %vm1689_vm10, 65537, %v4863_v1  ;;  %v547_v55 = vcombine.high %v545_v47, %v545_v47  ;;  %v606_v56 = vsel %vm586_vm0, %v545_v47, 0  ;;  %v563_v57 = vcombine.high %v555_v46, %v555_v46  ;;  %p4765_p2 = por %p4764_p4, %p4763_p0 }
  0xfe   : > { %4248 = vmatmul.mubr.msk.bf16.vlgmr.msra.gmra.mrb[0].mxu0 %vm582_vm1, %v5297_v41  ;;  %vm5321_vm11 = vcmp.lt.s32.totalorder %v1265_v48, 127  ;;  %1771 = vrot.lane.b32.xlu0 %v1714_v50, %s4865_s30  ;;  %vm5329_vm12 = vcmp.lt.s32.totalorder %v1272_v49, 127  ;;  %v562_v60 = vrot.slane %v548_v53, %v5231_v8  ;;  %v5335_v61 = vadd.s32 1024, %v5224_v5 }
  0xff   : > { %722 = vmatpush1.bf16.msra.mxu0 %v600_v45  ;;  %v5338_v62 = vadd.s32 1152, %v5224_v5  ;;  %4253 = vmatprep.subr.msk.bf16.mxu1 %vm586_vm0, %v547_v55  ;;  %vm1690_vm13 = vmpackc.low %vm5329_vm12, %vm5321_vm11  ;;  %v1722_v63 = vrot.slane %v1697_v52, %v5242_v12  ;;  %v572_v0 = vrot.slane %v490_v54, %v5231_v8  ;;  %v5350_v2 = vadd.s32 1280, %v5224_v5  ;;  %p4766_p5 = pnand %p4765_p2, %p4759_p3 }
 0x100   : > { %1769 = vrot.lane.b32.xlu1 %v1710_v36, %s4865_s30  ;;  %4250 = vmatmul.mubr.msk.bf16.vlgmr.msra.gmra.mrb[0].mxu1 %vm582_vm1, %v5297_v41  ;;  %v5353_v3 = vadd.s32 1408, %v5224_v5  ;;  %v564_v4 = vcombine.high %v562_v60, %v562_v60  ;;  %v1279_v6 = vand.u32 127, %v5335_v61  ;;  %v1726_v15 = vrot.slane %v1697_v52, %v5250_v17 }
 0x101   : > { %753 = vmatprep.mubr.bf16.mxu0 %v4863_v1  ;;  %765 = vmatpush1.bf16.msra.mxu1 %v606_v56  ;;  %v612_v16 = vsel %vm586_vm0, %v555_v46, 0  ;;  %v1286_v21 = vand.u32 127, %v5338_v62  ;;  %v1293_v22 = vand.u32 127, %v5350_v2  ;;  %v1698_v24 = vsel %vm1690_vm13, 65537, %v4863_v1 }
 0x102   : > { %796 = vmatprep.mubr.bf16.mxu1 %v4863_v1  ;;  %4255 = vmatprep.subr.msk.bf16.mxu0 %vm586_vm0, %v563_v57  ;;  %v618_v25 = vsel %vm586_vm0, %v562_v60, 0  ;;  %vm5374_vm14 = vcmp.lt.s32.totalorder %v1279_v6, 127  ;;  %v1300_v27 = vand.u32 127, %v5353_v3  ;;  %v580_v31 = vcombine.high %v572_v0, %v572_v0 }
 0x103   : > { %4257 = vmatprep.subr.msk.bf16.mxu1 %vm586_vm0, %v564_v4  ;;  %vm5381_vm15 = vcmp.lt.s32.totalorder %v1286_v21, 127  ;;  %1775 = vrot.lane.b32.xlu0 %v1722_v63, %s4865_s30  ;;  %v565_v32 = vcombine.high %v490_v54, %v490_v54  ;;  %v5387_v33 = vadd.s32 1536, %v5224_v5  ;;  %vm5395_vm3 = vcmp.lt.s32.totalorder %v1293_v22, 127 }
 0x104   : > { %1773 = vrot.lane.b32.xlu1 %v1718_v51, %s4865_s30  ;;  %vm1691_vm2 = vmpackc.low %vm5381_vm15, %vm5374_vm14  ;;  %vm5401_vm4 = vcmp.lt.s32.totalorder %v1300_v27, 127  ;;  %v1730_v36 = vrot.slane %v1698_v24, %v5242_v12  ;;  %v5407_v37 = vadd.s32 1664, %v5224_v5  ;;  %v5414_v40 = vadd.s32 1792, %v5224_v5 }
 0x105   : > { %v579_v38 = vrot.slane %v565_v32, %v5231_v8  ;;  %v1307_v39 = vand.u32 127, %v5387_v33  ;;  %v5417_v42 = vadd.s32 1920, %v5224_v5  ;;  %v1734_v43 = vrot.slane %v1698_v24, %v5250_v17  ;;  %vm1692_vm5 = vmpackc.low %vm5401_vm4, %vm5395_vm3 }
 0x106   : > { %4252 = vmatmul.mubr.msk.bf16.vlgmr.msra.gmra.mrb[4].mxu0 %vm582_vm1, %v5297_v41  ;;  %v1314_v44 = vand.u32 127, %v5407_v37  ;;  %v1699_v8 = vsel %vm1691_vm2, 65537, %v4863_v1  ;;  %v1321_v51 = vand.u32 127, %v5414_v40  ;;  %v1700_v54 = vsel %vm1692_vm5, 65537, %v4863_v1 }
 0x107   : > { %808 = vmatpush1.bf16.msra.mxu0 %v612_v16  ;;  %839 = vmatprep.mubr.bf16.mxu0 %v4863_v1  ;;  %v581_v45 = vcombine.high %v579_v38, %v579_v38  ;;  %v1738_v46 = vrot.slane %v1699_v8, %v5242_v12  ;;  %vm5441_vm6 = vcmp.lt.s32.totalorder %v1307_v39, 127  ;;  %v1328_v52 = vand.u32 127, %v5417_v42 }
 0x108   : > { %1777 = vrot.lane.b32.xlu1 %v1726_v15, %s4865_s30  ;;  %4254 = vmatmul.mubr.msk.bf16.vlgmr.msra.gmra.mrb[4].mxu1 %vm582_vm1, %v5297_v41  ;;  %vm5447_vm7 = vcmp.lt.s32.totalorder %v1314_v44, 127  ;;  %v1742_v53 = vrot.slane %v1699_v8, %v5250_v17  ;;  %v624_v55 = vsel %vm586_vm0, %v572_v0, 0  ;;  %v630_v56 = vsel %vm586_vm0, %v579_v38, 0 }
 0x109   : > { %851 = vmatpush1.bf16.msra.mxu1 %v618_v25  ;;  %882 = vmatprep.mubr.bf16.mxu1 %v4863_v1  ;;  %vm1693_vm8 = vmpackc.low %vm5447_vm7, %vm5441_vm6  ;;  %vm5468_vm9 = vcmp.lt.s32.totalorder %v1321_v51, 127  ;;  %vm5474_vm10 = vcmp.lt.s32.totalorder %v1328_v52, 127  ;;  %v1746_v59 = vrot.slane %v1700_v54, %v5242_v12  ;;  %v1750_v60 = vrot.slane %v1700_v54, %v5250_v17 }
 0x10a   : > { %4259 = vmatprep.subr.msk.bf16.mxu0 %vm586_vm0, %v580_v31  ;;  %1779 = vrot.lane.b32.xlu0 %v1730_v36, %s4865_s30  ;;  %v1701_v63 = vsel %vm1693_vm8, 65537, %v4863_v1  ;;  %vm1411_vm11 = vcmp.ge.s32.totalorder %v5224_v5, 1  ;;  %vm1412_vm12 = vcmp.ge.s32.totalorder %v1230_v13, 1  ;;  %vm5503_vm14 = vcmp.ge.s32.totalorder %v1237_v18, 1 }
 0x10b   : > { %4261 = vmatprep.subr.msk.bf16.mxu1 %vm586_vm0, %v581_v45  ;;  %vm1694_vm0 = vmpackc.low %vm5474_vm10, %vm5468_vm9  ;;  %v1754_v0 = vrot.slane %v1701_v63, %v5242_v12  ;;  %v1758_v4 = vrot.slane %v1701_v63, %v5250_v17  ;;  %vm5509_vm15 = vcmp.ge.s32.totalorder %v1244_v19, 1  ;;  %vm1415_vm3 = vcmp.ge.s32.totalorder %v1251_v20, 1 }
 0x10c   : > { %1781 = vrot.lane.b32.xlu1 %v1734_v43, %s4865_s30  ;;  %v1702_v15 = vsel %vm1694_vm0, 65537, %v4863_v1  ;;  %vm1492_vm13 = vmpackc.low %vm1412_vm12, %vm1411_vm11  ;;  %vm1416_vm4 = vcmp.ge.s32.totalorder %v1258_v28, 1  ;;  %vm1417_vm5 = vcmp.ge.s32.totalorder %v1265_v48, 1  ;;  %vm1418_vm6 = vcmp.ge.s32.totalorder %v1272_v49, 1 }
 0x10d   : > { %v1762_v13 = vrot.slane %v1702_v15, %v5242_v12  ;;  %v1766_v16 = vrot.slane %v1702_v15, %v5250_v17  ;;  %v1500_v9 = vsel %vm1492_vm13, 65537, %v4863_v1  ;;  %vm1493_vm2 = vmpackc.low %vm5509_vm15, %vm5503_vm14  ;;  %vm1419_vm8 = vcmp.ge.s32.totalorder %v1279_v6, 1 }
 0x10e   : > { %4256 = vmatmul.mubr.msk.bf16.vlgmr.msra.gmra.mrb[8].mxu0 %vm582_vm1, %v5297_v41  ;;  %1783 = vrot.lane.b32.xlu0 %v1738_v46, %s4865_s30  ;;  %v1511_v10 = vrot.slane %v1500_v9, %v5242_v12  ;;  %v1515_v18 = vrot.slane %v1500_v9, %v5250_v17  ;;  %v1501_v19 = vsel %vm1493_vm2, 65537, %v4863_v1  ;;  %vm1495_vm7 = vmpackc.low %vm1418_vm6, %vm1417_vm5  ;;  %vm1420_vm9 = vcmp.ge.s32.totalorder %v1286_v21, 1 }
 0x10f   : > { %894 = vmatpush1.bf16.msra.mxu0 %v624_v55  ;;  %925 = vmatprep.mubr.bf16.mxu0 %v4863_v1  ;;  %v1519_v11 = vrot.slane %v1501_v19, %v5242_v12  ;;  %v1523_v14 = vrot.slane %v1501_v19, %v5250_v17  ;;  %v1503_v29 = vsel %vm1495_vm7, 65537, %v4863_v1  ;;  %vm1496_vm10 = vmpackc.low %vm1420_vm9, %vm1419_vm8  ;;  %vm1421_vm0 = vcmp.ge.s32.totalorder %v1293_v22, 1 }
 0x110   : > { %1785 = vrot.lane.b32.xlu1 %v1742_v53, %s4865_s30  ;;  %4258 = vmatmul.mubr.msk.bf16.vlgmr.msra.gmra.mrb[8].mxu1 %vm582_vm1, %v5297_v41  ;;  %vm1422_vm11 = vcmp.ge.s32.totalorder %v1300_v27, 1  ;;  %v1539_v48 = vrot.slane %v1503_v29, %v5250_v17  ;;  %v1504_v49 = vsel %vm1496_vm10, 65537, %v4863_v1  ;;  %vm1423_vm13 = vcmp.ge.s32.totalorder %v1307_v39, 1 }
 0x111   : > { %937 = vmatpush1.bf16.msra.mxu1 %v630_v56  ;;  %968 = vmatprep.mubr.bf16.mxu1 %v4863_v1  ;;  %vm1497_vm12 = vmpackc.low %vm1422_vm11, %vm1421_vm0  ;;  %vm1424_vm14 = vcmp.ge.s32.totalorder %v1314_v44, 1  ;;  %v1543_v61 = vrot.slane %v1504_v49, %v5242_v12  ;;  %v1547_v62 = vrot.slane %v1504_v49, %v5250_v17  ;;  %vm1425_vm2 = vcmp.ge.s32.totalorder %v1321_v51, 1 }
 0x112   : > { %1787 = vrot.lane.b32.xlu0 %v1746_v59, %s4865_s30  ;;  %v1505_v2 = vsel %vm1497_vm12, 65537, %v4863_v1  ;;  %vm1498_vm15 = vmpackc.low %vm1424_vm14, %vm1423_vm13  ;;  %vm1604_vm9 = vcmask 1039360  }
 0x113   : > { %v1551_v3 = vrot.slane %v1505_v2, %v5242_v12  ;;  %v1555_v6 = vrot.slane %v1505_v2, %v5250_v17  ;;  %v1506_v21 = vsel %vm1498_vm15, 65537, %v4863_v1 }
 0x114   : > { %1789 = vrot.lane.b32.xlu1 %v1750_v60, %s4865_s30  ;;  %v1559_v22 = vrot.slane %v1506_v21, %v5242_v12  ;;  %v1563_v24 = vrot.slane %v1506_v21, %v5250_v17  ;;  %v1459_v60 = vld [vmem:[#allocation2] sm:$0xff] }
 0x116   : > { %4260 = vmatmul.mubr.msk.bf16.vlgmr.msra.gmra.mrb[12].mxu0 %vm582_vm1, %v5297_v41  ;;  %1791 = vrot.lane.b32.xlu0 %v1754_v0, %s4865_s30  ;;  %v3199_v0 = vld [vmem:[#allocation2 + $0x98] sm:$0xff] }
 0x117   : > { %2346 = vmatprep.mubr.bf16.mxu0 %v4863_v1 }
 0x118   : > { %1793 = vrot.lane.b32.xlu1 %v1758_v4, %s4865_s30  ;;  %4262 = vmatmul.mubr.msk.bf16.vlgmr.msra.gmra.mrb[12].mxu1 %vm582_vm1, %v5297_v41  ;;  %vm1494_vm1 = vmpackc.low %vm1416_vm4, %vm1415_vm3  ;;  %v1535_v41 = vrot.slane %v1503_v29, %v5242_v12  ;;  %vm1426_vm3 = vcmp.ge.s32.totalorder %v1328_v52, 1 }
 0x119   : > { %2389 = vmatprep.mubr.bf16.mxu1 %v4863_v1  ;;  %v1502_v20 = vsel %vm1494_vm1, 65537, %v4863_v1  ;;  %vm1499_vm4 = vmpackc.low %vm1426_vm3, %vm1425_vm2  ;;  %vm1799_vm1 = vcmask 7168  }
 0x11a   : > { %1795 = vrot.lane.b32.xlu0 %v1762_v13, %s4865_s30  ;;  %v1527_v23 = vrot.slane %v1502_v20, %v5242_v12  ;;  %v1531_v28 = vrot.slane %v1502_v20, %v5250_v17  ;;  %v1507_v25 = vsel %vm1499_vm4, 65537, %v4863_v1 }
 0x11b   : > { %v1567_v26 = vrot.slane %v1507_v25, %v5242_v12  ;;  %v1571_v27 = vrot.slane %v1507_v25, %v5250_v17 }
 0x11c   : > { %1797 = vrot.lane.b32.xlu1 %v1766_v16, %s4865_s30 }
 0x11e   : > { %1572 = vrot.lane.b32.xlu0 %v1511_v10, %s4866_s8 }
 0x120   : > { %1574 = vrot.lane.b32.xlu1 %v1515_v18, %s4866_s8 }
 0x122   : > { %1576 = vrot.lane.b32.xlu0 %v1519_v11, %s4866_s8 }
 0x124   : > { %1578 = vrot.lane.b32.xlu1 %v1523_v14, %s4866_s8 }
 0x126   : > { %1580 = vrot.lane.b32.xlu0 %v1527_v23, %s4866_s8 }
 0x128   : > { %1582 = vrot.lane.b32.xlu1 %v1531_v28, %s4866_s8 }
 0x12a   : > { %1584 = vrot.lane.b32.xlu0 %v1535_v41, %s4866_s8 }
 0x12c   : > { %1586 = vrot.lane.b32.xlu1 %v1539_v48, %s4866_s8 }
 0x12e   : > { %1588 = vrot.lane.b32.xlu0 %v1543_v61, %s4866_s8 }
 0x130   : > { %1590 = vrot.lane.b32.xlu1 %v1547_v62, %s4866_s8 }
 0x132   : > { %1592 = vrot.lane.b32.xlu0 %v1551_v3, %s4866_s8 }
 0x134   : > { %1594 = vrot.lane.b32.xlu1 %v1555_v6, %s4866_s8 }
 0x136   : > { %1596 = vrot.lane.b32.xlu0 %v1559_v22, %s4866_s8 }
 0x138   : > { %1598 = vrot.lane.b32.xlu1 %v1563_v24, %s4866_s8 }
 0x13a   : > { %1600 = vrot.lane.b32.xlu0 %v1567_v26, %s4866_s8 }
 0x13c   : > { %1602 = vrot.lane.b32.xlu1 %v1571_v27, %s4866_s8 }
 0x13e   : > { %2093 = vrot.lane.b32.xlu0 %v4534_v30, %s4867_s20 }
 0x140   : > { %1865 = vrot.lane.b32.xlu1 %v4863_v1, %s4866_s8 }
 0x142   : > { %3218 = vrot.lane.b32.xlu0 %v4863_v1, %s4866_s8 }
 0x144   : > { %2112 = vrot.lane.b32.xlu1 %v4863_v1, %s4865_s30 }
 0x148   : > { %3268 = vrot.lane.b32.xlu1 %v4863_v1, %s4868_s15 }
 0x16e   : > { %v5594_v31 = vpop.permute.xlu1 %1767 }
 0x16f   : > { %vm1815_vm8 = vcmp.ne.s16.totalorder %v5594_v31, 0 }
 0x171   : > { %v5600_v17 = vpop.permute.xlu0 %497 }
 0x172   : > { %v5596_v12 = vpop.permute.xlu1 %1769 }
 0x173   : > { %v5696_v22 = vsel %vm1799_vm1, %v5594_v31, %v5596_v12 }
 0x174   : > { %vm1816_vm0 = vcmp.ne.s16.totalorder %v5696_v22, 0 }
 0x175   : > { %v5604_v34 = vpop.permute.xlu0 %502 }
 0x176   : > { %v5598_v32 = vpop.permute.xlu1 %1773 }
 0x179   : > { %v5608_v36 = vpop.permute.xlu0 %1771 }
 0x17a   : > { %v5602_v33 = vpop.permute.xlu1 %1777 }
 0x17d   : > { %v5612_v38 = vpop.permute.xlu0 %1775 }
 0x17e   : > { %v5606_v35 = vpop.permute.xlu1 %1781 }
 0x181   : > { %v5616_v40 = vpop.permute.xlu0 %1779 }
 0x182   : > { %v5610_v37 = vpop.permute.xlu1 %1785 }
 0x185   : > { %v5620_v43 = vpop.permute.xlu0 %1783 }
 0x186   : > { %v5614_v39 = vpop.permute.xlu1 %1789 }
 0x189   : > { %v5624_v8 = vpop.permute.xlu0 %1787 }
 0x18a   : > { %v5618_v42 = vpop.permute.xlu1 %1793  ;;  %v6008_v31 = vsel %vm1799_vm1, %v5610_v37, %v5624_v8 }
 0x18d   : > { %v5628_v46 = vpop.permute.xlu0 %1791 }
 0x18e   : > { %v5622_v44 = vpop.permute.xlu1 %1797 }
 0x18f   : > { %vm1831_vm7 = vcmp.ne.s16.totalorder %v5622_v44, 0 }
 0x190   : > { %v3216_v15 = vsel %vm1831_vm7, %v3199_v0, 0 }
 0x191   : > { %v5632_v50 = vpop.permute.xlu0 %1795 }
 0x192   : > { %v5626_v45 = vpop.permute.xlu1 %1574  ;;  %v5637_v51 = vsel %vm1799_vm1, %v5632_v50, %v5622_v44 }
 0x195   : > { %v5641_v53 = vpop.permute.xlu0 %1572 }
 0x196   : > { %v5630_v47 = vpop.permute.xlu1 %1578  ;;  %vm7337_vm5 = vcmp.ne.s16.totalorder %v5641_v53, 0  ;;  %v5675_v4 = vsel %vm1604_vm9, %v5641_v53, %v5626_v45 }
 0x197   : > { %v1637_v63 = vsel %vm7337_vm5, %v1459_v60, 0  ;;  %vm7340_vm10 = vcmp.ne.s16.totalorder %v5675_v4, 0 }
 0x19a   : > { %v5639_v52 = vpop.permute.xlu1 %1582 }
 0x19e   : > { %v5647_v54 = vpop.permute.xlu1 %1586 }
 0x1a2   : > { %v5651_v55 = vpop.permute.xlu1 %1590 }
 0x1a6   : > { %v5653_v56 = vpop.permute.xlu1 %1594 }
 0x1aa   : > { %v5655_v57 = vpop.permute.xlu1 %1598 }
 0x1ae   : > { %v5657_v58 = vpop.permute.xlu1 %1602 }
 0x1b2   : > { %v5659_v59 = vpop.permute.xlu1 %1865 }
 0x1b3   : > { %2709 = vrot.lane.b32.xlu0 %v5659_v59, %s4865_s30 }
 0x1b7   : > { %2070 = vrot.lane.b32.xlu0 %v4863_v1, %s4868_s15 }
 0x1bb   : > { %1929 = vrot.lane.b32.xlu0 %v4863_v1, %s4868_s15 }
 0x1bf   : > { %2675 = vrot.lane.b32.xlu0 %v1637_v63, %s4865_s30 }
 0x1c3   : > { %3270 = vrot.lane.b32.xlu0 %v3216_v15, %s4868_s15 }
 0x1c7   : > { %2677 = vrot.lane.b32.xlu0 %v4863_v1, %s4865_s30 }
 0x1d1   : > { %v669_v5 = vpop.f32.mrb[0].mxu0 }
 0x1d2   : > { %v670_v7 = vadd.f32 %v669_v5, %v5600_v17  ;;  %v671_v13 = vpop.f32.mrb[1].mxu0 }
 0x1d3   : > { %v672_v16 = vadd.f32 %v671_v13, %v5600_v17  ;;  %v673_v9 = vpop.f32.mrb[2].mxu0  ;;  %v712_v10 = vpop.f32.mrb[0].mxu1 }
 0x1d4   : > { %v979_v18 = vmax.f32 %v670_v7, 0.0  ;;  %v674_v19 = vadd.f32 %v673_v9, %v5604_v34  ;;  %v713_v11 = vadd.f32 %v712_v10, %v5600_v17  ;;  %v675_v14 = vpop.f32.mrb[3].mxu0  ;;  %v714_v20 = vpop.f32.mrb[1].mxu1  ;;  %v5716_v7 = vsel %vm1799_vm1, %v5596_v12, %v5608_v36 }
 0x1d5   : > { %v980_v23 = vmax.f32 %v672_v16, 0.0  ;;  %v676_v28 = vadd.f32 %v675_v14, %v5604_v34  ;;  %v715_v1 = vadd.f32 %v714_v20, %v5600_v17  ;;  %v716_v29 = vpop.f32.mrb[2].mxu1  ;;  %vm1817_vm11 = vcmp.ne.s16.totalorder %v5716_v7, 0 }
 0x1d6   : > { %v995_v41 = vmax.f32 %v674_v19, 0.0  ;;  %v981_v48 = vmax.f32 %v713_v11, 0.0  ;;  %v717_v49 = vadd.f32 %v716_v29, %v5604_v34  ;;  %v718_v61 = vpop.f32.mrb[3].mxu1 }
 0x1d7   : > { %v996_v62 = vmax.f32 %v676_v28, 0.0  ;;  %v982_v2 = vmax.f32 %v715_v1, 0.0  ;;  %v719_v3 = vadd.f32 %v718_v61, %v5604_v34 }
 0x1d8   : > { %v5691_v6 = vpack.c.bf16 %v995_v41, %v979_v18  ;;  %v997_v21 = vmax.f32 %v717_v49, 0.0  ;;  %v1577_v18 = vpop.permute.xlu0 %1576 }
 0x1d9   : > { %v5698_v24 = vpack.c.bf16 %v996_v62, %v980_v23  ;;  %v998_v25 = vmax.f32 %v719_v3, 0.0  ;;  %v755_v26 = vpop.f32.mrb[4].mxu0  ;;  %v5736_v61 = vsel %vm1604_vm9, %v5626_v45, %v1577_v18 }
 0x1da   : > { %1027 = vst [vmem:[#allocation2 + $0x10] sm:$0xff] %v5691_v6  ;;  %v5701_v27 = vpack.c.bf16 %v997_v21, %v981_v48  ;;  %v756_v30 = vadd.f32 %v755_v26, %v5600_v17  ;;  %v757_v60 = vpop.f32.mrb[5].mxu0  ;;  %1867 = vrot.lane.b32.xlu1 %v5691_v6, %s4866_s8  ;;  %v1833_v20 = vsel %vm1816_vm0, %v5691_v6, 0  ;;  %v2000_v29 = vsel %vm1815_vm8, %v5691_v6, 0 }
 0x1db   : > { %1028 = vst [vmem:[#allocation2 + $0x18] sm:$0xff] %v5698_v24  ;;  %v5707_v63 = vpack.c.bf16 %v998_v25, %v982_v2  ;;  %v758_v0 = vadd.f32 %v757_v60, %v5600_v17  ;;  %v759_v15 = vpop.f32.mrb[6].mxu0  ;;  %v798_v5 = vpop.f32.mrb[4].mxu1  ;;  %1869 = vrot.lane.b32.xlu0 %v5698_v24, %s4866_s8  ;;  %v1983_v60 = vsel %vm7340_vm10, %v5691_v6, 0  ;;  %vm7338_vm12 = vcmp.ne.s16.totalorder %v5736_v61, 0 }
 0x1dc   : > { %1029 = vst [vmem:[#allocation2 + $0x20] sm:$0xff] %v5701_v27  ;;  %v760_v13 = vadd.f32 %v759_v15, %v5604_v34  ;;  %v799_v16 = vadd.f32 %v798_v5, %v5600_v17  ;;  %v761_v9 = vpop.f32.mrb[7].mxu0  ;;  %v800_v10 = vpop.f32.mrb[5].mxu1  ;;  %v983_v12 = vmax.f32 %v756_v30, 0.0  ;;  %v1834_v5 = vsel %vm1817_vm11, %v5698_v24, 0 }
 0x1dd   : > { %v762_v19 = vadd.f32 %v761_v9, %v5604_v34  ;;  %v801_v11 = vadd.f32 %v800_v10, %v5600_v17  ;;  %v802_v14 = vpop.f32.mrb[6].mxu1  ;;  %v984_v41 = vmax.f32 %v758_v0, 0.0  ;;  %v3201_v7 = vsel %vm1816_vm0, %v5701_v27, 0 }
 0x1de   : > { %v999_v23 = vmax.f32 %v760_v13, 0.0  ;;  %v803_v28 = vadd.f32 %v802_v14, %v5604_v34  ;;  %v804_v1 = vpop.f32.mrb[7].mxu1  ;;  %1931 = vrot.lane.b32.xlu1 %v1833_v20, %s4868_s15  ;;  %v985_v2 = vmax.f32 %v799_v16, 0.0 }
 0x1df   : > { %v1000_v48 = vmax.f32 %v762_v19, 0.0  ;;  %v805_v49 = vadd.f32 %v804_v1, %v5604_v34  ;;  %2038 = vrot.lane.b32.xlu0 %v2000_v29, %s4868_s15  ;;  %v986_v25 = vmax.f32 %v801_v11, 0.0  ;;  %v1639_v29 = vsel %vm7338_vm12, %v5691_v6, 0 }
 0x1e0   : > { %v5738_v62 = vpack.c.bf16 %v999_v23, %v983_v12  ;;  %v1001_v3 = vmax.f32 %v803_v28, 0.0  ;;  %v5763_v12 = vsel %vm1604_vm9, %v1577_v18, %v5630_v47  ;;  %v1984_v18 = vsel %vm7338_vm12, %v5698_v24, 0 }
 0x1e1   : > { %v5740_v21 = vpack.c.bf16 %v1000_v48, %v984_v41  ;;  %v1002_v26 = vmax.f32 %v805_v49, 0.0  ;;  %v841_v30 = vpop.f32.mrb[8].mxu0  ;;  %vm1623_vm13 = vcmp.ne.s16.totalorder %v5763_v12, 0 }
 0x1e2   : > { %1031 = vst [vmem:[#allocation2 + $0x30] sm:$0xff] %v5738_v62  ;;  %v5746_v0 = vpack.c.bf16 %v1001_v3, %v985_v2  ;;  %v842_v45 = vadd.f32 %v841_v30, %v5600_v17  ;;  %v843_v15 = vpop.f32.mrb[9].mxu0  ;;  %2114 = vrot.lane.b32.xlu1 %v1983_v60, %s4865_s30  ;;  %v5858_v22 = vsel %vm1623_vm13, %v5707_v63, 0 }
 0x1e3   : > { %1032 = vst [vmem:[#allocation2 + $0x38] sm:$0xff] %v5740_v21  ;;  %v5754_v13 = vpack.c.bf16 %v1002_v26, %v986_v25  ;;  %v844_v16 = vadd.f32 %v843_v15, %v5600_v17  ;;  %v845_v9 = vpop.f32.mrb[10].mxu0  ;;  %v884_v10 = vpop.f32.mrb[8].mxu1  ;;  %1933 = vrot.lane.b32.xlu0 %v1834_v5, %s4868_s15 }
 0x1e4   : > { %v846_v19 = vadd.f32 %v845_v9, %v5604_v34  ;;  %v885_v11 = vadd.f32 %v884_v10, %v5600_v17  ;;  %v847_v14 = vpop.f32.mrb[11].mxu0  ;;  %v886_v20 = vpop.f32.mrb[9].mxu1  ;;  %v987_v41 = vmax.f32 %v842_v45, 0.0  ;;  %v5783_v45 = vsel %vm1816_vm0, %v5698_v24, 0 }
 0x1e5   : > { %1034 = vst [vmem:[#allocation2 + $0x48] sm:$0xff] %v5754_v13  ;;  %v848_v23 = vadd.f32 %v847_v14, %v5604_v34  ;;  %v887_v28 = vadd.f32 %v886_v20, %v5600_v17  ;;  %v888_v1 = vpop.f32.mrb[10].mxu1  ;;  %v988_v3 = vmax.f32 %v844_v16, 0.0  ;;  %v1640_v14 = vsel %vm1623_vm13, %v5698_v24, 0 }
 0x1e6   : > { %v1003_v48 = vmax.f32 %v846_v19, 0.0  ;;  %v889_v49 = vadd.f32 %v888_v1, %v5604_v34  ;;  %v890_v2 = vpop.f32.mrb[11].mxu1  ;;  %2679 = vrot.lane.b32.xlu1 %v1639_v29, %s4865_s30  ;;  %v989_v6 = vmax.f32 %v885_v11, 0.0 }
 0x1e7   : > { %v1004_v25 = vmax.f32 %v848_v23, 0.0  ;;  %v891_v26 = vadd.f32 %v890_v2, %v5604_v34  ;;  %2116 = vrot.lane.b32.xlu0 %v1984_v18, %s4865_s30  ;;  %v990_v5 = vmax.f32 %v887_v28, 0.0 }
 0x1e8   : > { %v5778_v30 = vpack.c.bf16 %v1003_v48, %v987_v41  ;;  %v1005_v60 = vmax.f32 %v889_v49, 0.0 }
 0x1e9   : > { %v5786_v15 = vpack.c.bf16 %v1004_v25, %v988_v3  ;;  %v1006_v16 = vmax.f32 %v891_v26, 0.0  ;;  %v927_v9 = vpop.f32.mrb[12].mxu0 }
 0x1ea   : > { %1035 = vst [vmem:[#allocation2 + $0x50] sm:$0xff] %v5778_v30  ;;  %v5789_v10 = vpack.c.bf16 %v1005_v60, %v989_v6  ;;  %v928_v19 = vadd.f32 %v927_v9, %v5600_v17  ;;  %v929_v11 = vpop.f32.mrb[13].mxu0 }
 0x1eb   : > { %1036 = vst [vmem:[#allocation2 + $0x58] sm:$0xff] %v5786_v15  ;;  %v5796_v20 = vpack.c.bf16 %v1006_v16, %v990_v5  ;;  %v930_v23 = vadd.f32 %v929_v11, %v5600_v17  ;;  %v931_v28 = vpop.f32.mrb[14].mxu0  ;;  %v970_v1 = vpop.f32.mrb[12].mxu1  ;;  %2681 = vrot.lane.b32.xlu0 %v1640_v14, %s4865_s30  ;;  %v5813_v11 = vsel %vm1817_vm11, %v5707_v63, 0 }
 0x1ec   : > { %1037 = vst [vmem:[#allocation2 + $0x60] sm:$0xff] %v5789_v10  ;;  %v932_v29 = vadd.f32 %v931_v28, %v5604_v34  ;;  %v971_v41 = vadd.f32 %v970_v1, %v5600_v17  ;;  %v933_v48 = vpop.f32.mrb[15].mxu0  ;;  %v972_v49 = vpop.f32.mrb[13].mxu1  ;;  %v991_v25 = vmax.f32 %v928_v19, 0.0 }
 0x1ed   : > { %1038 = vst [vmem:[#allocation2 + $0x68] sm:$0xff] %v5796_v20  ;;  %v934_v2 = vadd.f32 %v933_v48, %v5604_v34  ;;  %v973_v18 = vadd.f32 %v972_v49, %v5600_v17  ;;  %v974_v3 = vpop.f32.mrb[14].mxu1  ;;  %v992_v5 = vmax.f32 %v930_v23, 0.0  ;;  %v1581_v28 = vpop.permute.xlu0 %1580  ;;  %v2002_v48 = vsel %vm1817_vm11, %v5701_v27, 0 }
 0x1ee   : > { %v1007_v26 = vmax.f32 %v932_v29, 0.0  ;;  %v975_v6 = vadd.f32 %v974_v3, %v5604_v34  ;;  %v976_v60 = vpop.f32.mrb[15].mxu1  ;;  %v993_v17 = vmax.f32 %v971_v41, 0.0  ;;  %v5834_v41 = vsel %vm1799_vm1, %v5598_v32, %v5612_v38 }
 0x1ef   : > { %v1008_v16 = vmax.f32 %v934_v2, 0.0  ;;  %v977_v9 = vadd.f32 %v976_v60, %v5604_v34  ;;  %1873 = vrot.lane.b32.xlu0 %v5707_v63, %s4866_s8  ;;  %v994_v29 = vmax.f32 %v973_v18, 0.0  ;;  %vm1819_vm14 = vcmp.ne.s16.totalorder %v5834_v41, 0 }
 0x1f0   : > { %v5815_v14 = vpack.c.bf16 %v1007_v26, %v991_v25  ;;  %v1009_v19 = vmax.f32 %v975_v6, 0.0  ;;  %v5843_v18 = vsel %vm1604_vm9, %v5630_v47, %v1581_v28  ;;  %v1836_v25 = vsel %vm1819_vm14, %v5707_v63, 0 }
 0x1f1   : > { %v5817_v1 = vpack.c.bf16 %v1008_v16, %v992_v5  ;;  %v1010_v23 = vmax.f32 %v977_v9, 0.0  ;;  %v1585_v2 = vpop.permute.xlu0 %1584  ;;  %vm7339_vm15 = vcmp.ne.s16.totalorder %v5843_v18, 0  ;;  %v5862_v47 = vsel %vm1604_vm9, %v1581_v28, %v5639_v52 }
 0x1f2   : > { %1039 = vst [vmem:[#allocation2 + $0x70] sm:$0xff] %v5815_v14  ;;  %v5820_v34 = vpack.c.bf16 %v1009_v19, %v993_v17  ;;  %v5847_v3 = vsel %vm1604_vm9, %v5639_v52, %v1585_v2  ;;  %v1986_v26 = vsel %vm7339_vm15, %v5707_v63, 0  ;;  %vm7335_vm3 = vcmp.ne.s16.totalorder %v5862_v47, 0 }
 0x1f3   : > { %1040 = vst [vmem:[#allocation2 + $0x78] sm:$0xff] %v5817_v1  ;;  %v5826_v49 = vpack.c.bf16 %v1010_v23, %v994_v29  ;;  %2042 = vrot.lane.b32.xlu0 %v2002_v48, %s4868_s15  ;;  %vm1626_vm2 = vcmp.ne.s16.totalorder %v5847_v3, 0  ;;  %v1642_v52 = vsel %vm7335_vm3, %v5707_v63, 0  ;;  %v2004_v5 = vsel %vm1819_vm14, %v5738_v62, 0 }
 0x1f4   : > { %1041 = vst [vmem:[#allocation2 + $0x80] sm:$0xff] %v5820_v34  ;;  %v5870_v6 = vsel %vm1626_vm2, %v5746_v0, 0  ;;  %v5889_v9 = vsel %vm1799_vm1, %v5608_v36, %v5598_v32  ;;  %v1987_v17 = vsel %vm7335_vm3, %v5738_v62, 0  ;;  %v5905_v32 = vsel %vm1799_vm1, %v5602_v33, %v5616_v40 }
 0x1f5   : > { %1042 = vst [vmem:[#allocation2 + $0x88] sm:$0xff] %v5826_v49  ;;  %v5874_v60 = vpop.permute.xlu0 %1588  ;;  %vm1818_vm4 = vcmp.ne.s16.totalorder %v5889_v9, 0  ;;  %vm1821_vm0 = vcmp.ne.s16.totalorder %v5905_v32, 0  ;;  %v5914_v29 = vsel %vm1604_vm9, %v1585_v2, %v5647_v54  ;;  %v1641_v12 = vsel %vm7339_vm15, %v5701_v27, 0 }
 0x1f6   : > { %v3203_v28 = vsel %vm1818_vm4, %v5738_v62, 0  ;;  %7432 = vst [vmem:[#allocation28_spill] sm:$0xff] %v5914_v29  ;;  %v1838_v23 = vsel %vm1821_vm0, %v5740_v21, 0  ;;  %vm7336_vm11 = vcmp.ne.s16.totalorder %v5914_v29, 0  ;;  %v2006_v2 = vsel %vm1821_vm0, %v5746_v0, 0 }
 0x1f7   : > { %3240 = vrot.lane.b32.xlu0 %v3201_v7, %s4868_s15  ;;  %v1644_v7 = vsel %vm7336_vm11, %v5740_v21, 0  ;;  %v6174_v41 = vsel %vm1604_vm9, %v5647_v54, %v5874_v60 }
 0x1f9   : > { %v5884_v16 = vpop.permute.xlu0 %1592 }
 0x1fb   : > { %1937 = vrot.lane.b32.xlu0 %v1836_v25, %s4868_s15 }
 0x1fd   : > { %v5896_v19 = vpop.permute.xlu0 %1596 }
 0x1ff   : > { %2120 = vrot.lane.b32.xlu0 %v1986_v26, %s4865_s30  ;;  %v5936_v26 = vsel %vm1799_vm1, %v5612_v38, %v5602_v33 }
 0x200   : > { %vm1820_vm3 = vcmp.ne.s16.totalorder %v5936_v26, 0  ;;  %v6141_v26 = vsel %vm1799_vm1, %v5624_v8, %v5614_v39 }
 0x201   : > { %v5909_v36 = vpop.permute.xlu0 %1600  ;;  %v3205_v33 = vsel %vm1820_vm3, %v5746_v0, 0 }
 0x203   : > { %2685 = vrot.lane.b32.xlu0 %v1642_v52, %s4865_s30  ;;  %v1989_v52 = vsel %vm7336_vm11, %v5746_v0, 0 }
 0x205   : > { %v5920_v48 = vpop.permute.xlu0 %2093 }
 0x207   : > { %2046 = vrot.lane.b32.xlu0 %v2004_v5, %s4868_s15 }
 0x209   : > { %v5927_v25 = vpop.permute.xlu0 %3218 }
 0x20a   : > { %7433 = vst [vmem:[#allocation29_spill] sm:$0xff] %v5927_v25 }
 0x20b   : > { %2122 = vrot.lane.b32.xlu0 %v1987_v17, %s4865_s30  ;;  %v5948_v17 = vsel %vm1799_vm1, %v5606_v35, %v5620_v43 }
 0x20c   : > { %vm1823_vm11 = vcmp.ne.s16.totalorder %v5948_v17, 0 }
 0x20f   : > { %3244 = vrot.lane.b32.xlu0 %v3203_v28, %s4868_s15  ;;  %v5960_v28 = vsel %vm1604_vm9, %v5874_v60, %v5651_v55 }
 0x210   : > { %7435 = vst [vmem:[#allocation31_spill] sm:$0xff] %v5960_v28  ;;  %vm1629_vm5 = vcmp.ne.s16.totalorder %v5960_v28, 0 }
 0x213   : > { %1879 = vrot.lane.b32.xlu0 %v5746_v0, %s4866_s8 }
 0x217   : > { %1941 = vrot.lane.b32.xlu0 %v1838_v23, %s4868_s15  ;;  %v1840_v23 = vsel %vm1823_vm11, %v5754_v13, 0 }
 0x21b   : > { %2689 = vrot.lane.b32.xlu0 %v1644_v7, %s4865_s30 }
 0x21f   : > { %2050 = vrot.lane.b32.xlu0 %v2006_v2, %s4868_s15  ;;  %v1646_v2 = vsel %vm1629_vm5, %v5754_v13, 0 }
 0x223   : > { %2126 = vrot.lane.b32.xlu0 %v1989_v52, %s4865_s30  ;;  %v5984_v52 = vsel %vm1799_vm1, %v5616_v40, %v5606_v35  ;;  %v1835_v35 = vsel %vm1818_vm4, %v5701_v27, 0 }
 0x224   : > { %vm1822_vm12 = vcmp.ne.s16.totalorder %v5984_v52, 0  ;;  %v1848_v52 = vsel %vm1831_vm7, %v5826_v49, 0  ;;  %vm1963_vm7 = vcmask 1031168  }
 0x225   : > { %v5942_v5 = vpop.permute.xlu0 %2709 }
 0x226   : > { %7434 = vst [vmem:[#allocation30_spill] sm:$0xff] %v5942_v5 }
 0x227   : > { %3248 = vrot.lane.b32.xlu0 %v3205_v33, %s4868_s15  ;;  %v2008_v33 = vsel %vm1823_vm11, %v5778_v30, 0 }
 0x229   : > { %v5954_v38 = vpop.permute.xlu0 %2070 }
 0x22b   : > { %1945 = vrot.lane.b32.xlu0 %v1840_v23, %s4868_s15  ;;  %v3200_v23 = vsel %vm1815_vm8, %v5698_v24, 0  ;;  %v1985_v24 = vsel %vm1623_vm13, %v5701_v27, 0  ;;  %vm1825_vm8 = vcmp.ne.s16.totalorder %v6008_v31, 0 }
 0x22c   : > { %v2010_v9 = vsel %vm1825_vm8, %v5789_v10, 0 }
 0x22d   : > { %v5966_v7 = vpop.permute.xlu0 %1929 }
 0x22e   : > { %2715 = vrot.lane.b32.xlu1 %v5966_v7, %s4865_s30 }
 0x22f   : > { %2693 = vrot.lane.b32.xlu0 %v1646_v2, %s4865_s30  ;;  %v6020_v2 = vsel %vm1604_vm9, %v5651_v55, %v5884_v16  ;;  %v6036_v55 = vsel %vm1604_vm9, %v5884_v16, %v5653_v56 }
 0x230   : > { %7437 = vst [vmem:[#allocation33_spill] sm:$0xff] %v6020_v2  ;;  %vm1630_vm13 = vcmp.ne.s16.totalorder %v6020_v2, 0  ;;  %7439 = vst [vmem:[#allocation35_spill] sm:$0xff] %v6036_v55  ;;  %vm1631_vm15 = vcmp.ne.s16.totalorder %v6036_v55, 0 }
 0x231   : > { %v6002_v40 = vpop.permute.xlu0 %2675  ;;  %v1648_v16 = vsel %vm1631_vm15, %v5786_v15, 0 }
 0x232   : > { %1871 = vrot.lane.b32.xlu1 %v5701_v27, %s4866_s8  ;;  %7436 = vst [vmem:[#allocation32_spill] sm:$0xff] %v6002_v40  ;;  %v2003_v27 = vsel %vm1818_vm4, %v5707_v63, 0  ;;  %v6064_v63 = vsel %vm1799_vm1, %v5620_v43, %v5610_v37 }
 0x233   : > { %1883 = vrot.lane.b32.xlu0 %v5778_v30, %s4866_s8  ;;  %vm1824_vm4 = vcmp.ne.s16.totalorder %v6064_v63, 0 }
 0x234   : > { %v3209_v43 = vsel %vm1824_vm4, %v5789_v10, 0  ;;  %v1841_v32 = vsel %vm1824_vm4, %v5778_v30, 0 }
 0x236   : > { %2040 = vrot.lane.b32.xlu1 %v5783_v45, %s4868_s15  ;;  %v3207_v45 = vsel %vm1822_vm12, %v5778_v30, 0 }
 0x237   : > { %2054 = vrot.lane.b32.xlu0 %v2008_v33, %s4868_s15  ;;  %v2113_v33 = vpop.permute.xlu1 %2112 }
 0x23a   : > { %3238 = vrot.lane.b32.xlu1 %v3200_v23, %s4868_s15  ;;  %v1842_v23 = vsel %vm1825_vm8, %v5786_v15, 0 }
 0x23b   : > { %3252 = vrot.lane.b32.xlu0 %v3207_v45, %s4868_s15  ;;  %v6025_v45 = vpop.permute.xlu0 %3270 }
 0x23c   : > { %7438 = vst [vmem:[#allocation34_spill] sm:$0xff] %v6025_v45  ;;  %v1643_v45 = vsel %vm1626_vm2, %v5738_v62, 0 }
 0x23e   : > { %1935 = vrot.lane.b32.xlu1 %v1835_v35, %s4868_s15  ;;  %v1992_v35 = vsel %vm1630_vm13, %v5786_v15, 0 }
 0x23f   : > { %1887 = vrot.lane.b32.xlu0 %v5789_v10, %s4866_s8 }
 0x242   : > { %2118 = vrot.lane.b32.xlu1 %v1985_v24, %s4865_s30  ;;  %v6042_v24 = vpop.permute.xlu1 %3268 }
 0x243   : > { %1949 = vrot.lane.b32.xlu0 %v1842_v23, %s4868_s15  ;;  %7440 = vst [vmem:[#allocation36_spill] sm:$0xff] %v6042_v24  ;;  %v6048_v23 = vpop.permute.xlu0 %2677 }
 0x244   : > { %7441 = vst [vmem:[#allocation37_spill] sm:$0xff] %v6048_v23 }
 0x246   : > { %2683 = vrot.lane.b32.xlu1 %v1641_v12, %s4865_s30 }
 0x247   : > { %2132 = vrot.lane.b32.xlu0 %v1992_v35, %s4865_s30 }
 0x24a   : > { %2044 = vrot.lane.b32.xlu1 %v2003_v27, %s4868_s15 }
 0x24b   : > { %2697 = vrot.lane.b32.xlu0 %v1648_v16, %s4865_s30 }
 0x24c   : > { %v6055_v12 = vpop.permute.xlu1 %1867 }
 0x24d   : > { %v6059_v35 = vpop.permute.xlu0 %1869 }
 0x24e   : > { %3242 = vrot.lane.b32.xlu1 %v5813_v11, %s4868_s15  ;;  %v6078_v11 = vsel %vm1799_vm1, %v5614_v39, %v5628_v46 }
 0x24f   : > { %2058 = vrot.lane.b32.xlu0 %v2010_v9, %s4868_s15  ;;  %vm7343_vm10 = vcmp.ne.s16.totalorder %v6078_v11, 0  ;;  %v6094_v9 = vsel %vm1604_vm9, %v5653_v56, %v5896_v19 }
 0x250   : > { %v6080_v37 = vpop.permute.xlu1 %1931  ;;  %7442 = vst [vmem:[#allocation38_spill] sm:$0xff] %v6094_v9  ;;  %v1844_v5 = vsel %vm7343_vm10, %v5796_v20, 0  ;;  %vm1632_vm6 = vcmp.ne.s16.totalorder %v6094_v9, 0 }
 0x251   : > { %v6073_v27 = vpop.permute.xlu0 %2038  ;;  %v1994_v24 = vsel %vm1632_vm6, %v5796_v20, 0 }
 0x252   : > { %1875 = vrot.lane.b32.xlu1 %v5738_v62, %s4866_s8 }
 0x253   : > { %3256 = vrot.lane.b32.xlu0 %v3209_v43, %s4868_s15  ;;  %v1837_v43 = vsel %vm1820_vm3, %v5738_v62, 0  ;;  %v2012_v62 = vsel %vm7343_vm10, %v5815_v14, 0  ;;  %vm1628_vm10 = vcmp.ne.s16.totalorder %v6174_v41, 0 }
 0x254   : > { %v2115_v40 = vpop.permute.xlu1 %2114  ;;  %v1645_v54 = vsel %vm1628_vm10, %v5746_v0, 0 }
 0x255   : > { %v6089_v16 = vpop.permute.xlu0 %1933 }
 0x256   : > { %1877 = vrot.lane.b32.xlu1 %v5740_v21, %s4866_s8 }
 0x257   : > { %1953 = vrot.lane.b32.xlu0 %v1844_v5, %s4868_s15  ;;  %v2214_v5 = vsel %vm1799_vm1, %v2113_v33, %v2115_v40 }
 0x259   : > { %v6105_v23 = vpop.permute.xlu0 %2116 }
 0x25a   : > { %1939 = vrot.lane.b32.xlu1 %v1837_v43, %s4868_s15  ;;  %v2215_v56 = vsel %vm1799_vm1, %v2115_v40, %v6105_v23  ;;  %v1988_v40 = vsel %vm1626_vm2, %v5740_v21, 0 }
 0x25b   : > { %2314 = vmatprep.subr.bf16.mxu0 %v2215_v56  ;;  %2136 = vrot.lane.b32.xlu0 %v1994_v24, %s4865_s30  ;;  %v2005_v56 = vsel %vm1820_vm3, %v5740_v21, 0  ;;  %vm1826_vm3 = vcmp.ne.s16.totalorder %v6141_v26, 0 }
 0x25c   : > { %2315 = vmatpush1.bf16.msra.mxu0 %v2214_v5  ;;  %v1813_v5 = vsel %vm1799_vm1, %v5618_v42, %v5632_v50  ;;  %v3211_v39 = vsel %vm1826_vm3, %v5815_v14, 0 }
 0x25d   : > { %v6118_v43 = vpop.permute.xlu0 %2681  ;;  %vm1829_vm2 = vcmp.ne.s16.totalorder %v1813_v5, 0 }
 0x25e   : > { %2687 = vrot.lane.b32.xlu1 %v1643_v45, %s4865_s30  ;;  %7443 = vst [vmem:[#allocation39_spill] sm:$0xff] %v6118_v43  ;;  %v3204_v45 = vsel %vm1819_vm14, %v5740_v21, 0  ;;  %v6166_v21 = vsel %vm1604_vm9, %v5655_v57, %v5909_v36  ;;  %v1846_v50 = vsel %vm1829_vm2, %v5817_v1, 0 }
 0x25f   : > { %1891 = vrot.lane.b32.xlu0 %v5815_v14, %s4866_s8  ;;  %vm1634_vm14 = vcmp.ne.s16.totalorder %v6166_v21, 0 }
 0x261   : > { %v6126_v24 = vpop.permute.xlu0 %1873 }
 0x262   : > { %2048 = vrot.lane.b32.xlu1 %v2005_v56, %s4868_s15  ;;  %v1839_v56 = vsel %vm1822_vm12, %v5746_v0, 0  ;;  %v1990_v0 = vsel %vm1628_vm10, %v5754_v13, 0 }
 0x263   : > { %2062 = vrot.lane.b32.xlu0 %v2012_v62, %s4868_s15 }
 0x265   : > { %v6136_v33 = vpop.permute.xlu0 %2042 }
 0x266   : > { %2124 = vrot.lane.b32.xlu1 %v1988_v40, %s4865_s30  ;;  %v1996_v40 = vsel %vm1634_vm14, %v5817_v1, 0 }
 0x267   : > { %1893 = vrot.lane.b32.xlu0 %v5817_v1, %s4866_s8 }
 0x269   : > { %v6150_v3 = vpop.permute.xlu0 %3240 }
 0x26a   : > { %3246 = vrot.lane.b32.xlu1 %v3204_v45, %s4868_s15  ;;  %v2007_v45 = vsel %vm1822_vm12, %v5754_v13, 0  ;;  %vm1636_vm12 = vcmp.ne.s16.totalorder %v5657_v58, 0 }
 0x26b   : > { %3260 = vrot.lane.b32.xlu0 %v3211_v39, %s4868_s15 }
 0x26d   : > { %v6161_v8 = vpop.permute.xlu0 %1937 }
 0x26e   : > { %1881 = vrot.lane.b32.xlu1 %v5754_v13, %s4866_s8 }
 0x26f   : > { %1957 = vrot.lane.b32.xlu0 %v1846_v50, %s4868_s15  ;;  %v2014_v50 = vsel %vm1829_vm2, %v5820_v34, 0 }
 0x271   : > { %v6181_v62 = vpop.permute.xlu0 %2120 }
 0x272   : > { %1943 = vrot.lane.b32.xlu1 %v1839_v56, %s4868_s15 }
 0x273   : > { %2140 = vrot.lane.b32.xlu0 %v1996_v40, %s4865_s30  ;;  %v3206_v40 = vsel %vm1821_vm0, %v5754_v13, 0  ;;  %v3214_v13 = vsel %vm1829_vm2, %v5826_v49, 0 }
 0x275   : > { %v6192_v60 = vpop.permute.xlu0 %2685 }
 0x276   : > { %2691 = vrot.lane.b32.xlu1 %v1645_v54, %s4865_s30  ;;  %7444 = vst [vmem:[#allocation40_spill] sm:$0xff] %v6192_v60 }
 0x277   : > { %2018 = vrot.lane.b32.xlu0 %v5826_v49, %s4866_s8 }
 0x279   : > { %v6200_v39 = vpop.permute.xlu0 %2046 }
 0x27a   : > { %2052 = vrot.lane.b32.xlu1 %v2007_v45, %s4868_s15  ;;  %v1998_v45 = vsel %vm1636_vm12, %v5826_v49, 0 }
 0x27b   : > { %2066 = vrot.lane.b32.xlu0 %v2014_v50, %s4868_s15 }
 0x27d   : > { %v6209_v56 = vpop.permute.xlu0 %2122 }
 0x27e   : > { %2128 = vrot.lane.b32.xlu1 %v1990_v0, %s4865_s30  ;;  %v1991_v0 = vsel %vm1629_vm5, %v5778_v30, 0 }
 0x27f   : > { %1961 = vrot.lane.b32.xlu0 %v1848_v52, %s4868_s15  ;;  %v1898_v52 = vsel %vm1604_vm9, %v6055_v12, %v6059_v35 }
 0x281   : > { %v6220_v54 = vpop.permute.xlu0 %3244 }
 0x282   : > { %3250 = vrot.lane.b32.xlu1 %v3206_v40, %s4868_s15  ;;  %v1647_v40 = vsel %vm1630_vm13, %v5778_v30, 0  ;;  %v3208_v30 = vsel %vm1823_vm11, %v5786_v15, 0 }
 0x283   : > { %2144 = vrot.lane.b32.xlu0 %v1998_v45, %s4865_s30 }
 0x285   : > { %v6228_v44 = vpop.permute.xlu0 %1879 }
 0x286   : > { %1885 = vrot.lane.b32.xlu1 %v5786_v15, %s4866_s8 }
 0x287   : > { %3266 = vrot.lane.b32.xlu0 %v3214_v13, %s4868_s15  ;;  %v1965_v13 = vsel %vm1963_vm7, %v6080_v37, %v6089_v16 }
 0x289   : > { %v6237_v50 = vpop.permute.xlu0 %1941 }
 0x28a   : > { %1947 = vrot.lane.b32.xlu1 %v1841_v32, %s4868_s15  ;;  %v2009_v32 = vsel %vm1824_vm4, %v5786_v15, 0  ;;  %vm7454_vm4 = vcmp.ne.s16.totalorder %v5637_v51, 0  ;;  %v1897_v51 = vsel %vm1604_vm9, %v5659_v59, %v6055_v12 }
 0x28b   : > { %2146 = vrot.lane.b32.xlu0 %v6055_v12, %s4865_s30  ;;  %vm7457_vm2 = vmmov %vm7454_vm4 }
 0x28d   : > { %v6245_v5 = vpop.permute.xlu0 %2689 }
 0x28e   : > { %2130 = vrot.lane.b32.xlu1 %v1991_v0, %s4865_s30  ;;  %7445 = vst [vmem:[#allocation41_spill] sm:$0xff] %v6245_v5  ;;  %v1993_v5 = vsel %vm1631_vm15, %v5789_v10, 0 }
 0x28f   : > { %2148 = vrot.lane.b32.xlu0 %v1898_v52, %s4865_s30 }
 0x291   : > { %v6255_v45 = vpop.permute.xlu0 %2050 }
 0x292   : > { %2695 = vrot.lane.b32.xlu1 %v1647_v40, %s4865_s30  ;;  %v6273_v40 = vpop.permute.xlu1 %2679 }
 0x293   : > { %2719 = vrot.lane.b32.xlu0 %v1965_v13, %s4865_s30  ;;  %7447 = vst [vmem:[#allocation43_spill] sm:$0xff] %v6273_v40 }
 0x295   : > { %v6265_v0 = vpop.permute.xlu0 %2126 }
 0x296   : > { %2056 = vrot.lane.b32.xlu1 %v2009_v32, %s4868_s15  ;;  %v1843_v32 = vsel %vm1826_vm3, %v5789_v10, 0 }
 0x299   : > { %v6271_v52 = vpop.permute.xlu0 %3248 }
 0x29a   : > { %3254 = vrot.lane.b32.xlu1 %v3208_v30, %s4868_s15  ;;  %7446 = vst [vmem:[#allocation42_spill] sm:$0xff] %v6271_v52 }
 0x29d   : > { %v6277_v13 = vpop.permute.xlu0 %1945 }
 0x29e   : > { %1889 = vrot.lane.b32.xlu1 %v5796_v20, %s4866_s8 }
 0x2a0   : > { %v6279_v63 = vpop.permute.xlu1 %2715 }
 0x2a1   : > { %7448 = vst [vmem:[#allocation44_spill] sm:$0xff] %v6279_v63  ;;  %v6285_v15 = vpop.permute.xlu0 %2693 }
 0x2a2   : > { %1951 = vrot.lane.b32.xlu1 %v1843_v32, %s4868_s15  ;;  %7449 = vst [vmem:[#allocation45_spill] sm:$0xff] %v6285_v15  ;;  %v1649_v15 = vsel %vm1632_vm6, %v5789_v10, 0  ;;  %v1812_v10 = vsel %vm1799_vm1, %v5628_v46, %v5618_v42  ;;  %v6337_v42 = vsel %vm1604_vm9, %v5896_v19, %v5655_v57 }
 0x2a3   : > { %vm1828_vm0 = vcmp.ne.s16.totalorder %v1812_v10, 0  ;;  %vm1633_vm11 = vcmp.ne.s16.totalorder %v6337_v42, 0 }
 0x2a4   : > { %v6287_v17 = vpop.permute.xlu1 %1871  ;;  %v1845_v31 = vsel %vm1828_vm0, %v5815_v14, 0  ;;  %v1995_v57 = vsel %vm1633_vm11, %v5815_v14, 0 }
 0x2a5   : > { %v1900_v30 = vsel %vm1604_vm9, %v6287_v17, %v6126_v24  ;;  %v6297_v43 = vpop.permute.xlu0 %1883 }
 0x2a6   : > { %2152 = vrot.lane.b32.xlu0 %v1900_v30, %s4865_s30  ;;  %2134 = vrot.lane.b32.xlu1 %v1993_v5, %s4865_s30  ;;  %v2011_v5 = vsel %vm1826_vm3, %v5796_v20, 0 }
 0x2a8   : > { %v6299_v60 = vpop.permute.xlu1 %2040 }
 0x2a9   : > { %v2073_v32 = vsel %vm1963_vm7, %v6299_v60, %v6136_v33  ;;  %v6309_v63 = vpop.permute.xlu0 %2054 }
 0x2aa   : > { %2184 = vrot.lane.b32.xlu0 %v2073_v32, %s4865_s30  ;;  %2699 = vrot.lane.b32.xlu1 %v1649_v15, %s4865_s30  ;;  %v3210_v32 = vsel %vm1825_vm8, %v5796_v20, 0  ;;  %vm7453_vm8 = vcmp.ne.s16.totalorder %v6078_v11, 0 }
 0x2ac   : > { %v6311_v30 = vpop.permute.xlu1 %3238 }
 0x2ad   : > { %v6317_v40 = vpop.permute.xlu0 %3252 }
 0x2ae   : > { %2060 = vrot.lane.b32.xlu1 %v2011_v5, %s4868_s15  ;;  %7450 = vst [vmem:[#allocation46_spill] sm:$0xff] %v6317_v40 }
 0x2b0   : > { %v6319_v25 = vpop.permute.xlu1 %1935 }
 0x2b1   : > { %v1967_v15 = vsel %vm1963_vm7, %v6319_v25, %v6161_v8  ;;  %v6332_v26 = vpop.permute.xlu0 %1887 }
 0x2b2   : > { %2723 = vrot.lane.b32.xlu0 %v1967_v15, %s4865_s30  ;;  %3258 = vrot.lane.b32.xlu1 %v3210_v32, %s4868_s15 }
 0x2b4   : > { %v2119_v5 = vpop.permute.xlu1 %2118 }
 0x2b5   : > { %v2217_v46 = vsel %vm1799_vm1, %v2119_v5, %v6181_v62  ;;  %v2216_v15 = vsel %vm1799_vm1, %v6105_v23, %v2119_v5  ;;  %v6346_v32 = vpop.permute.xlu0 %1949 }
 0x2b6   : > { %2357 = vmatprep.subr.bf16.mxu1 %v2217_v46  ;;  %1955 = vrot.lane.b32.xlu1 %v1845_v31, %s4868_s15  ;;  %v2013_v31 = vsel %vm1828_vm0, %v5817_v1, 0 }
 0x2b7   : > { %2358 = vmatpush1.bf16.msra.mxu1 %v2216_v15 }
 0x2b8   : > { %v6349_v55 = vpop.permute.xlu1 %2683 }
 0x2b9   : > { %7451 = vst [vmem:[#allocation47_spill] sm:$0xff] %v6349_v55  ;;  %v6355_v19 = vpop.permute.xlu0 %2132  ;;  %v3212_v55 = vsel %vm7453_vm8, %v5817_v1, 0  ;;  %vm7465_vm8 = vcmp.ne.s16.totalorder %v5736_v61, 0 }
 0x2ba   : > { %2138 = vrot.lane.b32.xlu1 %v1995_v57, %s4865_s30 }
 0x2bc   : > { %v6357_v9 = vpop.permute.xlu1 %2044 }
 0x2bd   : > { %v2075_v23 = vsel %vm1963_vm7, %v6357_v9, %v6200_v39  ;;  %v6365_v5 = vpop.permute.xlu0 %2697 }
 0x2be   : > { %1895 = vrot.lane.b32.xlu1 %v5820_v34, %s4866_s8  ;;  %2188 = vrot.lane.b32.xlu0 %v2075_v23, %s4865_s30  ;;  %7452 = vst [vmem:[#allocation48_spill] sm:$0xff] %v6365_v5  ;;  %v6383_v5 = vsel %vm1604_vm9, %v5909_v36, %v5657_v58  ;;  %v7479_v58 = vld [vmem:[#allocation29_spill] sm:$0xff] }
 0x2bf   : > { %vm1635_vm3 = vcmp.ne.s16.totalorder %v6383_v5, 0 }
 0x2c0   : > { %v6367_v46 = vpop.permute.xlu1 %3242 }
 0x2c1   : > { %v6374_v57 = vpop.permute.xlu0 %2058 }
 0x2c2   : > { %2064 = vrot.lane.b32.xlu1 %v2013_v31, %s4868_s15  ;;  %v1847_v31 = vsel %vm7454_vm4, %v5820_v34, 0  ;;  %vm2310_vm4 = vcmask 392192  }
 0x2c4   : > { %v6372_v15 = vpop.permute.xlu1 %1875 }
 0x2c5   : > { %v6389_v28 = vpop.permute.xlu0 %3256 }
 0x2c6   : > { %3262 = vrot.lane.b32.xlu1 %v3212_v55, %s4868_s15  ;;  %7455 = vst [vmem:[#allocation49_spill] sm:$0xff] %v6389_v28  ;;  %v1997_v55 = vsel %vm1635_vm3, %v5820_v34, 0  ;;  %v3213_v28 = vsel %vm1828_vm0, %v5820_v34, 0  ;;  %vm7464_vm0 = vcmp.ne.s16.totalorder %v5675_v4, 0  ;;  %v4540_v4 = vld [vmem:[#allocation2 + $0x30] sm:$0xff] }
 0x2c8   : > { %v1878_v23 = vpop.permute.xlu1 %1877 }
 0x2c9   : > { %v1903_v40 = vsel %vm1604_vm9, %v1878_v23, %v6228_v44 }
 0x2ca   : > { %1959 = vrot.lane.b32.xlu1 %v1847_v31, %s4868_s15  ;;  %v6404_v31 = vpop.permute.xlu0 %1953 }
 0x2cc   : > { %v6392_v11 = vpop.permute.xlu1 %1939 }
 0x2cd   : > { %v1968_v36 = vsel %vm1963_vm7, %v6161_v8, %v6392_v11  ;;  %v2015_v8 = vsel %vm7457_vm2, %v5826_v49, 0  ;;  %vm7466_vm2 = vcmp.ne.s16.totalorder %v5843_v18, 0 }
 0x2ce   : > { %2142 = vrot.lane.b32.xlu1 %v1997_v55, %s4865_s30  ;;  %2725 = vrot.lane.b32.xlu0 %v1968_v36, %s4865_s30  ;;  %v6417_v36 = vpop.permute.xlu0 %2136  ;;  %v3170_v61 = vsel %vm7466_vm2, %v4540_v4, 0 }
 0x2cf   : > { %7458 = vst [vmem:[#allocation51_spill] sm:$0xff] %v6417_v36  ;;  %v1899_v36 = vsel %vm1604_vm9, %v6059_v35, %v6287_v17 }
 0x2d0   : > { %v6402_v2 = vpop.permute.xlu1 %2687 }
 0x2d1   : > { %7456 = vst [vmem:[#allocation50_spill] sm:$0xff] %v6402_v2 }
 0x2d2   : > { %3264 = vrot.lane.b32.xlu1 %v3213_v28, %s4868_s15  ;;  %2158 = vrot.lane.b32.xlu0 %v1903_v40, %s4865_s30  ;;  %v6425_v28 = vpop.permute.xlu0 %1891 }
 0x2d4   : > { %v2049_v52 = vpop.permute.xlu1 %2048 }
 0x2d5   : > { %v2077_v55 = vsel %vm1963_vm7, %v2049_v52, %v6255_v45 }
 0x2d6   : > { %2068 = vrot.lane.b32.xlu1 %v2015_v8, %s4868_s15  ;;  %2192 = vrot.lane.b32.xlu0 %v2077_v55, %s4865_s30  ;;  %v1964_v8 = vsel %vm1963_vm7, %v5966_v7, %v6080_v37  ;;  %v6436_v55 = vpop.permute.xlu0 %2062  ;;  %v2072_v7 = vsel %vm1963_vm7, %v6073_v27, %v6299_v60  ;;  %v2074_v60 = vsel %vm1963_vm7, %v6136_v33, %v6357_v9 }
 0x2d8   : > { %v6421_v10 = vpop.permute.xlu1 %2124 }
 0x2da   : > { %2180 = vrot.lane.b32.xlu1 %v6073_v27, %s4865_s30  ;;  %v6446_v59 = vpop.permute.xlu0 %1893 }
 0x2dc   : > { %v6427_v40 = vpop.permute.xlu1 %3246 }
 0x2dd   : > { %v3275_v4 = vsel %vm1963_vm7, %v6220_v54, %v6427_v40 }
 0x2de   : > { %2711 = vrot.lane.b32.xlu1 %v1897_v51, %s4865_s30  ;;  %v6462_v51 = vpop.permute.xlu0 %3260 }
 0x2e0   : > { %v1882_v49 = vpop.permute.xlu1 %1881 }
 0x2e1   : > { %v1905_v37 = vsel %vm1604_vm9, %v1882_v49, %v6297_v43 }
 0x2e2   : > { %2717 = vrot.lane.b32.xlu1 %v1964_v8, %s4865_s30  ;;  %v6472_v8 = vpop.permute.xlu0 %1957 }
 0x2e4   : > { %v1944_v2 = vpop.permute.xlu1 %1943 }
 0x2e5   : > { %v1970_v29 = vsel %vm1963_vm7, %v6237_v50, %v1944_v2 }
 0x2e6   : > { %2150 = vrot.lane.b32.xlu1 %v1899_v36, %s4865_s30  ;;  %2729 = vrot.lane.b32.xlu0 %v1970_v29, %s4865_s30  ;;  %v1966_v29 = vsel %vm1963_vm7, %v6089_v16, %v6319_v25  ;;  %v1901_v16 = vsel %vm1604_vm9, %v6126_v24, %v6372_v15  ;;  %v6484_v9 = vpop.permute.xlu0 %2140 }
 0x2e8   : > { %v6448_v12 = vpop.permute.xlu1 %2691 }
 0x2e9   : > { %7459 = vst [vmem:[#allocation52_spill] sm:$0xff] %v6448_v12 }
 0x2ea   : > { %2182 = vrot.lane.b32.xlu1 %v2072_v7, %s4865_s30  ;;  %2162 = vrot.lane.b32.xlu0 %v1905_v37, %s4865_s30  ;;  %v1902_v37 = vsel %vm1604_vm9, %v6372_v15, %v1878_v23  ;;  %v6494_v15 = vpop.permute.xlu0 %2018 }
 0x2ec   : > { %v2053_v17 = vpop.permute.xlu1 %2052 }
 0x2ed   : > { %v2079_v36 = vsel %vm1963_vm7, %v2053_v17, %v6309_v63 }
 0x2ee   : > { %2721 = vrot.lane.b32.xlu1 %v1966_v29, %s4865_s30  ;;  %2196 = vrot.lane.b32.xlu0 %v2079_v36, %s4865_s30  ;;  %v2076_v36 = vsel %vm1963_vm7, %v6200_v39, %v2049_v52  ;;  %v1904_v39 = vsel %vm1604_vm9, %v6228_v44, %v1882_v49  ;;  %v6506_v52 = vpop.permute.xlu0 %2066  ;;  %v1971_v44 = vsel %vm1963_vm7, %v1944_v2, %v6277_v13 }
 0x2f0   : > { %v6466_v27 = vpop.permute.xlu1 %2128 }
 0x2f2   : > { %2186 = vrot.lane.b32.xlu1 %v2074_v60, %s4865_s30  ;;  %v1969_v60 = vsel %vm1963_vm7, %v6392_v11, %v6237_v50  ;;  %v6515_v50 = vpop.permute.xlu0 %1961 }
 0x2f4   : > { %v6474_v25 = vpop.permute.xlu1 %3250 }
 0x2f6   : > { %2154 = vrot.lane.b32.xlu1 %v1901_v16, %s4865_s30 }
 0x2f8   : > { %v1886_v7 = vpop.permute.xlu1 %1885 }
 0x2f9   : > { %v1907_v29 = vsel %vm1604_vm9, %v1886_v7, %v6332_v26 }
 0x2fa   : > { %2156 = vrot.lane.b32.xlu1 %v1902_v37, %s4865_s30  ;;  %2166 = vrot.lane.b32.xlu0 %v1907_v29, %s4865_s30  ;;  %v2078_v29 = vsel %vm1963_vm7, %v6255_v45, %v2053_v17  ;;  %v1906_v45 = vsel %vm1604_vm9, %v6297_v43, %v1886_v7  ;;  %v6524_v17 = vpop.permute.xlu0 %2144 }
 0x2fc   : > { %v1948_v33 = vpop.permute.xlu1 %1947 }
 0x2fd   : > { %v1973_v24 = vsel %vm1963_vm7, %v1948_v33, %v6346_v32 }
 0x2fe   : > { %2190 = vrot.lane.b32.xlu1 %v2076_v36, %s4865_s30  ;;  %2735 = vrot.lane.b32.xlu0 %v1973_v24, %s4865_s30  ;;  %v6533_v2 = vpop.permute.xlu0 %3266 }
 0x300   : > { %v6496_v23 = vpop.permute.xlu1 %2130 }
 0x302   : > { %2727 = vrot.lane.b32.xlu1 %v1969_v60, %s4865_s30  ;;  %v1972_v60 = vsel %vm1963_vm7, %v6277_v13, %v1948_v33 }
 0x304   : > { %v6502_v16 = vpop.permute.xlu1 %2695 }
 0x305   : > { %7460 = vst [vmem:[#allocation53_spill] sm:$0xff] %v6502_v16 }
 0x306   : > { %2160 = vrot.lane.b32.xlu1 %v1904_v39, %s4865_s30 }
 0x308   : > { %v2057_v37 = vpop.permute.xlu1 %2056 }
 0x309   : > { %v2081_v36 = vsel %vm1963_vm7, %v2057_v37, %v6374_v57  ;;  %v2080_v43 = vsel %vm1963_vm7, %v6309_v63, %v2057_v37 }
 0x30a   : > { %2194 = vrot.lane.b32.xlu1 %v2078_v29, %s4865_s30  ;;  %2200 = vrot.lane.b32.xlu0 %v2081_v36, %s4865_s30  ;;  %v6547_v36 = vpop.permute.xlu0 %2146 }
 0x30c   : > { %v6517_v11 = vpop.permute.xlu1 %3254 }
 0x30e   : > { %2731 = vrot.lane.b32.xlu1 %v1971_v44, %s4865_s30 }
 0x310   : > { %v1890_v49 = vpop.permute.xlu1 %1889 }
 0x311   : > { %v1909_v7 = vsel %vm1604_vm9, %v1890_v49, %v6425_v28  ;;  %v1908_v33 = vsel %vm1604_vm9, %v6332_v26, %v1890_v49 }
 0x312   : > { %2164 = vrot.lane.b32.xlu1 %v1906_v45, %s4865_s30  ;;  %v6556_v45 = vpop.permute.xlu0 %2148 }
 0x314   : > { %v1952_v24 = vpop.permute.xlu1 %1951 }
 0x315   : > { %v1975_v39 = vsel %vm1963_vm7, %v1952_v24, %v6404_v31  ;;  %v1974_v63 = vsel %vm1963_vm7, %v6346_v32, %v1952_v24  ;;  %v1910_v32 = vsel %vm1604_vm9, %v6425_v28, %v6446_v59 }
 0x316   : > { %2733 = vrot.lane.b32.xlu1 %v1972_v60, %s4865_s30  ;;  %2739 = vrot.lane.b32.xlu0 %v1975_v39, %s4865_s30  ;;  %v6566_v24 = vpop.permute.xlu0 %2719 }
 0x317   : > { %7462 = vst [vmem:[#allocation55_spill] sm:$0xff] %v6566_v24  ;;  %v1651_v24 = vsel %vm1634_vm14, %v5815_v14, 0 }
 0x318   : > { %v6535_v29 = vpop.permute.xlu1 %2134 }
 0x31a   : > { %2198 = vrot.lane.b32.xlu1 %v2080_v43, %s4865_s30  ;;  %2170 = vrot.lane.b32.xlu0 %v1909_v7, %s4865_s30  ;;  %v6571_v43 = vpop.permute.xlu0 %2152 }
 0x31c   : > { %v6543_v13 = vpop.permute.xlu1 %2699 }
 0x31d   : > { %7461 = vst [vmem:[#allocation54_spill] sm:$0xff] %v6543_v13 }
 0x31e   : > { %2168 = vrot.lane.b32.xlu1 %v1908_v33, %s4865_s30 }
 0x320   : > { %v2061_v44 = vpop.permute.xlu1 %2060 }
 0x321   : > { %v2083_v37 = vsel %vm1963_vm7, %v2061_v44, %v6436_v55  ;;  %v2082_v26 = vsel %vm1963_vm7, %v6374_v57, %v2061_v44  ;;  %v6576_v57 = vpop.permute.xlu0 %2184 }
 0x322   : > { %2737 = vrot.lane.b32.xlu1 %v1974_v63, %s4865_s30  ;;  %2204 = vrot.lane.b32.xlu0 %v2083_v37, %s4865_s30 }
 0x324   : > { %v6558_v60 = vpop.permute.xlu1 %3258 }
 0x325   : > { %v2724_v63 = vpop.permute.xlu0 %2723 }
 0x326   : > { %2202 = vrot.lane.b32.xlu1 %v2082_v26, %s4865_s30 }
 0x328   : > { %v1956_v49 = vpop.permute.xlu1 %1955 }
 0x32a   : > { %2172 = vrot.lane.b32.xlu1 %v1910_v32, %s4865_s30 }
 0x32c   : > { %v6569_v39 = vpop.permute.xlu1 %2138 }
 0x330   : > { %v1896_v7 = vpop.permute.xlu1 %1895  ;;  %v6591_v32 = vpop.permute.xlu0 %2188 }
 0x331   : > { %v1911_v33 = vsel %vm1604_vm9, %v6446_v59, %v1896_v7  ;;  %v2020_v59 = vsel %vm1604_vm9, %v1896_v7, %v6494_v15 }
 0x332   : > { %2174 = vrot.lane.b32.xlu0 %v1911_v33, %s4865_s30 }
 0x334   : > { %v2065_v44 = vpop.permute.xlu1 %2064 }
 0x335   : > { %v2084_v28 = vsel %vm1963_vm7, %v6436_v55, %v2065_v44  ;;  %v2085_v26 = vsel %vm1963_vm7, %v2065_v44, %v6506_v52 }
 0x336   : > { %2178 = vrot.lane.b32.xlu0 %v6494_v15, %s4865_s30  ;;  %2206 = vrot.lane.b32.xlu1 %v2084_v28, %s4865_s30 }
 0x338   : > { %v6583_v37 = vpop.permute.xlu1 %3262 }
 0x33a   : > { %2208 = vrot.lane.b32.xlu0 %v2085_v26, %s4865_s30  ;;  %2176 = vrot.lane.b32.xlu1 %v2020_v59, %s4865_s30 }
 0x33c   : > { %v6593_v55 = vpop.permute.xlu1 %1959 }
 0x340   : > { %v6595_v33 = vpop.permute.xlu0 %2725  ;;  %v6597_v28 = vpop.permute.xlu1 %2142 }
 0x341   : > { %v6601_v13 = vsel %vm1799_vm1, %v2724_v63, %v6595_v33 }
 0x342   : > { %7463 = vst [vmem:[#allocation56_spill] sm:$0xff] %v6601_v13  ;;  %v1650_v13 = vsel %vm1633_vm11, %v5796_v20, 0  ;;  %v1976_v20 = vsel %vm1963_vm7, %v6404_v31, %v1956_v49  ;;  %v2230_v31 = vsel %vm1799_vm1, %v6547_v36, %v6556_v45 }
 0x344   : > { %v6603_v44 = vpop.permute.xlu1 %3264 }
 0x348   : > { %v2069_v12 = vpop.permute.xlu1 %2068 }
 0x349   : > { %v2087_v26 = vsel %vm1963_vm7, %v2069_v12, %v5954_v38  ;;  %v2086_v59 = vsel %vm1963_vm7, %v6506_v52, %v2069_v12  ;;  %v1653_v12 = vsel %vm1636_vm12, %v5820_v34, 0  ;;  %v1652_v52 = vsel %vm1635_vm3, %v5817_v1, 0 }
 0x34a   : > { %2212 = vrot.lane.b32.xlu0 %v2087_v26, %s4865_s30  ;;  %2210 = vrot.lane.b32.xlu1 %v2086_v59, %s4865_s30  ;;  %v1978_v34 = vsel %vm1963_vm7, %v6472_v8, %v6593_v55  ;;  %v1977_v1 = vsel %vm1963_vm7, %v1956_v49, %v6472_v8  ;;  %v4538_v8 = vld [vmem:[#allocation2 + $0x18] sm:$0xff]  ;;  %v4539_v59 = vld [vmem:[#allocation2 + $0x20] sm:$0xff] }
 0x34b   : > { %v3167_v49 = vsel %vm7464_vm0, %v4538_v8, 0  ;;  %vm7467_vm0 = vcmp.ne.s16.totalorder %v5641_v53, 0 }
 0x34c   : > { %v2181_v16 = vpop.permute.xlu1 %2180 }
 0x34e   : > { %2703 = vrot.lane.b32.xlu0 %v1651_v24, %s4865_s30  ;;  %2701 = vrot.lane.b32.xlu1 %v1650_v13, %s4865_s30 }
 0x350   : > { %v6619_v38 = vpop.permute.xlu1 %2711 }
 0x352   : > { %2707 = vrot.lane.b32.xlu0 %v1653_v12, %s4865_s30  ;;  %2705 = vrot.lane.b32.xlu1 %v1652_v52, %s4865_s30  ;;  %v3168_v12 = vsel %vm7465_vm8, %v4539_v59, 0  ;;  %vm7468_vm8 = vcmp.ne.s16.totalorder %v5862_v47, 0 }
 0x354   : > { %v6629_v14 = vpop.permute.xlu1 %2717 }
 0x356   : > { %2741 = vrot.lane.b32.xlu0 %v1976_v20, %s4865_s30  ;;  %2713 = vrot.lane.b32.xlu1 %v1896_v7, %s4865_s30 }
 0x358   : > { %v6635_v13 = vpop.permute.xlu1 %2150 }
 0x359   : > { %v6645_v24 = vsel %vm1799_vm1, %v6556_v45, %v6635_v13  ;;  %v6709_v53 = vsel %vm1799_vm1, %v6635_v13, %v6571_v43 }
 0x35a   : > { %2745 = vrot.lane.b32.xlu0 %v1978_v34, %s4865_s30  ;;  %2743 = vrot.lane.b32.xlu1 %v1977_v1, %s4865_s30  ;;  %v6673_v34 = vpop.permute.xlu0 %2158  ;;  %v2218_v1 = vsel %vm1799_vm1, %v6181_v62, %v6209_v56 }
 0x35b   : > { %2316 = vmatprep.subr.bf16.mxu0 %v6645_v24 }
 0x35c   : > { %2317 = vmatpush1.bf16.msra.mxu0 %v2230_v31  ;;  %v2183_v7 = vpop.permute.xlu1 %2182  ;;  %v6683_v31 = vld [vmem:[#allocation2 + $0x8] sm:$0xff] }
 0x35d   : > { %v2246_v26 = vsel %vm1799_vm1, %v2181_v16, %v2183_v7  ;;  %v2247_v52 = vsel %vm1799_vm1, %v2183_v7, %v6576_v57  ;;  %v2219_v16 = vsel %vm1799_vm1, %v6209_v56, %v6421_v10  ;;  %v3272_v56 = vsel %vm1963_vm7, %v6311_v30, %v6150_v3 }
 0x35e   : > { %3323 = vrot.lane.b32.xlu0 %v3167_v49, %s4865_s30  ;;  %3325 = vrot.lane.b32.xlu1 %v3168_v12, %s4865_s30  ;;  %v3182_v21 = vsel %vm1636_vm12, %v6683_v31, 0 }
 0x35f   : > { %2318 = vmatprep.subr.bf16.mxu0 %v2247_v52 }
 0x360   : > { %2319 = vmatpush1.bf16.msra.mxu0 %v2246_v26  ;;  %v6665_v36 = vpop.permute.xlu1 %2721  ;;  %v6693_v26 = vpop.permute.xlu0 %2192 }
 0x361   : > { %2400 = vmatprep.subr.bf16.mxu0 %v2219_v16  ;;  %v6671_v20 = vsel %vm1799_vm1, %v6665_v36, %v2724_v63  ;;  %v4542_v63 = vld [vmem:[#allocation2 + $0x10] sm:$0xff] }
 0x362   : > { %3327 = vrot.lane.b32.xlu0 %v5858_v22, %s4865_s30  ;;  %3329 = vrot.lane.b32.xlu1 %v3170_v61, %s4865_s30  ;;  %v3166_v7 = vsel %vm7467_vm0, %v4542_v63, 0  ;;  %v1979_v22 = vsel %vm1963_vm7, %v6593_v55, %v6515_v50 }
 0x363   : > { %4268 = vmatmul.mubr.msk.bf16.vlgmr.msra.gmra.mrb[16].mxu0 %vm2310_vm4, %v5920_v48 }
 0x364   : > { %2401 = vmatpush1.bf16.msra.mxu0 %v2218_v1  ;;  %v2187_v18 = vpop.permute.xlu1 %2186  ;;  %2432 = vmatprep.mubr.bf16.mxu0 %v6683_v31  ;;  %v6711_v50 = vpop.permute.xlu0 %2729 }
 0x365   : > { %v2249_v55 = vsel %vm1799_vm1, %v2187_v18, %v6591_v32  ;;  %v2248_v52 = vsel %vm1799_vm1, %v6576_v57, %v2187_v18  ;;  %v4543_v18 = vld [vmem:[#allocation2 + $0x38] sm:$0xff] }
 0x366   : > { %3321 = vrot.lane.b32.xlu0 %v3166_v7, %s4865_s30  ;;  %2747 = vrot.lane.b32.xlu1 %v1979_v22, %s4865_s30  ;;  %v3171_v63 = vsel %vm7468_vm8, %v4543_v18, 0  ;;  %v4544_v22 = vld [vmem:[#allocation2 + $0x50] sm:$0xff] }
 0x368   : > { %v2155_v62 = vpop.permute.xlu1 %2154  ;;  %v2163_v61 = vpop.permute.xlu0 %2162 }
 0x369   : > { %v6700_v8 = vsel %vm1799_vm1, %v6571_v43, %v2155_v62  ;;  %v3273_v43 = vsel %vm1963_vm7, %v6150_v3, %v6367_v46  ;;  %v2221_v3 = vsel %vm1799_vm1, %v6265_v0, %v6466_v27 }
 0x36a   : > { %3363 = vrot.lane.b32.xlu0 %v3272_v56, %s4865_s30  ;;  %3355 = vrot.lane.b32.xlu1 %v6059_v35, %s4865_s30  ;;  %v3274_v35 = vsel %vm1963_vm7, %v6367_v46, %v6220_v54  ;;  %v2223_v54 = vsel %vm1799_vm1, %v6496_v23, %v6355_v19  ;;  %v7469_v56 = vld [vmem:[#allocation28_spill] sm:$0xff] }
 0x36b   : > { %2359 = vmatprep.subr.bf16.mxu1 %v6700_v8  ;;  %vm7470_vm2 = vcmp.ne.s16.totalorder %v7469_v56, 0 }
 0x36c   : > { %2360 = vmatpush1.bf16.msra.mxu1 %v6709_v53  ;;  %v2157_v49 = vpop.permute.xlu1 %2156  ;;  %v2197_v47 = vpop.permute.xlu0 %2196 }
 0x36d   : > { %2361 = vmatprep.subr.bf16.mxu1 %v2249_v55  ;;  %v6717_v59 = vsel %vm1799_vm1, %v2155_v62, %v2157_v49  ;;  %v6727_v12 = vsel %vm1799_vm1, %v2157_v49, %v6673_v34  ;;  %v4545_v62 = vld [vmem:[#allocation2 + $0x48] sm:$0xff] }
 0x36e   : > { %3367 = vrot.lane.b32.xlu0 %v3274_v35, %s4865_s30  ;;  %3365 = vrot.lane.b32.xlu1 %v3273_v43, %s4865_s30  ;;  %v3173_v55 = vsel %vm7470_vm2, %v4545_v62, 0 }
 0x36f   : > { %2402 = vmatprep.subr.bf16.mxu0 %v6727_v12 }
 0x370   : > { %2362 = vmatpush1.bf16.msra.mxu1 %v2248_v52  ;;  %2403 = vmatpush1.bf16.msra.mxu0 %v6717_v59  ;;  %v2191_v46 = vpop.permute.xlu1 %2190  ;;  %v7471_v52 = vld [vmem:[#allocation51_spill] sm:$0xff] }
 0x371   : > { %2443 = vmatprep.subr.bf16.mxu1 %v2221_v3  ;;  %v2250_v16 = vsel %vm1799_vm1, %v6591_v32, %v2191_v46  ;;  %v2251_v57 = vsel %vm1799_vm1, %v2191_v46, %v6693_v26  ;;  %v2220_v32 = vsel %vm1799_vm1, %v6421_v10, %v6265_v0  ;;  %v2222_v10 = vsel %vm1799_vm1, %v6466_v27, %v6496_v23  ;;  %v4535_v27 = vld [vmem:[#allocation12 + $0x4] ss:$8 sps:$4 sm:$0xff]   ;;  %v4537_v23 = vld [vmem:[#allocation12] ss:$8 sps:$4 sm:$0xff]  }
 0x372   : > { %3361 = vrot.lane.b32.xlu0 %v6311_v30, %s4865_s30  ;;  %3369 = vrot.lane.b32.xlu1 %v3275_v4, %s4865_s30  ;;  %v2225_v3 = vsel %vm1799_vm1, %v6535_v29, %v7471_v52 }
 0x373   : > { %4269 = vmatmul.mubr.msk.bf16.vlgmr.msra.gmra.mrb[16].mxu1 %vm2310_vm4, %v5920_v48  ;;  %2404 = vmatprep.subr.bf16.mxu0 %v2251_v57 }
 0x374   : > { %2405 = vmatpush1.bf16.msra.mxu0 %v2250_v16  ;;  %2444 = vmatpush1.bf16.msra.mxu1 %v2220_v32  ;;  %v2728_v1 = vpop.permute.xlu1 %2727  ;;  %v7472_v16 = vld [vmem:[#allocation42_spill] sm:$0xff] }
 0x375   : > { %2486 = vmatprep.subr.bf16.mxu0 %v2223_v54  ;;  %v6758_v30 = vsel %vm1799_vm1, %v2728_v1, %v6711_v50  ;;  %2475 = vmatprep.mubr.bf16.mxu1 %v6683_v31  ;;  %v6765_v0 = vsel %vm1799_vm1, %v6595_v33, %v2728_v1  ;;  %v3277_v4 = vsel %vm1963_vm7, %v7472_v16, %v6474_v25 }
 0x376   : > { %3333 = vrot.lane.b32.xlu0 %v5870_v6, %s4865_s30  ;;  %3331 = vrot.lane.b32.xlu1 %v3171_v63, %s4865_s30  ;;  %v3174_v6 = vsel %vm1628_vm10, %v4544_v22, 0  ;;  %v2224_v54 = vsel %vm1799_vm1, %v6355_v19, %v6535_v29 }
 0x377   : > { %4270 = vmatmul.mubr.msk.bf16.vlgmr.msra.gmra.mrb[20].mxu0 %vm2310_vm4, %v5920_v48 }
 0x378   : > { %2487 = vmatpush1.bf16.msra.mxu0 %v2222_v10  ;;  %v2161_v7 = vpop.permute.xlu1 %2160  ;;  %2518 = vmatprep.mubr.bf16.mxu0 %v6683_v31 }
 0x379   : > { %v6778_v33 = vsel %vm1799_vm1, %v6673_v34, %v2161_v7  ;;  %v6785_v49 = vsel %vm1799_vm1, %v2161_v7, %v2163_v61  ;;  %v2167_v34 = vpop.permute.xlu0 %2166 }
 0x37a   : > { %3337 = vrot.lane.b32.xlu0 %v3174_v6, %s4865_s30  ;;  %3335 = vrot.lane.b32.xlu1 %v3173_v55, %s4865_s30  ;;  %v4547_v6 = vld [vmem:[#allocation2 + $0x58] sm:$0xff] }
 0x37b   : > { %2445 = vmatprep.subr.bf16.mxu1 %v6785_v49  ;;  %v3175_v56 = vsel %vm1629_vm5, %v4547_v6, 0  ;;  %v3282_v6 = vsel %vm1963_vm7, %v6558_v60, %v6462_v51  ;;  %vm3302_vm5 = vcmask 261120  }
 0x37c   : > { %2446 = vmatpush1.bf16.msra.mxu1 %v6778_v33  ;;  %v2195_v41 = vpop.permute.xlu1 %2194 }
 0x37d   : > { %v2252_v35 = vsel %vm1799_vm1, %v6693_v26, %v2195_v41  ;;  %v2253_v43 = vsel %vm1799_vm1, %v2195_v41, %v2197_v47  ;;  %v3276_v26 = vsel %vm1963_vm7, %v6427_v40, %v7472_v16  ;;  %v2736_v32 = vpop.permute.xlu0 %2735 }
 0x37e   : > { %3300 = vrot.lane.b32.xlu0 %v4535_v27, %s4869_s26  ;;  %3298 = vrot.lane.b32.xlu1 %v4537_v23, %s4869_s26 }
 0x37f   : > { %2447 = vmatprep.subr.bf16.mxu1 %v2253_v43  ;;  %v3220_v43 = vsel %vm1604_vm9, %v6494_v15, %v7479_v58 }
 0x380   : > { %2448 = vmatpush1.bf16.msra.mxu1 %v2252_v35  ;;  %v2732_v46 = vpop.permute.xlu1 %2731  ;;  %v4548_v35 = vld [vmem:[#allocation2 + $0x70] sm:$0xff] }
 0x381   : > { %2529 = vmatprep.subr.bf16.mxu1 %v2225_v3  ;;  %v6805_v57 = vsel %vm1799_vm1, %v6711_v50, %v2732_v46  ;;  %v7473_v50 = vld [vmem:[#allocation46_spill] sm:$0xff]  ;;  %v2201_v7 = vpop.permute.xlu0 %2200  ;;  %v3178_v3 = vsel %vm1632_vm6, %v4548_v35, 0  ;;  %v4552_v35 = vld [vmem:[#allocation2 + $0x88] sm:$0xff] }
 0x382   : > { %3373 = vrot.lane.b32.xlu0 %v3277_v4, %s4865_s30  ;;  %3371 = vrot.lane.b32.xlu1 %v3276_v26, %s4865_s30  ;;  %v3279_v18 = vsel %vm1963_vm7, %v7473_v50, %v6517_v11  ;;  %v3278_v63 = vsel %vm1963_vm7, %v6474_v25, %v7473_v50  ;;  %v3181_v42 = vsel %vm1635_vm3, %v4552_v35, 0  ;;  %v7488_v35 = vld [vmem:[#allocation50_spill] sm:$0xff] }
 0x383   : > { %4271 = vmatmul.mubr.msk.bf16.vlgmr.msra.gmra.mrb[20].mxu1 %vm2310_vm4, %v5920_v48 }
 0x384   : > { %2530 = vmatpush1.bf16.msra.mxu1 %v2224_v54  ;;  %v2165_v1 = vpop.permute.xlu1 %2164  ;;  %2561 = vmatprep.mubr.bf16.mxu1 %v6683_v31 }
 0x385   : > { %v6816_v40 = vsel %vm1799_vm1, %v2163_v61, %v2165_v1  ;;  %v6825_v10 = vsel %vm1799_vm1, %v2165_v1, %v2167_v34  ;;  %v4546_v61 = vld [vmem:[#allocation2 + $0x60] sm:$0xff] }
 0x386   : > { %3377 = vrot.lane.b32.xlu0 %v3279_v18, %s4865_s30  ;;  %3375 = vrot.lane.b32.xlu1 %v3278_v63, %s4865_s30  ;;  %v3176_v25 = vsel %vm1630_vm13, %v4546_v61, 0  ;;  %v7478_v18 = vld [vmem:[#allocation49_spill] sm:$0xff] }
 0x387   : > { %2488 = vmatprep.subr.bf16.mxu0 %v6825_v10  ;;  %v3281_v63 = vsel %vm1963_vm7, %v7478_v18, %v6558_v60 }
 0x388   : > { %2489 = vmatpush1.bf16.msra.mxu0 %v6816_v40  ;;  %v2734_v19 = vpop.permute.xlu1 %2733  ;;  %v6841_v27 = vpop.permute.xlu0 %2739 }
 0x389   : > { %v6832_v29 = vsel %vm1799_vm1, %v2732_v46, %v2734_v19  ;;  %v6839_v55 = vsel %vm1799_vm1, %v2734_v19, %v2736_v32  ;;  %v4549_v46 = vld [vmem:[#allocation2 + $0x68] sm:$0xff]  ;;  %v3280_v19 = vsel %vm1963_vm7, %v6517_v11, %v7478_v18 }
 0x38a   : > { %3341 = vrot.lane.b32.xlu0 %v3176_v25, %s4865_s30  ;;  %3339 = vrot.lane.b32.xlu1 %v3175_v56, %s4865_s30  ;;  %v3177_v4 = vsel %vm1631_vm15, %v4549_v46, 0  ;;  %v3283_v25 = vsel %vm1963_vm7, %v6462_v51, %v6583_v37  ;;  %v4550_v56 = vld [vmem:[#allocation2 + $0x80] sm:$0xff]  ;;  %v3285_v46 = vsel %vm1963_vm7, %v6603_v44, %v6533_v2 }
 0x38c   : > { %v2199_v23 = vpop.permute.xlu1 %2198  ;;  %v2171_v54 = vpop.permute.xlu0 %2170 }
 0x38d   : > { %v2254_v41 = vsel %vm1799_vm1, %v2197_v47, %v2199_v23  ;;  %v2255_v26 = vsel %vm1799_vm1, %v2199_v23, %v2201_v7  ;;  %v2227_v47 = vsel %vm1799_vm1, %v6569_v39, %v6484_v9  ;;  %v3180_v23 = vsel %vm1634_vm14, %v4550_v56, 0 }
 0x38e   : > { %3345 = vrot.lane.b32.xlu0 %v3178_v3, %s4865_s30  ;;  %3343 = vrot.lane.b32.xlu1 %v3177_v4, %s4865_s30  ;;  %v2766_v56 = vsel %vm1799_vm1, %v6619_v38, %v6556_v45  ;;  %v7489_v45 = vld [vmem:[#allocation40_spill] sm:$0xff] }
 0x38f   : > { %2490 = vmatprep.subr.bf16.mxu0 %v2255_v26  ;;  %v7480_v26 = vld [vmem:[#allocation34_spill] sm:$0xff] }
 0x390   : > { %2491 = vmatpush1.bf16.msra.mxu0 %v2254_v41  ;;  %v2169_v1 = vpop.permute.xlu1 %2168  ;;  %v4551_v41 = vld [vmem:[#allocation2 + $0x78] sm:$0xff] }
 0x391   : > { %2572 = vmatprep.subr.bf16.mxu0 %v2227_v47  ;;  %v6857_v50 = vsel %vm1799_vm1, %v2167_v34, %v2169_v1  ;;  %v6866_v61 = vsel %vm1799_vm1, %v2169_v1, %v2171_v54  ;;  %v2226_v34 = vsel %vm1799_vm1, %v7471_v52, %v6569_v39  ;;  %v3179_v51 = vsel %vm1633_vm11, %v4551_v41, 0  ;;  %v7481_v47 = vld [vmem:[#allocation36_spill] sm:$0xff] }
 0x392   : > { %3381 = vrot.lane.b32.xlu0 %v3281_v63, %s4865_s30  ;;  %3379 = vrot.lane.b32.xlu1 %v3280_v19, %s4865_s30 }
 0x393   : > { %4272 = vmatmul.mubr.msk.bf16.vlgmr.msra.gmra.mrb[24].mxu0 %vm2310_vm4, %v5920_v48  ;;  %2531 = vmatprep.subr.bf16.mxu1 %v6866_v61 }
 0x394   : > { %2532 = vmatpush1.bf16.msra.mxu1 %v6857_v50  ;;  %2573 = vmatpush1.bf16.msra.mxu0 %v2226_v34  ;;  %v2738_v11 = vpop.permute.xlu1 %2737  ;;  %v2205_v52 = vpop.permute.xlu0 %2204 }
 0x395   : > { %v6878_v22 = vsel %vm1799_vm1, %v2736_v32, %v2738_v11  ;;  %2604 = vmatprep.mubr.bf16.mxu0 %v6683_v31  ;;  %v6889_v39 = vsel %vm1799_vm1, %v2738_v11, %v6841_v27  ;;  %v3844_v11 = vld [vmem:[#allocation14] sm:$0xff] }
 0x396   : > { %3385 = vrot.lane.b32.xlu0 %v3283_v25, %s4865_s30  ;;  %3383 = vrot.lane.b32.xlu1 %v3282_v6, %s4865_s30  ;;  %v7482_v25 = vld [vmem:[#allocation43_spill] sm:$0xff]  ;;  %v7483_v6 = vld [vmem:[#allocation37_spill] sm:$0xff] }
 0x398   : > { %v2203_v32 = vpop.permute.xlu1 %2202 }
 0x399   : > { %v2256_v62 = vsel %vm1799_vm1, %v2201_v7, %v2203_v32  ;;  %v2257_v60 = vsel %vm1799_vm1, %v2203_v32, %v2205_v52  ;;  %v2229_v7 = vsel %vm1799_vm1, %v6597_v28, %v6524_v17  ;;  %v2228_v17 = vsel %vm1799_vm1, %v6484_v9, %v6597_v28 }
 0x39a   : > { %3349 = vrot.lane.b32.xlu0 %v3180_v23, %s4865_s30  ;;  %3347 = vrot.lane.b32.xlu1 %v3179_v51, %s4865_s30  ;;  %v3284_v9 = vsel %vm1963_vm7, %v6583_v37, %v6603_v44  ;;  %v3287_v37 = vsel %vm1963_vm7, %v7481_v47, %v7480_v26  ;;  %v3286_v44 = vsel %vm1963_vm7, %v6533_v2, %v7481_v47  ;;  %v7485_v23 = vld [vmem:[#allocation30_spill] sm:$0xff]  ;;  %v7486_v51 = vld [vmem:[#allocation55_spill] sm:$0xff] }
 0x39b   : > { %2533 = vmatprep.subr.bf16.mxu1 %v2257_v60  ;;  %v2750_v32 = vsel %vm1799_vm1, %v7483_v6, %v7482_v25  ;;  %v2765_v41 = vsel %vm1799_vm1, %v7485_v23, %v6619_v38  ;;  %v2769_v60 = vsel %vm1799_vm1, %v6629_v14, %v7486_v51 }
 0x39c   : > { %2534 = vmatpush1.bf16.msra.mxu1 %v2256_v62  ;;  %v2173_v5 = vpop.permute.xlu1 %2172  ;;  %v7484_v62 = vld [vmem:[#allocation32_spill] sm:$0xff] }
 0x39d   : > { %2615 = vmatprep.subr.bf16.mxu1 %v2229_v7  ;;  %v6938_v15 = vsel %vm1799_vm1, %v2171_v54, %v2173_v5  ;;  %v3845_v54 = vld [vmem:[#allocation14 + $0x8] sm:$0xff]  ;;  %v7487_v7 = vld [vmem:[#allocation44_spill] sm:$0xff] }
 0x39e   : > { %3353 = vrot.lane.b32.xlu0 %v3182_v21, %s4865_s30  ;;  %3351 = vrot.lane.b32.xlu1 %v3181_v42, %s4865_s30  ;;  %v2768_v21 = vsel %vm1799_vm1, %v7487_v7, %v6629_v14  ;;  %v2754_v42 = vsel %vm1799_vm1, %v7489_v45, %v7488_v35  ;;  %v7490_v14 = vld [vmem:[#allocation47_spill] sm:$0xff] }
 0x39f   : > { %4273 = vmatmul.mubr.msk.bf16.vlgmr.msra.gmra.mrb[24].mxu1 %vm2310_vm4, %v5920_v48 }
 0x3a0   : > { %2616 = vmatpush1.bf16.msra.mxu1 %v2228_v17  ;;  %2647 = vmatprep.mubr.bf16.mxu1 %v6683_v31 }
 0x3a2   : > { %3359 = vrot.lane.b32.xlu0 %v7479_v58, %s4865_s30  ;;  %3357 = vrot.lane.b32.xlu1 %v3220_v43, %s4865_s30 }
 0x3a4   : > { %v6923_v3 = vpop.permute.xlu0 %2174 }
 0x3a5   : > { %v6933_v28 = vsel %vm1799_vm1, %v2173_v5, %v6923_v3  ;;  %v6988_v5 = vld [vmem:[#allocation12] ss:$8 sps:$4 sm:$0xff]  }
 0x3a6   : > { %3389 = vrot.lane.b32.xlu0 %v3285_v46, %s4865_s30  ;;  %3387 = vrot.lane.b32.xlu1 %v3284_v9, %s4865_s30  ;;  %v2753_v46 = vsel %vm1799_vm1, %v7490_v14, %v7489_v45  ;;  %v7491_v9 = vld [vmem:[#allocation39_spill] sm:$0xff] }
 0x3a7   : > { %2574 = vmatprep.subr.bf16.mxu0 %v6933_v28  ;;  %v2751_v47 = vsel %vm1799_vm1, %v7482_v25, %v7491_v9  ;;  %v7496_v25 = vld [vmem:[#allocation41_spill] sm:$0xff] }
 0x3a8   : > { %2575 = vmatpush1.bf16.msra.mxu0 %v6938_v15  ;;  %v2179_v16 = vpop.permute.xlu0 %2178  ;;  %v2207_v4 = vpop.permute.xlu1 %2206 }
 0x3a9   : > { %v2258_v2 = vsel %vm1799_vm1, %v2205_v52, %v2207_v4  ;;  %v2749_v52 = vsel %vm1799_vm1, %v7484_v62, %v7483_v6 }
 0x3aa   : > { %3393 = vrot.lane.b32.xlu0 %v3287_v37, %s4865_s30  ;;  %3391 = vrot.lane.b32.xlu1 %v3286_v44, %s4865_s30 }
 0x3ac   : > { %v2209_v1 = vpop.permute.xlu0 %2208  ;;  %v6950_v18 = vpop.permute.xlu1 %2176 }
 0x3ad   : > { %v2259_v63 = vsel %vm1799_vm1, %v2207_v4, %v2209_v1  ;;  %v2245_v19 = vsel %vm1799_vm1, %v6950_v18, %v2179_v16  ;;  %v6958_v34 = vsel %vm1799_vm1, %v6923_v3, %v6950_v18  ;;  %v2752_v16 = vsel %vm1799_vm1, %v7491_v9, %v7490_v14 }
 0x3ae   : > { %3853 = vperm.xlu0 %4527, %v3845_v54   ;;  %2576 = vmatprep.subr.bf16.mxu0 %v2259_v63  ;;  %v7493_v54 = vld [vmem:[#allocation53_spill] sm:$0xff] }
 0x3af   : > { %2617 = vmatprep.subr.bf16.mxu1 %v2245_v19  ;;  %2577 = vmatpush1.bf16.msra.mxu0 %v2258_v2 }
 0x3b0   : > { %2618 = vmatpush1.bf16.msra.mxu1 %v6958_v34  ;;  %2822 = vmatprep.subr.bf16.mxu0 %v2750_v32 }
 0x3b1   : > { %3848 = vperm.xlu1 %4528, %v3844_v11  }
 0x3b2   : > { %4274 = vmatmul.mubr.msk.bf16.vlgmr.msra.gmra.mrb[28].mxu0 %vm2310_vm4, %v5920_v48 }
 0x3b3   : > { %2823 = vmatpush1.bf16.msra.mxu0 %v2749_v52  ;;  %2854 = vmatprep.mubr.bf16.mxu0 %v6683_v31 }
 0x3b4   : > { %2824 = vmatprep.subr.bf16.mxu0 %v2766_v56 }
 0x3b7   : > { %2825 = vmatpush1.bf16.msra.mxu0 %v2765_v41 }
 0x3b8   : > { %2826 = vmatprep.subr.bf16.mxu0 %v2769_v60 }
 0x3bb   : > { %2827 = vmatpush1.bf16.msra.mxu0 %v2768_v21 }
 0x3bc   : > { %v2213_v17 = vpop.permute.xlu0 %2212  ;;  %2908 = vmatprep.subr.bf16.mxu0 %v2754_v42  ;;  %v2211_v58 = vpop.permute.xlu1 %2210 }
 0x3bd   : > { %v2260_v38 = vsel %vm1799_vm1, %v2209_v1, %v2211_v58  ;;  %v2261_v43 = vsel %vm1799_vm1, %v2211_v58, %v2213_v17  ;;  %v7494_v1 = vld [vmem:[#allocation45_spill] sm:$0xff] }
 0x3be   : > { %2619 = vmatprep.subr.bf16.mxu1 %v2261_v43  ;;  %4276 = vmatmul.mubr.msk.bf16.vlgmr.msra.gmra.mrb[16].mxu0 %vm2310_vm4, %v6988_v5  ;;  %v2758_v63 = vsel %vm1799_vm1, %v7494_v1, %v7493_v54 }
 0x3bf   : > { %2620 = vmatpush1.bf16.msra.mxu1 %v2260_v38  ;;  %2909 = vmatpush1.bf16.msra.mxu0 %v2753_v46 }
 0x3c0   : > { %v6998_v4 = vpop.permute.xlu0 %2703  ;;  %2865 = vmatprep.subr.bf16.mxu1 %v2752_v16  ;;  %2910 = vmatprep.subr.bf16.mxu0 %v6717_v59  ;;  %v2702_v26 = vpop.permute.xlu1 %2701 }
 0x3c1   : > { %2940 = vmatprep.mubr.bf16.mxu0 %v6683_v31  ;;  %v2762_v56 = vsel %vm1799_vm1, %v2702_v26, %v6998_v4 }
 0x3c2   : > { %4275 = vmatmul.mubr.msk.bf16.vlgmr.msra.gmra.mrb[28].mxu1 %vm2310_vm4, %v5920_v48  ;;  %v7492_v48 = vld [vmem:[#allocation56_spill] sm:$0xff] }
 0x3c3   : > { %2866 = vmatpush1.bf16.msra.mxu1 %v2751_v47  ;;  %2911 = vmatpush1.bf16.msra.mxu0 %v6700_v8 }
 0x3c4   : > { %v7008_v37 = vpop.permute.xlu0 %2707  ;;  %2867 = vmatprep.subr.bf16.mxu1 %v6709_v53  ;;  %2912 = vmatprep.subr.bf16.mxu0 %v6765_v0  ;;  %v7012_v44 = vpop.permute.xlu1 %2705  ;;  %v2770_v0 = vsel %vm1799_vm1, %v7486_v51, %v6665_v36  ;;  %v2755_v36 = vsel %vm1799_vm1, %v7488_v35, %v7496_v25  ;;  %v7497_v51 = vld [vmem:[#allocation54_spill] sm:$0xff] }
 0x3c5   : > { %2897 = vmatprep.mubr.bf16.mxu1 %v6683_v31 }
 0x3c7   : > { %2868 = vmatpush1.bf16.msra.mxu1 %v6645_v24  ;;  %2913 = vmatpush1.bf16.msra.mxu0 %v7492_v48  ;;  %v7495_v24 = vld [vmem:[#allocation52_spill] sm:$0xff] }
 0x3c8   : > { %v2742_v19 = vpop.permute.xlu0 %2741  ;;  %2869 = vmatprep.subr.bf16.mxu1 %v6671_v20  ;;  %2994 = vmatprep.subr.bf16.mxu0 %v2758_v63  ;;  %v7021_v2 = vpop.permute.xlu1 %2713  ;;  %v2757_v11 = vsel %vm1799_vm1, %v7495_v24, %v7494_v1  ;;  %v2756_v20 = vsel %vm1799_vm1, %v7496_v25, %v7495_v24 }
 0x3c9   : > { %v2780_v42 = vsel %vm1799_vm1, %v6841_v27, %v2742_v19  ;;  %v2764_v27 = vsel %vm1799_vm1, %v7012_v44, %v7008_v37 }
 0x3ca   : > { %4278 = vmatmul.mubr.msk.bf16.vlgmr.msra.gmra.mrb[20].mxu0 %vm2310_vm4, %v6988_v5 }
 0x3cb   : > { %2870 = vmatpush1.bf16.msra.mxu1 %v2770_v0  ;;  %2995 = vmatpush1.bf16.msra.mxu0 %v2757_v11 }
 0x3cc   : > { %v7034_v6 = vpop.permute.xlu0 %2745  ;;  %2951 = vmatprep.subr.bf16.mxu1 %v2756_v20  ;;  %2996 = vmatprep.subr.bf16.mxu0 %v6816_v40  ;;  %v7037_v32 = vpop.permute.xlu1 %2743 }
 0x3cd   : > { %3026 = vmatprep.mubr.bf16.mxu0 %v6683_v31 }
 0x3ce   : > { %4277 = vmatmul.mubr.msk.bf16.vlgmr.msra.gmra.mrb[16].mxu1 %vm2310_vm4, %v6988_v5 }
 0x3cf   : > { %2952 = vmatpush1.bf16.msra.mxu1 %v2755_v36  ;;  %2997 = vmatpush1.bf16.msra.mxu0 %v6785_v49 }
 0x3d0   : > { %v3324_v62 = vpop.permute.xlu0 %3323  ;;  %2953 = vmatprep.subr.bf16.mxu1 %v6778_v33  ;;  %2998 = vmatprep.subr.bf16.mxu0 %v6839_v55  ;;  %v7048_v52 = vpop.permute.xlu1 %3325  ;;  %v2761_v55 = vsel %vm1799_vm1, %v7497_v51, %v2702_v26 }
 0x3d1   : > { %2983 = vmatprep.mubr.bf16.mxu1 %v6683_v31  ;;  %v3396_v17 = vsel %vm1799_vm1, %v3324_v62, %v7048_v52 }
 0x3d3   : > { %2954 = vmatpush1.bf16.msra.mxu1 %v6727_v12  ;;  %2999 = vmatpush1.bf16.msra.mxu0 %v6832_v29  ;;  %v7498_v29 = vld [vmem:[#allocation48_spill] sm:$0xff] }
 0x3d4   : > { %v7055_v23 = vpop.permute.xlu0 %3327  ;;  %2955 = vmatprep.subr.bf16.mxu1 %v6805_v57  ;;  %3080 = vmatprep.subr.bf16.mxu0 %v2762_v56  ;;  %v7058_v41 = vpop.permute.xlu1 %3329  ;;  %v2760_v60 = vsel %vm1799_vm1, %v7498_v29, %v7497_v51  ;;  %v2759_v21 = vsel %vm1799_vm1, %v7493_v54, %v7498_v29 }
 0x3d5   : > { %v3398_v48 = vsel %vm1799_vm1, %v7055_v23, %v7058_v41 }
 0x3d6   : > { %4280 = vmatmul.mubr.msk.bf16.vlgmr.msra.gmra.mrb[24].mxu0 %vm2310_vm4, %v6988_v5 }
 0x3d7   : > { %2956 = vmatpush1.bf16.msra.mxu1 %v6758_v30  ;;  %3081 = vmatpush1.bf16.msra.mxu0 %v2761_v55  ;;  %v2781_v30 = vsel %vm1799_vm1, %v2742_v19, %v7037_v32  ;;  %v3397_v19 = vsel %vm1799_vm1, %v7048_v52, %v7055_v23 }
 0x3d8   : > { %v3322_v7 = vpop.permute.xlu0 %3321  ;;  %3037 = vmatprep.subr.bf16.mxu1 %v2760_v60  ;;  %3082 = vmatprep.subr.bf16.mxu0 %v6938_v15  ;;  %v2748_v57 = vpop.permute.xlu1 %2747 }
 0x3d9   : > { %3112 = vmatprep.mubr.bf16.mxu0 %v6683_v31  ;;  %v3395_v43 = vsel %vm1799_vm1, %v3322_v7, %v3324_v62 }
 0x3da   : > { %4279 = vmatmul.mubr.msk.bf16.vlgmr.msra.gmra.mrb[20].mxu1 %vm2310_vm4, %v6988_v5 }
 0x3db   : > { %3038 = vmatpush1.bf16.msra.mxu1 %v2759_v21  ;;  %3083 = vmatpush1.bf16.msra.mxu0 %v6866_v61 }
 0x3dc   : > { %v3364_v35 = vpop.permute.xlu0 %3363  ;;  %3039 = vmatprep.subr.bf16.mxu1 %v6857_v50  ;;  %3084 = vmatprep.subr.bf16.mxu0 %v2781_v30  ;;  %v3356_v45 = vpop.permute.xlu1 %3355 }
 0x3dd   : > { %3069 = vmatprep.mubr.bf16.mxu1 %v6683_v31  ;;  %v3411_v9 = vsel %vm1799_vm1, %v3356_v45, %v6635_v13  ;;  %v2783_v13 = vsel %vm1799_vm1, %v7034_v6, %v2748_v57 }
 0x3df   : > { %3040 = vmatpush1.bf16.msra.mxu1 %v6825_v10  ;;  %3085 = vmatpush1.bf16.msra.mxu0 %v2780_v42 }
 0x3e0   : > { %v7085_v58 = vpop.permute.xlu0 %3367  ;;  %3041 = vmatprep.subr.bf16.mxu1 %v6889_v39  ;;  %3468 = vmatprep.subr.bf16.mxu0 %v3396_v17  ;;  %v3366_v38 = vpop.permute.xlu1 %3365  ;;  %v2763_v39 = vsel %vm1799_vm1, %v6998_v4, %v7012_v44  ;;  %v2782_v44 = vsel %vm1799_vm1, %v7037_v32, %v7034_v6 }
 0x3e2   : > { %4282 = vmatmul.mubr.msk.bf16.vlgmr.msra.gmra.mrb[28].mxu0 %vm2310_vm4, %v6988_v5 }
 0x3e3   : > { %3042 = vmatpush1.bf16.msra.mxu1 %v6878_v22  ;;  %3469 = vmatpush1.bf16.msra.mxu0 %v3395_v43  ;;  %v2767_v22 = vsel %vm1799_vm1, %v6923_v3, %v7021_v2 }
 0x3e4   : > { %v3362_v14 = vpop.permute.xlu0 %3361  ;;  %3123 = vmatprep.subr.bf16.mxu1 %v2764_v27  ;;  %3470 = vmatprep.subr.bf16.mxu0 %v6709_v53  ;;  %v3370_v46 = vpop.permute.xlu1 %3369  ;;  %v3415_v53 = vsel %vm1799_vm1, %v3364_v35, %v3366_v38 }
 0x3e5   : > { %3500 = vmatprep.mubr.bf16.mxu0 %v6683_v31  ;;  %v3414_v4 = vsel %vm1799_vm1, %v3362_v14, %v3364_v35 }
 0x3e6   : > { %4281 = vmatmul.mubr.msk.bf16.vlgmr.msra.gmra.mrb[24].mxu1 %vm2310_vm4, %v6988_v5 }
 0x3e7   : > { %3124 = vmatpush1.bf16.msra.mxu1 %v2763_v39  ;;  %3471 = vmatpush1.bf16.msra.mxu0 %v3411_v9 }
 0x3e8   : > { %v3334_v16 = vpop.permute.xlu0 %3333  ;;  %3125 = vmatprep.subr.bf16.mxu1 %v2767_v22  ;;  %3472 = vmatprep.subr.bf16.mxu0 %v3415_v53  ;;  %v3332_v26 = vpop.permute.xlu1 %3331 }
 0x3e9   : > { %3155 = vmatprep.mubr.bf16.mxu1 %v6683_v31  ;;  %v3400_v47 = vsel %vm1799_vm1, %v3332_v26, %v3334_v16  ;;  %v3399_v2 = vsel %vm1799_vm1, %v7058_v41, %v3332_v26 }
 0x3eb   : > { %3126 = vmatpush1.bf16.msra.mxu1 %v6933_v28  ;;  %3473 = vmatpush1.bf16.msra.mxu0 %v3414_v4 }
 0x3ec   : > { %v3338_v37 = vpop.permute.xlu0 %3337  ;;  %3127 = vmatprep.subr.bf16.mxu1 %v2783_v13  ;;  %3554 = vmatprep.subr.bf16.mxu0 %v3400_v47  ;;  %v3336_v3 = vpop.permute.xlu1 %3335 }
 0x3ed   : > { %v3402_v6 = vsel %vm1799_vm1, %v3336_v3, %v3338_v37  ;;  %v3401_v62 = vsel %vm1799_vm1, %v3334_v16, %v3336_v3 }
 0x3ef   : > { %3128 = vmatpush1.bf16.msra.mxu1 %v2782_v44 }
 0x3f0   : > { %v3301_v54 = vpop.permute.xlu0 %3300  ;;  %3511 = vmatprep.subr.bf16.mxu1 %v3398_v48  ;;  %v3299_v1 = vpop.permute.xlu1 %3298 }
 0x3f1   : > { %v7120_v63 = vsel %vm3302_vm5, %v3299_v1, %v3301_v54 }
 0x3f2   : > { %4286 = vmatmul.mubr.msk.bf16.vlgmr.msra.gmra.mrb[16].mxu0 %vm2310_vm4, %v7120_v63  ;;  %4283 = vmatmul.mubr.msk.bf16.vlgmr.msra.gmra.mrb[28].mxu1 %vm2310_vm4, %v6988_v5  ;;  %v3417_v5 = vsel %vm1799_vm1, %v7085_v58, %v3370_v46 }
 0x3f3   : > { %3555 = vmatpush1.bf16.msra.mxu0 %v3399_v2  ;;  %3512 = vmatpush1.bf16.msra.mxu1 %v3397_v19 }
 0x3f4   : > { %3556 = vmatprep.subr.bf16.mxu0 %v6778_v33  ;;  %v3374_v0 = vpop.permute.xlu0 %3373  ;;  %3513 = vmatprep.subr.bf16.mxu1 %v6717_v59  ;;  %v3372_v24 = vpop.permute.xlu1 %3371  ;;  %v3416_v59 = vsel %vm1799_vm1, %v3366_v38, %v7085_v58 }
 0x3f5   : > { %v3419_v11 = vsel %vm1799_vm1, %v3372_v24, %v3374_v0  ;;  %3586 = vmatprep.mubr.bf16.mxu0 %v6683_v31  ;;  %3543 = vmatprep.mubr.bf16.mxu1 %v6683_v31  ;;  %v3418_v20 = vsel %vm1799_vm1, %v3370_v46, %v3372_v24 }
 0x3f7   : > { %3557 = vmatpush1.bf16.msra.mxu0 %v6727_v12  ;;  %3514 = vmatpush1.bf16.msra.mxu1 %v6700_v8 }
 0x3f8   : > { %3558 = vmatprep.subr.bf16.mxu0 %v3419_v11  ;;  %v3378_v25 = vpop.permute.xlu0 %3377  ;;  %3515 = vmatprep.subr.bf16.mxu1 %v3417_v5  ;;  %v3376_v33 = vpop.permute.xlu1 %3375 }
 0x3f9   : > { %v3421_v23 = vsel %vm1799_vm1, %v3376_v33, %v3378_v25  ;;  %v3420_v29 = vsel %vm1799_vm1, %v3374_v0, %v3376_v33 }
 0x3fb   : > { %3559 = vmatpush1.bf16.msra.mxu0 %v3418_v20  ;;  %3516 = vmatpush1.bf16.msra.mxu1 %v3416_v59 }
 0x3fc   : > { %v3342_v32 = vpop.permute.xlu0 %3341  ;;  %3597 = vmatprep.subr.bf16.mxu1 %v3402_v6  ;;  %v3340_v12 = vpop.permute.xlu1 %3339 }
 0x3fd   : > { %v3403_v8 = vsel %vm1799_vm1, %v3338_v37, %v3340_v12  ;;  %v3404_v36 = vsel %vm1799_vm1, %v3340_v12, %v3342_v32 }
 0x3fe   : > { %4288 = vmatmul.mubr.msk.bf16.vlgmr.msra.gmra.mrb[20].mxu0 %vm2310_vm4, %v7120_v63  ;;  %4287 = vmatmul.mubr.msk.bf16.vlgmr.msra.gmra.mrb[16].mxu1 %vm2310_vm4, %v7120_v63 }
 0x3ff   : > { %3640 = vmatprep.subr.bf16.mxu0 %v3404_v36  ;;  %3598 = vmatpush1.bf16.msra.mxu1 %v3401_v62 }
 0x400   : > { %3641 = vmatpush1.bf16.msra.mxu0 %v3403_v8  ;;  %v3346_v52 = vpop.permute.xlu0 %3345  ;;  %3599 = vmatprep.subr.bf16.mxu1 %v6816_v40  ;;  %v3344_v56 = vpop.permute.xlu1 %3343 }
 0x401   : > { %3642 = vmatprep.subr.bf16.mxu0 %v6857_v50  ;;  %3629 = vmatprep.mubr.bf16.mxu1 %v6683_v31  ;;  %v3406_v50 = vsel %vm1799_vm1, %v3344_v56, %v3346_v52  ;;  %v3405_v7 = vsel %vm1799_vm1, %v3342_v32, %v3344_v56 }
 0x402   : > { %3672 = vmatprep.mubr.bf16.mxu0 %v6683_v31 }
 0x403   : > { %3600 = vmatpush1.bf16.msra.mxu1 %v6785_v49 }
 0x404   : > { %3643 = vmatpush1.bf16.msra.mxu0 %v6825_v10  ;;  %v3382_v41 = vpop.permute.xlu0 %3381  ;;  %3601 = vmatprep.subr.bf16.mxu1 %v3421_v23  ;;  %v3380_v51 = vpop.permute.xlu1 %3379 }
 0x405   : > { %v3422_v55 = vsel %vm1799_vm1, %v3378_v25, %v3380_v51  ;;  %v3423_v40 = vsel %vm1799_vm1, %v3380_v51, %v3382_v41 }
 0x406   : > { %3644 = vmatprep.subr.bf16.mxu0 %v3423_v40 }
 0x407   : > { %3602 = vmatpush1.bf16.msra.mxu1 %v3420_v29 }
 0x408   : > { %3645 = vmatpush1.bf16.msra.mxu0 %v3422_v55  ;;  %v3386_v60 = vpop.permute.xlu0 %3385  ;;  %3683 = vmatprep.subr.bf16.mxu1 %v3406_v50  ;;  %v3384_v49 = vpop.permute.xlu1 %3383 }
 0x409   : > { %v3425_v35 = vsel %vm1799_vm1, %v3384_v49, %v3386_v60  ;;  %v3424_v42 = vsel %vm1799_vm1, %v3382_v41, %v3384_v49 }
 0x40a   : > { %4289 = vmatmul.mubr.msk.bf16.vlgmr.msra.gmra.mrb[20].mxu1 %vm2310_vm4, %v7120_v63 }
 0x40b   : > { %4290 = vmatmul.mubr.msk.bf16.vlgmr.msra.gmra.mrb[24].mxu0 %vm2310_vm4, %v7120_v63  ;;  %3684 = vmatpush1.bf16.msra.mxu1 %v3405_v7 }
 0x40c   : > { %v3350_v10 = vpop.permute.xlu0 %3349  ;;  %3685 = vmatprep.subr.bf16.mxu1 %v6938_v15  ;;  %v3348_v57 = vpop.permute.xlu1 %3347  ;;  %3715 = vmatprep.mubr.bf16.mxu1 %v6683_v31 }
 0x40d   : > { %v3407_v21 = vsel %vm1799_vm1, %v3346_v52, %v3348_v57  ;;  %v3408_v30 = vsel %vm1799_vm1, %v3348_v57, %v3350_v10  ;;  %3758 = vmatprep.mubr.bf16.mxu0 %v6683_v31 }
 0x40e   : > { %3726 = vmatprep.subr.bf16.mxu0 %v3408_v30 }
 0x40f   : > { %3686 = vmatpush1.bf16.msra.mxu1 %v6866_v61  ;;  %3727 = vmatpush1.bf16.msra.mxu0 %v3407_v21 }
 0x410   : > { %v3354_v45 = vpop.permute.xlu0 %3353  ;;  %3687 = vmatprep.subr.bf16.mxu1 %v3425_v35  ;;  %3728 = vmatprep.subr.bf16.mxu0 %v6958_v34  ;;  %v3352_v15 = vpop.permute.xlu1 %3351 }
 0x411   : > { %v3410_v17 = vsel %vm1799_vm1, %v3352_v15, %v3354_v45  ;;  %v3409_v61 = vsel %vm1799_vm1, %v3350_v10, %v3352_v15 }
 0x413   : > { %3688 = vmatpush1.bf16.msra.mxu1 %v3424_v42  ;;  %3729 = vmatpush1.bf16.msra.mxu0 %v6933_v28 }
 0x414   : > { %v3360_v58 = vpop.permute.xlu0 %3359  ;;  %3769 = vmatprep.subr.bf16.mxu1 %v3410_v17  ;;  %v3358_v38 = vpop.permute.xlu1 %3357 }
 0x415   : > { %v3413_v43 = vsel %vm1799_vm1, %v3358_v38, %v3360_v58  ;;  %v3412_v46 = vsel %vm1799_vm1, %v6950_v18, %v3358_v38 }
 0x416   : > { %4291 = vmatmul.mubr.msk.bf16.vlgmr.msra.gmra.mrb[24].mxu1 %vm2310_vm4, %v7120_v63 }
 0x417   : > { %3770 = vmatpush1.bf16.msra.mxu1 %v3409_v61  ;;  %3801 = vmatprep.mubr.bf16.mxu1 %v6683_v31 }
 0x418   : > { %v3390_v34 = vpop.permute.xlu0 %3389  ;;  %3771 = vmatprep.subr.bf16.mxu1 %v3413_v43  ;;  %v3388_v27 = vpop.permute.xlu1 %3387 }
 0x419   : > { %v3426_v28 = vsel %vm1799_vm1, %v3386_v60, %v3388_v27  ;;  %v3427_v14 = vsel %vm1799_vm1, %v3388_v27, %v3390_v34 }
 0x41a   : > { %3730 = vmatprep.subr.bf16.mxu0 %v3427_v14 }
 0x41b   : > { %3731 = vmatpush1.bf16.msra.mxu0 %v3426_v28  ;;  %3772 = vmatpush1.bf16.msra.mxu1 %v3412_v46 }
 0x41c   : > { %v3394_v39 = vpop.permute.xlu0 %3393  ;;  %v3392_v9 = vpop.permute.xlu1 %3391 }
 0x41d   : > { %v3428_v22 = vsel %vm1799_vm1, %v3390_v34, %v3392_v9  ;;  %v3429_v31 = vsel %vm1799_vm1, %v3392_v9, %v3394_v39 }
 0x41e   : > { %4292 = vmatmul.mubr.msk.bf16.vlgmr.msra.gmra.mrb[28].mxu0 %vm2310_vm4, %v7120_v63  ;;  %3773 = vmatprep.subr.bf16.mxu1 %v3429_v31 }
 0x41f   : > { %3774 = vmatpush1.bf16.msra.mxu1 %v3428_v22 }
 0x422   : > { %4293 = vmatmul.mubr.msk.bf16.vlgmr.msra.gmra.mrb[28].mxu1 %vm2310_vm4, %v7120_v63 }
 0x42d   : > { %v7196_v4 = vpop.permute.xlu0 %3853 }
 0x430   : > { %v7193_v53 = vpop.permute.xlu1 %3848 }
 0x4c5   : > { %v3502_v18 = vpop.f32.mrb[16].mxu0 }
 0x4c6   : > { %v3504_v16 = vpop.f32.mrb[17].mxu0  ;;  %v3856_v26 = vadd.f32 %v7193_v53, %v3502_v18 }
 0x4c7   : > { %v3857_v13 = vadd.f32 %v7193_v53, %v3504_v16  ;;  %v3506_v47 = vpop.f32.mrb[18].mxu0 }
 0x4c8   : > { %v3888_v37 = vmax.f32 %v3856_v26, 0.0  ;;  %v3872_v3 = vadd.f32 %v7196_v4, %v3506_v47  ;;  %v3508_v44 = vpop.f32.mrb[19].mxu0 }
 0x4c9   : > { %v3889_v48 = vmax.f32 %v3857_v13, 0.0  ;;  %v3873_v54 = vadd.f32 %v7196_v4, %v3508_v44 }
 0x4ca   : > { %v3904_v1 = vmax.f32 %v3872_v3, 0.0 }
 0x4cb   : > { %v4319_v63 = vpack.c.bf16 %v3889_v48, %v3888_v37  ;;  %v3905_v19 = vmax.f32 %v3873_v54, 0.0 }
 0x4cd   : > { %4016 = vst [vmem:[%s7202_s16] sm:$0xff] %v4319_v63  ;;  %v4327_v2 = vpack.c.bf16 %v3905_v19, %v3904_v1 }
 0x4cf   : > { %4024 = vst [vmem:[%s7202_s16 + $0x40] sm:$0xff] %v4327_v2 }
 0x4d1   : > { %v3588_v0 = vpop.f32.mrb[20].mxu0  ;;  %v3545_v24 = vpop.f32.mrb[16].mxu1 }
 0x4d2   : > { %v3860_v11 = vadd.f32 %v7193_v53, %v3588_v0  ;;  %v3858_v5 = vadd.f32 %v7193_v53, %v3545_v24  ;;  %v3590_v25 = vpop.f32.mrb[21].mxu0  ;;  %v3547_v33 = vpop.f32.mrb[17].mxu1 }
 0x4d3   : > { %v3861_v59 = vadd.f32 %v7193_v53, %v3590_v25  ;;  %v3859_v20 = vadd.f32 %v7193_v53, %v3547_v33  ;;  %v3592_v6 = vpop.f32.mrb[22].mxu0  ;;  %v3549_v32 = vpop.f32.mrb[18].mxu1 }
 0x4d4   : > { %v3892_v12 = vmax.f32 %v3860_v11, 0.0  ;;  %v3890_v8 = vmax.f32 %v3858_v5, 0.0  ;;  %v3876_v36 = vadd.f32 %v7196_v4, %v3592_v6  ;;  %v3874_v62 = vadd.f32 %v7196_v4, %v3549_v32  ;;  %v3594_v52 = vpop.f32.mrb[23].mxu0  ;;  %v3551_v56 = vpop.f32.mrb[19].mxu1 }
 0x4d5   : > { %v3893_v23 = vmax.f32 %v3861_v59, 0.0  ;;  %v3891_v41 = vmax.f32 %v3859_v20, 0.0  ;;  %v3877_v51 = vadd.f32 %v7196_v4, %v3594_v52  ;;  %v3875_v55 = vadd.f32 %v7196_v4, %v3551_v56 }
 0x4d6   : > { %v3908_v40 = vmax.f32 %v3876_v36, 0.0  ;;  %v3906_v29 = vmax.f32 %v3874_v62, 0.0 }
 0x4d7   : > { %v4321_v50 = vpack.c.bf16 %v3893_v23, %v3892_v12  ;;  %v4320_v60 = vpack.c.bf16 %v3891_v41, %v3890_v8  ;;  %v3909_v49 = vmax.f32 %v3877_v51, 0.0  ;;  %v3907_v7 = vmax.f32 %v3875_v55, 0.0 }
 0x4d9   : > { %4018 = vst [vmem:[%s7202_s16 + $0x10] sm:$0xff] %v4321_v50  ;;  %4017 = vst [vmem:[%s7202_s16 + $0x8] sm:$0xff] %v4320_v60  ;;  %v4329_v10 = vpack.c.bf16 %v3909_v49, %v3908_v40  ;;  %v4328_v57 = vpack.c.bf16 %v3907_v7, %v3906_v29 }
 0x4db   : > { %4026 = vst [vmem:[%s7202_s16 + $0x50] sm:$0xff] %v4329_v10  ;;  %4025 = vst [vmem:[%s7202_s16 + $0x48] sm:$0xff] %v4328_v57 }
 0x4dd   : > { %v3631_v21 = vpop.f32.mrb[20].mxu1 }
 0x4de   : > { %v3862_v30 = vadd.f32 %v7193_v53, %v3631_v21  ;;  %v3674_v35 = vpop.f32.mrb[24].mxu0  ;;  %v3633_v45 = vpop.f32.mrb[21].mxu1 }
 0x4df   : > { %v3864_v15 = vadd.f32 %v7193_v53, %v3674_v35  ;;  %v3863_v42 = vadd.f32 %v7193_v53, %v3633_v45  ;;  %v3676_v17 = vpop.f32.mrb[25].mxu0  ;;  %v3635_v58 = vpop.f32.mrb[22].mxu1 }
 0x4e0   : > { %v3894_v38 = vmax.f32 %v3862_v30, 0.0  ;;  %v3865_v61 = vadd.f32 %v7193_v53, %v3676_v17  ;;  %v3878_v43 = vadd.f32 %v7196_v4, %v3635_v58  ;;  %v3678_v34 = vpop.f32.mrb[26].mxu0  ;;  %v3637_v27 = vpop.f32.mrb[23].mxu1 }
 0x4e1   : > { %v3896_v28 = vmax.f32 %v3864_v15, 0.0  ;;  %v3895_v14 = vmax.f32 %v3863_v42, 0.0  ;;  %v3880_v46 = vadd.f32 %v7196_v4, %v3678_v34  ;;  %v3879_v39 = vadd.f32 %v7196_v4, %v3637_v27  ;;  %v3680_v9 = vpop.f32.mrb[27].mxu0 }
 0x4e2   : > { %v3897_v22 = vmax.f32 %v3865_v61, 0.0  ;;  %v3910_v31 = vmax.f32 %v3878_v43, 0.0  ;;  %v3881_v18 = vadd.f32 %v7196_v4, %v3680_v9 }
 0x4e3   : > { %v4322_v16 = vpack.c.bf16 %v3895_v14, %v3894_v38  ;;  %v3912_v26 = vmax.f32 %v3880_v46, 0.0  ;;  %v3911_v13 = vmax.f32 %v3879_v39, 0.0 }
 0x4e4   : > { %v4323_v47 = vpack.c.bf16 %v3897_v22, %v3896_v28  ;;  %v3913_v37 = vmax.f32 %v3881_v18, 0.0 }
 0x4e5   : > { %4019 = vst [vmem:[%s7202_s16 + $0x18] sm:$0xff] %v4322_v16  ;;  %v4330_v3 = vpack.c.bf16 %v3911_v13, %v3910_v31 }
 0x4e6   : > { %4020 = vst [vmem:[%s7202_s16 + $0x20] sm:$0xff] %v4323_v47  ;;  %v4331_v44 = vpack.c.bf16 %v3913_v37, %v3912_v26 }
 0x4e7   : > { %4027 = vst [vmem:[%s7202_s16 + $0x58] sm:$0xff] %v4330_v3 }
 0x4e8   : > { %4028 = vst [vmem:[%s7202_s16 + $0x60] sm:$0xff] %v4331_v44 }
 0x4e9   : > { %v3717_v48 = vpop.f32.mrb[24].mxu1 }
 0x4ea   : > { %v3866_v54 = vadd.f32 %v7193_v53, %v3717_v48  ;;  %v3719_v1 = vpop.f32.mrb[25].mxu1 }
 0x4eb   : > { %v3867_v63 = vadd.f32 %v7193_v53, %v3719_v1  ;;  %v3721_v19 = vpop.f32.mrb[26].mxu1 }
 0x4ec   : > { %v3898_v2 = vmax.f32 %v3866_v54, 0.0  ;;  %v3882_v0 = vadd.f32 %v7196_v4, %v3721_v19  ;;  %v3723_v24 = vpop.f32.mrb[27].mxu1 }
 0x4ed   : > { %v3899_v11 = vmax.f32 %v3867_v63, 0.0  ;;  %v3883_v5 = vadd.f32 %v7196_v4, %v3723_v24 }
 0x4ee   : > { %v3914_v25 = vmax.f32 %v3882_v0, 0.0 }
 0x4ef   : > { %v4324_v33 = vpack.c.bf16 %v3899_v11, %v3898_v2  ;;  %v3915_v59 = vmax.f32 %v3883_v5, 0.0 }
 0x4f1   : > { %4021 = vst [vmem:[%s7202_s16 + $0x28] sm:$0xff] %v4324_v33  ;;  %v4332_v20 = vpack.c.bf16 %v3915_v59, %v3914_v25  ;;  %v3760_v6 = vpop.f32.mrb[28].mxu0 }
 0x4f2   : > { %v3868_v32 = vadd.f32 %v7193_v53, %v3760_v6  ;;  %v3762_v12 = vpop.f32.mrb[29].mxu0 }
 0x4f3   : > { %4029 = vst [vmem:[%s7202_s16 + $0x68] sm:$0xff] %v4332_v20  ;;  %v3869_v8 = vadd.f32 %v7193_v53, %v3762_v12  ;;  %v3764_v36 = vpop.f32.mrb[30].mxu0 }
 0x4f4   : > { %v3900_v62 = vmax.f32 %v3868_v32, 0.0  ;;  %v3884_v52 = vadd.f32 %v7196_v4, %v3764_v36  ;;  %v3766_v56 = vpop.f32.mrb[31].mxu0 }
 0x4f5   : > { %v3901_v23 = vmax.f32 %v3869_v8, 0.0  ;;  %v3885_v41 = vadd.f32 %v7196_v4, %v3766_v56  ;;  %v3803_v51 = vpop.f32.mrb[28].mxu1 }
 0x4f6   : > { %v3916_v55 = vmax.f32 %v3884_v52, 0.0  ;;  %v3870_v40 = vadd.f32 %v7193_v53, %v3803_v51  ;;  %v3805_v29 = vpop.f32.mrb[29].mxu1 }
 0x4f7   : > { %v4325_v50 = vpack.c.bf16 %v3901_v23, %v3900_v62  ;;  %v3917_v60 = vmax.f32 %v3885_v41, 0.0  ;;  %v3871_v49 = vadd.f32 %v7193_v53, %v3805_v29  ;;  %v3807_v7 = vpop.f32.mrb[30].mxu1 }
 0x4f8   : > { %v3902_v10 = vmax.f32 %v3870_v40, 0.0  ;;  %v3886_v57 = vadd.f32 %v7196_v4, %v3807_v7  ;;  %v3809_v21 = vpop.f32.mrb[31].mxu1 }
 0x4f9   : > { %4022 = vst [vmem:[%s7202_s16 + $0x30] sm:$0xff] %v4325_v50  ;;  %v4333_v30 = vpack.c.bf16 %v3917_v60, %v3916_v55  ;;  %v3903_v35 = vmax.f32 %v3871_v49, 0.0  ;;  %v3887_v45 = vadd.f32 %v7196_v4, %v3809_v21 }
 0x4fa   : > { %v3918_v15 = vmax.f32 %v3886_v57, 0.0 }
 0x4fb   : > { %4030 = vst [vmem:[%s7202_s16 + $0x70] sm:$0xff] %v4333_v30  ;;  %v4326_v42 = vpack.c.bf16 %v3903_v35, %v3902_v10  ;;  %v3919_v53 = vmax.f32 %v3887_v45, 0.0 }
 0x4fd   : > { %4023 = vst [vmem:[%s7202_s16 + $0x38] sm:$0xff] %v4326_v42  ;;  %v4334_v17 = vpack.c.bf16 %v3919_v53, %v3918_v15 }
 0x4ff   : > { %4031 = vst [vmem:[%s7202_s16 + $0x78] sm:$0xff] %v4334_v17 }
 0x500   : > { %4769 = shalt.err (!%p4766_p5)
}
 0x501   : > { %s4770_s23 = scalar_lea.hbm %s7251_s5, 2048  ;;  %s4774_s11 = scalar_lea.hbm %s7311_s7, 4096 }
 0x502   : > { %p4771_p10 = scmp.ne.s32.totalorder %s7251_s5, %s4770_s23  ;;  %p4775_p1 = scmp.lt.u32.totalorder %s7251_s5, %s7311_s7 }
 0x503   : > { %p4776_p9 = scmp.lt.u32.totalorder %s4774_s11, %s4770_s23  ;;  %p4778_p12 = scmp.lt.u32.totalorder %s4770_s23, %s7251_s5 }
 0x504   : > { %p4772_p8 = pnand %p4771_p10, %p7499_p7 }
 0x505   : > { %p4777_p11 = por %p4776_p9, %p4775_p1 }
 0x506   : > { %p4773_p13 = pneg %p4772_p8 }
 0x507   : > { %p4779_p6 = por %p4778_p12, %p4777_p11 }
 0x509   : > { %p4780_p3 = pnand %p4779_p6, %p4773_p13 }
 0x50b   : > { %4783 = shalt.err (!%p4780_p3)
}
 0x50c   : > { %s4871_s30 = smov 1024   ;;  %s4872_s8 = smov 64  }
 0x50d   : > { %4423 = dma.vmem_to_hbm [thread:$0]  (%p7499_p7), %s7253_s17, 2048, %s7251_s5, %s4033_s14, %s4871_s30, %s4871_s30, %s4872_s8  }
 0x50e PF: > { %s7500_s20 = sld [smem:[#allocation21_spill]]  ;;  %s7501_s15 = sld [smem:[#allocation27_spill]] }
 0x50f   : > { %s7502_s26 = sld [smem:[#allocation24_spill]] }
 0x514   : > { %s4063_s3 = sand.u32 1, %s7500_s20   ;;  %p7503_p0 = scmp.ne.s32.totalorder %s7501_s15, 0 }
 0x515   : > { %p7504_p4 = scmp.ge.s32.totalorder %s7502_s26, 2  ;;  %s4064_s16 = scalar_lea.sflag [#allocation5], %s4063_s3 }
 0x517   : > { %p4449_p2 = pnand %p7504_p4, %p7503_p0 }
 0x519   : > { %4825 = dma.done.wait (!%p4449_p2), %s4064_s16, 2048  }
 0x51a   : > { %4827 = vsyncadd (!%p4449_p2), %s4064_s16, 4294965248  ;;  %s28_s29 = sadd.s32 1, %s7502_s26   ;;  %s7505_s12 = sld [smem:[#allocation22_spill]] }
 0x51b   : > { %p25_p5 = scmp.ge.s32.totalorder %s28_s29, 4   ;;  %s7506_s26 = sld [smem:[#allocation26_spill]] }
 0x51c   : > { %s7507_s27 = sld [smem:[#allocation23_spill]]  ;;  %s7508_s28 = sld [smem:[#allocation25_spill]] }
 0x51d   : > { %s7509_s24 = smov %s4834_s25  ;;  %27 = sbr.rel (!%p25_p5) target bundleno = 14 (0xe), region = 149 }
 0x520   : > { %s7510_s25 = smov %s7505_s12 }
 0x524   :  { %4069 = vsyncpa [#allocation4], 1 }
 0x525   :  { %4071 = vsyncpa [#allocation4 + $0x1], 1 }
 0x526   :  { %4072 = vsyncpa [#allocation7], 1 }
 0x527   :  { %4074 = vsyncpa [#allocation7 + $0x1], 1 }
 0x528   :  { %4075 = vsyncpa [#allocation10], 1 }
 0x529   :  { %4076 = vsyncpa [#allocation13], 1 }
 0x52a   :  { %4077 = vsyncpa [#allocation5], 1 }
 0x52b   :  { %4079 = vsyncpa [#allocation5 + $0x1], 1 }

</bundles_post_ra>
